<compile_context>
chip_gen: v7x
topology: tpu7x:2x2x1
jax: 0.10.0
libtpu: 0.0.40
codegen_flags: <defaults>
</compile_context>

<pallas_src>
import jax
import jax.numpy as jnp
from jax.experimental import pallas as pl
from jax.experimental.pallas import tpu as pltpu

_LOG2 = 0.6931471805599453


def _ssp(x):
    # shifted softplus: log(1 + exp(x)) - log(2), numerically stable
    return jnp.maximum(x, 0.0) + jnp.log1p(jnp.exp(-jnp.abs(x))) - _LOG2


# ----------------------------------------------------------------------------
# Pallas kernel: one grid step handles a tile of `td` destination nodes and
# all of their (dense) incoming edges.  Everything — the four MLP matmuls,
# the edge gating, the masked-mean aggregation — runs inside the kernel.
# ----------------------------------------------------------------------------
def _schnet_conv_kernel(bf_ref, eh_ref, adj_ref, nh_ref,
                        w1_ref, b1_ref, w2_ref, b2_ref,
                        w3_ref, b3_ref, w4_ref, b4_ref,
                        out_ref):
    td, n, f = eh_ref.shape

    # ---- edge MLPs: bf16 operands straight into the MXU, f32 accumulation ----
    # bf_ref is the pre-flattened [td*N, R] bf16 tile; w1/w2 are bf16.
    x = jnp.dot(bf_ref[...], w1_ref[...],
                preferred_element_type=jnp.float32) + b1_ref[...]
    x = _ssp(x)                                                  # FGN_MLP1 (f32)
    x = jnp.dot(x.astype(jnp.bfloat16), w2_ref[...],
                preferred_element_type=jnp.float32) + b2_ref[...]
    x = _ssp(x)                                                  # FGN_MLP2 (f32)

    # ---- g.edata['h'] = bf * g.edata['h'] ------------------------------------
    eh = x.reshape(td, n, f) * eh_ref[...].astype(jnp.float32)   # [td, N, F]

    # ---- update_all(u_mul_e('h','h','m'), mean('m','h')) ---------------------
    # message m[d, s] = node_h[s] * edge_h[d, s]; masked mean over in-edges.
    # VPU multiply + XLU sublane reduce + EUP reciprocal (no F-wide divide).
    adj = adj_ref[...].astype(jnp.float32)                       # [td, N]
    m = eh * nh_ref[...][None, :, :] * adj[:, :, None]           # [td, N, F]
    deg = jnp.sum(adj, axis=1, keepdims=True)                    # [td, 1]
    inv_deg = pl.reciprocal(jnp.maximum(deg, 1.0), approx=True)  # EUP, ~free
    agg = jnp.sum(m, axis=1) * inv_deg                           # [td, F]

    # ---- IB_MLP1 / IB_MLP2 (tiny, f32) ---------------------------------------
    y = _ssp(jnp.dot(agg, w3_ref[...], preferred_element_type=jnp.float32)
             + b3_ref[...])
    out_ref[...] = _ssp(jnp.dot(y, w4_ref[...], preferred_element_type=jnp.float32)
                        + b4_ref[...])


# ----------------------------------------------------------------------------
# Tiling / VMEM sizing helpers (generation-aware)
# ----------------------------------------------------------------------------
def _vmem_capacity_bytes():
    """Physical VMEM per TensorCore (128 MiB v5e/v6e, 64 MiB v7x)."""
    try:
        return int(pltpu.get_tpu_info().vmem_capacity_bytes)
    except Exception:
        return 64 << 20   # conservative (v7x-sized) fallback


def _choose_td(n, r, f, *, vmem_budget_bytes, target_steps=8):
    """Destination-tile size: (a) divides N, (b) multiple of 8 (sublanes),
    (c) double-buffered bf16 tiles + f32 temporaries fit the VMEM budget,
    (d) prefer the largest tile that still leaves >= target_steps grid steps
        (>= 4 per v7x TensorCore) so the tile DMA is never exposed; for small
        graphs fall back to the smallest tile to maximise pipeline depth."""
    per_row = n * (2 * 2 * r        # double-buffered bf16 bf rows
                   + 2 * 2 * f      # double-buffered bf16 eh rows
                   + 2 * 2          # double-buffered bf16 adj row
                   + 4 * 3 * f)     # f32 temporaries (x, gated eh, messages)
    cap = max(8, vmem_budget_bytes // max(per_row, 1))
    divisors = [t for t in range(8, n + 1, 8) if n % t == 0]
    fits = [t for t in divisors if t <= cap]
    if not fits:
        return 8 if n % 8 == 0 else n
    deep = [t for t in fits if n // t >= target_steps]
    if deep:
        return max(deep)            # biggest tile with a deep enough pipeline
    return min(fits)                # small graph: maximise grid steps instead


def _vmem_limit_bytes(td, n, r, f, o, vmem_cap_bytes):
    tiles = 2 * td * n * (r + f + 1) * 2        # double-buffered bf16 bf/eh/adj
    tiles += 2 * td * o * 4                     # double-buffered f32 out
    resident = n * f * 4                        # nh (grid-invariant)
    weights = 2 * (2 * (r * f + f * f)          # bf16 w1 / w2
                   + 4 * (f * o + o * o))       # f32  w3 / w4
    biases = 2 * 4 * (2 * f + 2 * o)
    temps = td * n * 3 * f * 4 + td * (f + o) * 4
    need = tiles + resident + weights + biases + temps
    # Leave ~15% headroom for compiler-internal scratch (never request the
    # whole physical VMEM, especially on v7x's 64 MiB per core).
    ceiling = int(vmem_cap_bytes * 0.85)
    return int(min(ceiling, max(32 << 20, 2 * need)))


# ----------------------------------------------------------------------------
# Host wrapper
# ----------------------------------------------------------------------------
def schnet_conv(bf, eh, adj, nh, params, *, td=None):
    """Dense-graph SchnetConv forward.  Returns [N, out_feats] float32.

    NOTE: the N^2-sized edge tensors (bf, eh, adj) are streamed as bfloat16
    (halves the HBM traffic this kernel is bound on); this is an intentional
    accuracy decision mirrored by `schnet_conv_ref`."""
    N, N2, R = bf.shape
    F = nh.shape[1]
    O = params['w3'].shape[1]
    assert N == N2 and eh.shape == (N, N, F) and adj.shape == (N, N)
    assert N % 8 == 0, "N must be a multiple of 8 (sublane layout)"
    # The original module wires IB_MLP2 as MLP(in_feats, in_feats) applied to
    # IB_MLP1's output, which implicitly requires out_feats == in_feats.
    assert O == F and params['w4'].shape == (O, O), \
        "SchnetConv wiring requires out_feats == in_feats"

    vmem_cap = _vmem_capacity_bytes()
    if td is None:
        td = _choose_td(N, R, F, vmem_budget_bytes=int(vmem_cap * 0.4))
    assert N % td == 0 and td % 8 == 0

    # Stream the N^2-sized edge tensors as bf16; bf is pre-flattened so the
    # kernel feeds a 2-D bf16 LHS straight into the MXU (no in-kernel reshape
    # of the big operand).
    bf = bf.astype(jnp.bfloat16).reshape(N * N, R)
    eh = eh.astype(jnp.bfloat16)
    adj = adj.astype(jnp.bfloat16)          # 0/1 mask: exact in bf16
    nh = nh.astype(jnp.float32)

    # FGN weights in bf16 (grid-invariant, cast once); biases + IB weights f32.
    w1 = params['w1'].astype(jnp.bfloat16)
    w2 = params['w2'].astype(jnp.bfloat16)
    w3 = params['w3'].astype(jnp.float32)
    w4 = params['w4'].astype(jnp.float32)
    b1 = params['b1'].reshape(1, -1).astype(jnp.float32)
    b2 = params['b2'].reshape(1, -1).astype(jnp.float32)
    b3 = params['b3'].reshape(1, -1).astype(jnp.float32)
    b4 = params['b4'].reshape(1, -1).astype(jnp.float32)

    def full(a):
        nd = a.ndim
        # grid-invariant: constant index_map => fetched once, no re-DMA
        return pl.BlockSpec(a.shape, lambda i: (0,) * nd)

    grid_spec = pltpu.PrefetchScalarGridSpec(
        num_scalar_prefetch=0,
        grid=(N // td,),
        in_specs=[
            pl.BlockSpec((td * N, R), lambda i: (i, 0)),     # bf  flat (bf16)
            pl.BlockSpec((td, N, F), lambda i: (i, 0, 0)),   # eh        (bf16)
            pl.BlockSpec((td, N),    lambda i: (i, 0)),      # adjacency (bf16)
            pl.BlockSpec((N, F),     lambda i: (0, 0)),      # nh (all sources)
            full(w1), full(b1), full(w2), full(b2),
            full(w3), full(b3), full(w4), full(b4),
        ],
        out_specs=pl.BlockSpec((td, O), lambda i: (i, 0)),
    )

    return pl.pallas_call(
        _schnet_conv_kernel,
        out_shape=jax.ShapeDtypeStruct((N, O), jnp.float32),
        grid_spec=grid_spec,
        compiler_params=pltpu.CompilerParams(
            dimension_semantics=("parallel",),
            vmem_limit_bytes=_vmem_limit_bytes(td, N, R, F, O, vmem_cap)),
    )(bf, eh, adj, nh, w1, b1, w2, b2, w3, b3, w4, b4)


# ----------------------------------------------------------------------------
# Pure-JAX reference (mirrors the kernel's bf16 edge/weight quantization, all
# accumulation in f32) for correctness checking.
# ----------------------------------------------------------------------------
def schnet_conv_ref(bf, eh, adj, nh, params):
    hi = jax.lax.Precision.HIGHEST
    f32 = jnp.float32
    bf = bf.astype(jnp.bfloat16).astype(f32)
    eh = eh.astype(jnp.bfloat16).astype(f32)
    adj = adj.astype(jnp.bfloat16).astype(f32)
    w1 = params['w1'].astype(jnp.bfloat16).astype(f32)
    w2 = params['w2'].astype(jnp.bfloat16).astype(f32)
    x = _ssp(jnp.dot(bf, w1, precision=hi) + params['b1'])
    x = x.astype(jnp.bfloat16).astype(f32)
    x = _ssp(jnp.dot(x, w2, precision=hi) + params['b2'])
    eh = x * eh
    m = nh[None, :, :] * eh * adj[:, :, None]
    deg = jnp.sum(adj, axis=1, keepdims=True)
    agg = jnp.sum(m, axis=1) / jnp.maximum(deg, 1.0)
    y = _ssp(jnp.dot(agg, params['w3'], precision=hi) + params['b3'])
    return _ssp(jnp.dot(y, params['w4'], precision=hi) + params['b4'])


def init_params(key, radial_feats, in_feats, out_feats):
    ks = jax.random.split(key, 8)

    def lin(kw, fan_in, fan_out):
        return jax.random.normal(kw, (fan_in, fan_out), jnp.float32) / jnp.sqrt(fan_in)

    return {
        'w1': lin(ks[0], radial_feats, in_feats),
        'b1': jax.random.normal(ks[1], (in_feats,), jnp.float32) * 0.01,
        'w2': lin(ks[2], in_feats, in_feats),
        'b2': jax.random.normal(ks[3], (in_feats,), jnp.float32) * 0.01,
        'w3': lin(ks[4], in_feats, out_feats),
        'b3': jax.random.normal(ks[5], (out_feats,), jnp.float32) * 0.01,
        'w4': lin(ks[6], out_feats, out_feats),
        'b4': jax.random.normal(ks[7], (out_feats,), jnp.float32) * 0.01,
    }


if __name__ == "__main__":
    # Module-default feature sizes, small node count:
    #   N = 32 nodes, radial_feats = 128, in_feats = out_feats = 64
    N, R, F = 32, 128, 64
    key = jax.random.PRNGKey(0)
    k_bf, k_eh, k_nh, k_adj, k_p = jax.random.split(key, 5)

    bf = jax.random.normal(k_bf, (N, N, R), jnp.float32)
    eh = jax.random.normal(k_eh, (N, N, F), jnp.float32)
    nh = jax.random.normal(k_nh, (N, F), jnp.float32)
    adj = (jax.random.uniform(k_adj, (N, N)) < 0.5).astype(jnp.float32)
    adj = adj.at[0].set(0.0)   # exercise the zero-in-degree path (mean -> 0)

    params = init_params(k_p, R, F, F)

    out = schnet_conv(bf, eh, adj, nh, params)   # td auto-chosen -> 8 (grid=4)
    out = jax.block_until_ready(out)

    ref = schnet_conv_ref(bf, eh, adj, nh, params)
    assert out.shape == (N, F)
    max_err = float(jnp.max(jnp.abs(out - ref)))
    # Tolerance covers the mirrored bf16 streaming/weight quantization plus the
    # in-kernel approximate (EUP) reciprocal used for the masked mean.
    assert jnp.allclose(out, ref, atol=5e-3, rtol=5e-3), \
        f"mismatch vs reference (max abs err {max_err})"

    print("KERNEL_OK")
</pallas_src>

<mosaic_0001>
module attributes {stable_mosaic.version = 11 : i64} {
  func.func @_schnet_conv_kernel(%arg0: i32, %arg1: memref<256x128xbf16, #tpu.memory_space<vmem>>, %arg2: memref<8x32x64xbf16, #tpu.memory_space<vmem>>, %arg3: memref<8x32xbf16, #tpu.memory_space<vmem>>, %arg4: memref<32x64xf32, #tpu.memory_space<vmem>>, %arg5: memref<128x64xbf16, #tpu.memory_space<vmem>>, %arg6: memref<1x64xf32, #tpu.memory_space<vmem>>, %arg7: memref<64x64xbf16, #tpu.memory_space<vmem>>, %arg8: memref<1x64xf32, #tpu.memory_space<vmem>>, %arg9: memref<64x64xf32, #tpu.memory_space<vmem>>, %arg10: memref<1x64xf32, #tpu.memory_space<vmem>>, %arg11: memref<64x64xf32, #tpu.memory_space<vmem>>, %arg12: memref<1x64xf32, #tpu.memory_space<vmem>>, %arg13: memref<8x64xf32, #tpu.memory_space<vmem>>) attributes {dimension_semantics = [#tpu.dimension_semantics<parallel>], iteration_bounds = array<i64: 4>, scalar_prefetch = 0 : i64, scratch_operands = 0 : i64, tpu.core_type = #tpu.core_type<tc>, window_params = [{transform_indices = @transform_0, window_bounds = array<i64: 256, 128>}, {transform_indices = @transform_1, window_bounds = array<i64: 8, 32, 64>}, {transform_indices = @transform_2, window_bounds = array<i64: 8, 32>}, {pipeline_mode = #tpu.pipeline_mode<synchronous>, transform_indices = @transform_3, window_bounds = array<i64: 32, 64>}, {pipeline_mode = #tpu.pipeline_mode<synchronous>, transform_indices = @transform_4, window_bounds = array<i64: 128, 64>}, {pipeline_mode = #tpu.pipeline_mode<synchronous>, transform_indices = @transform_5, window_bounds = array<i64: 1, 64>}, {pipeline_mode = #tpu.pipeline_mode<synchronous>, transform_indices = @transform_6, window_bounds = array<i64: 64, 64>}, {pipeline_mode = #tpu.pipeline_mode<synchronous>, transform_indices = @transform_7, window_bounds = array<i64: 1, 64>}, {pipeline_mode = #tpu.pipeline_mode<synchronous>, transform_indices = @transform_8, window_bounds = array<i64: 64, 64>}, {pipeline_mode = #tpu.pipeline_mode<synchronous>, transform_indices = @transform_9, window_bounds = array<i64: 1, 64>}, {pipeline_mode = #tpu.pipeline_mode<synchronous>, transform_indices = @transform_10, window_bounds = array<i64: 64, 64>}, {pipeline_mode = #tpu.pipeline_mode<synchronous>, transform_indices = @transform_11, window_bounds = array<i64: 1, 64>}, {transform_indices = @transform_12, window_bounds = array<i64: 8, 64>}]} {
    %c0 = arith.constant 0 : index
    %c0_0 = arith.constant 0 : index
    %0 = vector.load %arg1[%c0, %c0_0] : memref<256x128xbf16, #tpu.memory_space<vmem>>, vector<256x128xbf16>
    %c0_1 = arith.constant 0 : index
    %c0_2 = arith.constant 0 : index
    %1 = vector.load %arg5[%c0_1, %c0_2] : memref<128x64xbf16, #tpu.memory_space<vmem>>, vector<128x64xbf16>
    %cst = arith.constant dense<0.000000e+00> : vector<256x64xf32>
    %2 = tpu.matmul %0, %1, %cst {dimension_numbers = #tpu.dot_dimension_numbers<[1], [0], [0], [1], [0, 0, 1, 1], [], []>} : vector<256x128xbf16>, vector<128x64xbf16>, vector<256x64xf32> -> vector<256x64xf32>
    %c0_3 = arith.constant 0 : index
    %c0_4 = arith.constant 0 : index
    %3 = vector.load %arg6[%c0_3, %c0_4] : memref<1x64xf32, #tpu.memory_space<vmem>>, vector<1x64xf32>
    %4 = vector.broadcast %3 : vector<1x64xf32> to vector<256x64xf32>
    %5 = arith.addf %2, %4 : vector<256x64xf32>
    %cst_5 = arith.constant 0.000000e+00 : f32
    %6 = vector.broadcast %cst_5 : f32 to vector<256x64xf32>
    %7 = arith.maximumf %5, %6 : vector<256x64xf32>
    %8 = math.absf %5 : vector<256x64xf32>
    %cst_6 = arith.constant 0.000000e+00 : f32
    %9 = vector.broadcast %cst_6 : f32 to vector<256x64xf32>
    %10 = arith.subf %9, %8 : vector<256x64xf32>
    %11 = math.exp %10 : vector<256x64xf32>
    %12 = math.log1p %11 : vector<256x64xf32>
    %13 = arith.addf %7, %12 : vector<256x64xf32>
    %cst_7 = arith.constant 0.693147182 : f32
    %14 = vector.broadcast %cst_7 : f32 to vector<256x64xf32>
    %15 = arith.subf %13, %14 : vector<256x64xf32>
    %16 = arith.truncf %15 : vector<256x64xf32> to vector<256x64xbf16>
    %c0_8 = arith.constant 0 : index
    %c0_9 = arith.constant 0 : index
    %17 = vector.load %arg7[%c0_8, %c0_9] : memref<64x64xbf16, #tpu.memory_space<vmem>>, vector<64x64xbf16>
    %cst_10 = arith.constant dense<0.000000e+00> : vector<256x64xf32>
    %18 = tpu.matmul %16, %17, %cst_10 {dimension_numbers = #tpu.dot_dimension_numbers<[1], [0], [0], [1], [0, 0, 1, 1], [], []>} : vector<256x64xbf16>, vector<64x64xbf16>, vector<256x64xf32> -> vector<256x64xf32>
    %c0_11 = arith.constant 0 : index
    %c0_12 = arith.constant 0 : index
    %19 = vector.load %arg8[%c0_11, %c0_12] : memref<1x64xf32, #tpu.memory_space<vmem>>, vector<1x64xf32>
    %20 = vector.broadcast %19 : vector<1x64xf32> to vector<256x64xf32>
    %21 = arith.addf %18, %20 : vector<256x64xf32>
    %cst_13 = arith.constant 0.000000e+00 : f32
    %22 = vector.broadcast %cst_13 : f32 to vector<256x64xf32>
    %23 = arith.maximumf %21, %22 : vector<256x64xf32>
    %24 = math.absf %21 : vector<256x64xf32>
    %cst_14 = arith.constant 0.000000e+00 : f32
    %25 = vector.broadcast %cst_14 : f32 to vector<256x64xf32>
    %26 = arith.subf %25, %24 : vector<256x64xf32>
    %27 = math.exp %26 : vector<256x64xf32>
    %28 = math.log1p %27 : vector<256x64xf32>
    %29 = arith.addf %23, %28 : vector<256x64xf32>
    %cst_15 = arith.constant 0.693147182 : f32
    %30 = vector.broadcast %cst_15 : f32 to vector<256x64xf32>
    %31 = arith.subf %29, %30 : vector<256x64xf32>
    %32 = vector.shape_cast %31 : vector<256x64xf32> to vector<8x32x64xf32>
    %c0_16 = arith.constant 0 : index
    %c0_17 = arith.constant 0 : index
    %c0_18 = arith.constant 0 : index
    %33 = vector.load %arg2[%c0_16, %c0_17, %c0_18] : memref<8x32x64xbf16, #tpu.memory_space<vmem>>, vector<8x32x64xbf16>
    %34 = arith.extf %33 : vector<8x32x64xbf16> to vector<8x32x64xf32>
    %35 = arith.mulf %32, %34 : vector<8x32x64xf32>
    %c0_19 = arith.constant 0 : index
    %c0_20 = arith.constant 0 : index
    %36 = vector.load %arg3[%c0_19, %c0_20] : memref<8x32xbf16, #tpu.memory_space<vmem>>, vector<8x32xbf16>
    %37 = arith.extf %36 : vector<8x32xbf16> to vector<8x32xf32>
    %c0_21 = arith.constant 0 : index
    %c0_22 = arith.constant 0 : index
    %38 = vector.load %arg4[%c0_21, %c0_22] : memref<32x64xf32, #tpu.memory_space<vmem>>, vector<32x64xf32>
    %39 = vector.shape_cast %38 : vector<32x64xf32> to vector<1x32x64xf32>
    %40 = vector.broadcast %39 : vector<1x32x64xf32> to vector<8x32x64xf32>
    %41 = arith.mulf %35, %40 : vector<8x32x64xf32>
    %42 = vector.shape_cast %37 : vector<8x32xf32> to vector<8x32x1xf32>
    %43 = vector.broadcast %42 : vector<8x32x1xf32> to vector<8x32x64xf32>
    %44 = arith.mulf %41, %43 : vector<8x32x64xf32>
    %cst_23 = arith.constant dense<0.000000e+00> : vector<8xf32>
    %45 = vector.multi_reduction <add>, %37, %cst_23 [1] : vector<8x32xf32> to vector<8xf32>
    %46 = vector.shape_cast %45 : vector<8xf32> to vector<8x1xf32>
    %cst_24 = arith.constant 1.000000e+00 : f32
    %47 = vector.broadcast %cst_24 : f32 to vector<8x1xf32>
    %48 = arith.maximumf %46, %47 : vector<8x1xf32>
    %49 = tpu.reciprocal %48 {approx = true} : vector<8x1xf32> -> vector<8x1xf32>
    %cst_25 = arith.constant dense<0.000000e+00> : vector<8x64xf32>
    %50 = vector.multi_reduction <add>, %44, %cst_25 [1] : vector<8x32x64xf32> to vector<8x64xf32>
    %51 = vector.broadcast %49 : vector<8x1xf32> to vector<8x64xf32>
    %52 = arith.mulf %50, %51 : vector<8x64xf32>
    %c0_26 = arith.constant 0 : index
    %c0_27 = arith.constant 0 : index
    %53 = vector.load %arg9[%c0_26, %c0_27] : memref<64x64xf32, #tpu.memory_space<vmem>>, vector<64x64xf32>
    %cst_28 = arith.constant dense<0.000000e+00> : vector<8x64xf32>
    %54 = tpu.matmul %52, %53, %cst_28 {dimension_numbers = #tpu.dot_dimension_numbers<[1], [0], [0], [1], [0, 0, 1, 1], [], []>} : vector<8x64xf32>, vector<64x64xf32>, vector<8x64xf32> -> vector<8x64xf32>
    %c0_29 = arith.constant 0 : index
    %c0_30 = arith.constant 0 : index
    %55 = vector.load %arg10[%c0_29, %c0_30] : memref<1x64xf32, #tpu.memory_space<vmem>>, vector<1x64xf32>
    %56 = vector.broadcast %55 : vector<1x64xf32> to vector<8x64xf32>
    %57 = arith.addf %54, %56 : vector<8x64xf32>
    %cst_31 = arith.constant 0.000000e+00 : f32
    %58 = vector.broadcast %cst_31 : f32 to vector<8x64xf32>
    %59 = arith.maximumf %57, %58 : vector<8x64xf32>
    %60 = math.absf %57 : vector<8x64xf32>
    %cst_32 = arith.constant 0.000000e+00 : f32
    %61 = vector.broadcast %cst_32 : f32 to vector<8x64xf32>
    %62 = arith.subf %61, %60 : vector<8x64xf32>
    %63 = math.exp %62 : vector<8x64xf32>
    %64 = math.log1p %63 : vector<8x64xf32>
    %65 = arith.addf %59, %64 : vector<8x64xf32>
    %cst_33 = arith.constant 0.693147182 : f32
    %66 = vector.broadcast %cst_33 : f32 to vector<8x64xf32>
    %67 = arith.subf %65, %66 : vector<8x64xf32>
    %c0_34 = arith.constant 0 : index
    %c0_35 = arith.constant 0 : index
    %68 = vector.load %arg11[%c0_34, %c0_35] : memref<64x64xf32, #tpu.memory_space<vmem>>, vector<64x64xf32>
    %cst_36 = arith.constant dense<0.000000e+00> : vector<8x64xf32>
    %69 = tpu.matmul %67, %68, %cst_36 {dimension_numbers = #tpu.dot_dimension_numbers<[1], [0], [0], [1], [0, 0, 1, 1], [], []>} : vector<8x64xf32>, vector<64x64xf32>, vector<8x64xf32> -> vector<8x64xf32>
    %c0_37 = arith.constant 0 : index
    %c0_38 = arith.constant 0 : index
    %70 = vector.load %arg12[%c0_37, %c0_38] : memref<1x64xf32, #tpu.memory_space<vmem>>, vector<1x64xf32>
    %71 = vector.broadcast %70 : vector<1x64xf32> to vector<8x64xf32>
    %72 = arith.addf %69, %71 : vector<8x64xf32>
    %cst_39 = arith.constant 0.000000e+00 : f32
    %73 = vector.broadcast %cst_39 : f32 to vector<8x64xf32>
    %74 = arith.maximumf %72, %73 : vector<8x64xf32>
    %75 = math.absf %72 : vector<8x64xf32>
    %cst_40 = arith.constant 0.000000e+00 : f32
    %76 = vector.broadcast %cst_40 : f32 to vector<8x64xf32>
    %77 = arith.subf %76, %75 : vector<8x64xf32>
    %78 = math.exp %77 : vector<8x64xf32>
    %79 = math.log1p %78 : vector<8x64xf32>
    %80 = arith.addf %74, %79 : vector<8x64xf32>
    %cst_41 = arith.constant 0.693147182 : f32
    %81 = vector.broadcast %cst_41 : f32 to vector<8x64xf32>
    %82 = arith.subf %80, %81 : vector<8x64xf32>
    %c0_42 = arith.constant 0 : index
    %c0_43 = arith.constant 0 : index
    %83 = vector.load %arg13[%c0_42, %c0_43] : memref<8x64xf32, #tpu.memory_space<vmem>>, vector<8x64xf32>
    tpu.vector_store %arg13[%c0_42, %c0_43], %82 {strides = array<i32>} : memref<8x64xf32, #tpu.memory_space<vmem>>, vector<8x64xf32>,
    return
  }
  func.func @transform_0(%arg0: i32) -> (i32, i32) {
    %c0_i32 = arith.constant 0 : i32
    %c0_i32_0 = arith.constant 0 : i32
    return %arg0, %c0_i32 : i32, i32
  }
  func.func @transform_1(%arg0: i32) -> (i32, i32, i32) {
    %c0_i32 = arith.constant 0 : i32
    %c0_i32_0 = arith.constant 0 : i32
    %c0_i32_1 = arith.constant 0 : i32
    return %arg0, %c0_i32, %c0_i32_0 : i32, i32, i32
  }
  func.func @transform_2(%arg0: i32) -> (i32, i32) {
    %c0_i32 = arith.constant 0 : i32
    %c0_i32_0 = arith.constant 0 : i32
    return %arg0, %c0_i32 : i32, i32
  }
  func.func @transform_3(%arg0: i32) -> (i32, i32) {
    %c0_i32 = arith.constant 0 : i32
    %c0_i32_0 = arith.constant 0 : i32
    %c0_i32_1 = arith.constant 0 : i32
    return %c0_i32, %c0_i32_0 : i32, i32
  }
  func.func @transform_4(%arg0: i32) -> (i32, i32) {
    %c0_i32 = arith.constant 0 : i32
    %c0_i32_0 = arith.constant 0 : i32
    %c0_i32_1 = arith.constant 0 : i32
    return %c0_i32, %c0_i32_0 : i32, i32
  }
  func.func @transform_5(%arg0: i32) -> (i32, i32) {
    %c0_i32 = arith.constant 0 : i32
    %c0_i32_0 = arith.constant 0 : i32
    %c0_i32_1 = arith.constant 0 : i32
    return %c0_i32, %c0_i32_0 : i32, i32
  }
  func.func @transform_6(%arg0: i32) -> (i32, i32) {
    %c0_i32 = arith.constant 0 : i32
    %c0_i32_0 = arith.constant 0 : i32
    %c0_i32_1 = arith.constant 0 : i32
    return %c0_i32, %c0_i32_0 : i32, i32
  }
  func.func @transform_7(%arg0: i32) -> (i32, i32) {
    %c0_i32 = arith.constant 0 : i32
    %c0_i32_0 = arith.constant 0 : i32
    %c0_i32_1 = arith.constant 0 : i32
    return %c0_i32, %c0_i32_0 : i32, i32
  }
  func.func @transform_8(%arg0: i32) -> (i32, i32) {
    %c0_i32 = arith.constant 0 : i32
    %c0_i32_0 = arith.constant 0 : i32
    %c0_i32_1 = arith.constant 0 : i32
    return %c0_i32, %c0_i32_0 : i32, i32
  }
  func.func @transform_9(%arg0: i32) -> (i32, i32) {
    %c0_i32 = arith.constant 0 : i32
    %c0_i32_0 = arith.constant 0 : i32
    %c0_i32_1 = arith.constant 0 : i32
    return %c0_i32, %c0_i32_0 : i32, i32
  }
  func.func @transform_10(%arg0: i32) -> (i32, i32) {
    %c0_i32 = arith.constant 0 : i32
    %c0_i32_0 = arith.constant 0 : i32
    %c0_i32_1 = arith.constant 0 : i32
    return %c0_i32, %c0_i32_0 : i32, i32
  }
  func.func @transform_11(%arg0: i32) -> (i32, i32) {
    %c0_i32 = arith.constant 0 : i32
    %c0_i32_0 = arith.constant 0 : i32
    %c0_i32_1 = arith.constant 0 : i32
    return %c0_i32, %c0_i32_0 : i32, i32
  }
  func.func @transform_12(%arg0: i32) -> (i32, i32) {
    %c0_i32 = arith.constant 0 : i32
    %c0_i32_0 = arith.constant 0 : i32
    return %arg0, %c0_i32 : i32, i32
  }
}

</mosaic_0001>

<bundles_post_ra>
// kernel: tpu_custom_call.1
= control target key start
LH: loop header
LB: loop body
LE: loop exit
PB: predicated region body
PF: predicated region fallthrough
CT: control target
= control target key end

     0   :  { %s6212_s0 = inlined_call_operand.hbm [shape: bf16[1024,128], index: 0, kind: input, shape index: {}]   ;;  %s6213_s1 = inlined_call_operand.hbm [shape: bf16[32,32,64], index: 1, kind: input, shape index: {}]   ;;  %s6214_s2 = inlined_call_operand.hbm [shape: bf16[32,32], index: 2, kind: input, shape index: {}]   ;;  %s6215_s3 = inlined_call_operand.hbm [shape: f32[32,64], index: 3, kind: input, shape index: {}]   ;;  %s6216_s4 = inlined_call_operand.vmem [shape: bf16[128,64], index: 4, kind: input, shape index: {}]   ;;  %s6217_s5 = inlined_call_operand.vmem [shape: f32[1,64], index: 5, kind: input, shape index: {}]   ;;  %s6218_s6 = inlined_call_operand.hbm [shape: bf16[64,64], index: 6, kind: input, shape index: {}]   ;;  %s6219_s7 = inlined_call_operand.vmem [shape: f32[1,64], index: 7, kind: input, shape index: {}]   ;;  %s6220_s8 = inlined_call_operand.vmem [shape: f32[64,64], index: 8, kind: input, shape index: {}]   ;;  %s6221_s9 = inlined_call_operand.hbm [shape: f32[1,64], index: 9, kind: input, shape index: {}]   ;;  %s6222_s10 = inlined_call_operand.vmem [shape: f32[64,64], index: 10, kind: input, shape index: {}]   ;;  %s6223_s11 = inlined_call_operand.vmem [shape: f32[1,64], index: 11, kind: input, shape index: {}]   ;;  %s6224_s12 = inlined_call_operand.hbm [shape: f32[32,64], index: 12, kind: output, shape index: {}]  }
   0x1   :  { %6261 = sst [smem:[#allocation33_spill]] %s6213_s1 }
   0x2   :  { %6262 = sst [smem:[#allocation34_spill]] %s6215_s3 }
   0x3   :  { %6263 = sst [smem:[#allocation35_spill]] %s6217_s5 }
   0x4   :  { %6264 = sst [smem:[#allocation36_spill]] %s6219_s7 }
   0x5   :  { %6265 = sst [smem:[#allocation37_spill]] %s6220_s8 }
   0x6   :  { %6266 = sst [smem:[#allocation38_spill]] %s6222_s10 }
   0x7   :  { %6267 = sst [smem:[#allocation39_spill]] %s6223_s11 }
   0x8   :  { %6268 = sst [smem:[#allocation40_spill]] %s6224_s12 }
   0x9   :  { %17 = vsyncpa [#allocation3], 0 }
   0xa   :  { %19 = vsyncpa [#allocation3 + $0x1], 0 }
   0xb   :  { %20 = vsyncpa [#allocation6], 0 }
   0xc   :  { %22 = vsyncpa [#allocation6 + $0x1], 0 }
   0xd   :  { %23 = vsyncpa [#allocation9], 0 }
   0xe   :  { %24 = vsyncpa [#allocation12], 0 }
   0xf   :  { %25 = vsyncpa [#allocation4], 0 }
  0x10   :  { %27 = vsyncpa [#allocation4 + $0x1], 0  ;;  %s4210_s21 = smov 0   ;;  %s4212_s22 = smov 0  }
  0x11   :  { %s4214_s23 = smov 0   ;;  %s4216_s24 = smov 0  }
  0x12 LB: > { %6269 = sst [smem:[#allocation19_spill]] %s4117_s21  ;;  %s4231_s25 = sadd.s32 4294967295, %s4129_s24   ;;  %s4129_s24 = sphi %s4216_s24, %s6502_s24   ;;  %s4125_s23 = sphi %s4214_s23, %s6504_s23   ;;  %s4121_s22 = sphi %s4212_s22, %s6506_s22   ;;  %s4117_s21 = sphi %s4210_s21, %s6505_s21  }
  0x13   : > { %6270 = sst [smem:[#allocation20_spill]] %s4125_s23  ;;  %s3046_s26 = sadd.s32 4294967294, %s4129_s24  }
  0x14   : > { %s4235_s27 = sadd.s32 1, %s4129_s24   ;;  %s40_s28 = sadd.s32 1, %s4125_s23 }
  0x15   : > { %6271 = sst [smem:[#allocation21_spill]] %s4235_s27  ;;  %s37_s29 = ssub.s32 %s4129_s24, %s4235_s27 }
  0x16   : > { %p47_p0 = scmp.ne.s32.totalorder %s4125_s23, %s4121_s22  ;;  %p38_p1 = scmp.eq.s32.totalorder %s37_s29, 0 }
  0x17   : > { %p48_p2 = scmp.eq.s32.totalorder %s4129_s24, 0  ;;  %p53_p3 = scmp.ne.s32.totalorder %s4121_s22, %s4117_s21 }
  0x18   : > { %p6229_p4 = scmp.eq.s32.totalorder %s4231_s25, 0  ;;  %p318_p7 = scmp.eq.s32.totalorder %s4231_s25, 3 }
  0x19   : > { %s4247_s30 = scalar_select %p38_p1, %s4125_s23, %s40_s28  }
  0x1a   : > { %p4249_p5 = por %p48_p2, %p47_p0  ;;  %p4255_p6 = por %p6229_p4, %p53_p3 }
  0x1b   : > { %6272 = sst [smem:[#allocation22_spill]] %s4247_s30  ;;  %p324_p8 = scmp.eq.s32.totalorder %s3046_s26, 3 }
  0x1c   : > { %s6273_s13 = scalar_select %p4249_p5, 1, 0 }
  0x1d   : > { %s6274_s14 = scalar_select %p4255_p6, 1, 0 }
  0x1e   : > { %p3047_p9 = scmp.ge.s32.totalorder %s4129_s24, 1  ;;  %p331_p10 = scmp.lt.s32.totalorder %s4129_s24, 5 }
  0x1f   : > { %p4262_p11 = por %p318_p7, %p47_p0  ;;  %p4266_p12 = por %p324_p8, %p53_p3 }
  0x20   : > { %p4270_p13 = pnand %p3047_p9, %p331_p10  ;;  %s4131_s18 = smov [#allocation8]  }
  0x21   : > { %s6275_s15 = scalar_select %p4262_p11, 1, 0 }
  0x22   : > { %s6277_s16 = scalar_select %p4266_p12, 1, 0 }
  0x23   : > { %6276 = sst [smem:[#allocation23_spill]] %s6275_s15  ;;  %p3503_p1 = pneg %p4270_p13 }
  0x24   : > { %6278 = sst [smem:[#allocation24_spill]] %s6277_s16  ;;  %s343_s19 = sshll.u32 %s4131_s18, 4  ;;  %s344_s19 = int_to_ptr.vmem [resolvable:$true] %s343_s19 }
  0x25   : > { %s6279_s17 = scalar_select %p4270_p13, 1, 0 }
  0x26   : > { %p4278_p2 = pnand %p3503_p1, %p6229_p4  ;;  %s6281_s3 = sld [smem:[#allocation34_spill]] }
  0x28   : > { %s6280_s20 = scalar_select %p4278_p2, 1, 0 }
  0x29   : > { %p4291_p7 = pneg %p4278_p2 }
  0x2b   : > { %s6282_s16 = scalar_select %p4291_p7, 1, 0 }
  0x2c   : > { %s3877_s29 = scalar_lea.hbm %s6281_s3, 512 }
  0x2d   : > { %p3878_p3 = scmp.ne.s32.totalorder %s6281_s3, %s3877_s29  ;;  %p3884_p10 = scmp.lt.u32.totalorder %s3877_s29, %s6281_s3 }
  0x2f   : > { %p3880_p8 = pnand %p4291_p7, %p3878_p3 }
  0x31   : > { %p3881_p9 = pneg %p3880_p8 }
  0x33   : > { %p3886_p1 = pnand %p3884_p10, %p3881_p9 }
  0x35   : > { %3889 = shalt.err (!%p3886_p1)
}
  0x36   : > { %s3890_s26 = scalar_lea.vmem %s344_s19, 512  ;;  %p3898_p11 = scmp.lt.s32.totalorder %s344_s19, %s344_s19 }
  0x37   : > { %p3891_p4 = scmp.ne.s32.totalorder %s344_s19, %s3890_s26  ;;  %p3899_p6 = scmp.lt.s32.totalorder %s3890_s26, %s3890_s26 }
  0x39   : > { %p3893_p0 = pnand %p3891_p4, %p4291_p7  ;;  %p3900_p13 = por %p3899_p6, %p3898_p11 }
  0x3b   : > { %p3894_p12 = pneg %p3893_p0 }
  0x3d   : > { %p3901_p5 = pnand %p3900_p13, %p3894_p12 }
  0x3f   : > { %3904 = shalt.err (!%p3901_p5)
}
  0x40   : > { %s4132_s27 = smov 128   ;;  %s4133_s21 = smov 8  }
  0x41   : > { %3506 = dma.hbm_to_vmem [thread:$0]  (!%p4278_p2), %s6281_s3, 512, %s344_s19, [#allocation9], %s4132_s27, %s4132_s27, %s4133_s21  }
  0x42   : > { %s4308_s29 = sand.u32 1, %s4125_s23   ;;  %s6238_s18 = sshll.u32 %s4129_s24, 11 }
  0x43   : > { %s6237_s26 = sshll.u32 %s4308_s29, 7  ;;  %p6283_p4 = scmp.ne.s32.totalorder %s6273_s13, 0 }
  0x44   : > { %p6284_p5 = scmp.lt.s32.totalorder %s4129_s24, 4  ;;  %s420_s15 = sand.u32 1, %s4129_s24  }
  0x45   : > { %s6286_s1 = sld [smem:[#allocation33_spill]]  ;;  %s424_s19 = scalar_lea.vmem [#allocation5], %s6237_s26 }
  0x46   : > { %p4316_p6 = pnand %p6284_p5, %p6283_p4  ;;  %s432_s13 = sshll.u32 %s424_s19, 4  ;;  %s4330_s13 = int_to_ptr.vmem [resolvable:$true] %s432_s13 }
  0x47   : > { %s4332_s27 = scalar_lea.sflag [#allocation6], %s420_s15 }
  0x48   : > { %s6285_s12 = scalar_select %p4316_p6, 1, 0 }
  0x49   : > { %p4338_p12 = pneg %p4316_p6 }
  0x4b   : > { %s4326_s30 = scalar_lea.hbm %s6286_s1, %s6238_s18  ;;  %s3910_s26 = scalar_lea.hbm %s6286_s1, 8192 }
  0x4c   : > { %s3905_s21 = scalar_lea.hbm %s4326_s30, 2048  ;;  %p3911_p3 = scmp.lt.u32.totalorder %s4326_s30, %s6286_s1 }
  0x4d   : > { %p3906_p11 = scmp.ne.s32.totalorder %s4326_s30, %s3905_s21  ;;  %p3912_p8 = scmp.lt.u32.totalorder %s3910_s26, %s3905_s21 }
  0x4e   : > { %s6287_s28 = scalar_select %p4338_p12, 1, 0 }
  0x4f   : > { %p3908_p13 = pnand %p4338_p12, %p3906_p11  ;;  %p3913_p9 = por %p3912_p8, %p3911_p3 }
  0x50   : > { %p3914_p10 = scmp.lt.u32.totalorder %s3905_s21, %s4326_s30 }
  0x51   : > { %p3909_p0 = pneg %p3908_p13 }
  0x52   : > { %p3915_p1 = por %p3914_p10, %p3913_p9 }
  0x54   : > { %p3916_p4 = pnand %p3915_p1, %p3909_p0 }
  0x56   : > { %3919 = shalt.err (!%p3916_p4)
}
  0x57   : > { %s3920_s15 = scalar_lea.vmem %s4330_s13, 2048  ;;  %s4134_s10 = smov [#allocation5]  }
  0x58   : > { %p3921_p5 = scmp.ne.s32.totalorder %s4330_s13, %s3920_s15  ;;  %s3925_s11 = sshll.u32 %s4134_s10, 4  ;;  %s3926_s11 = int_to_ptr.vmem [resolvable:$false] %s3925_s11 }
  0x59   : > { %s3927_s18 = scalar_lea.vmem %s3926_s11, 4096  ;;  %p3928_p2 = scmp.lt.s32.totalorder %s4330_s13, %s3926_s11 }
  0x5a   : > { %p3923_p11 = pnand %p3921_p5, %p4338_p12  ;;  %p3929_p7 = scmp.lt.s32.totalorder %s3927_s18, %s3920_s15 }
  0x5c   : > { %p3924_p13 = pneg %p3923_p11  ;;  %p3930_p3 = por %p3929_p7, %p3928_p2 }
  0x5e   : > { %p3931_p8 = pnand %p3930_p3, %p3924_p13 }
  0x60   : > { %3934 = shalt.err (!%p3931_p8)
}
  0x61   : > { %s4135_s26 = smov 64   ;;  %s4136_s21 = smov 4  }
  0x62   : > { %3519 = dma.hbm_to_vmem [thread:$0]  (!%p4316_p6), %s4326_s30, 2048, %s4330_s13, %s4332_s27, %s4135_s26, %s4135_s26, %s4136_s21  }
  0x63   : > { %s4137_s19 = smov [#allocation10]   ;;  %s4138_s11 = smov [#allocation11]  }
  0x64   : > { %s362_s10 = sshll.u32 %s4137_s19, 4  ;;  %s382_s15 = sshll.u32 %s4138_s11, 4  ;;  %s363_s10 = int_to_ptr.vmem [resolvable:$true] %s362_s10  ;;  %s383_s15 = int_to_ptr.vmem [resolvable:$true] %s382_s15 }
  0x65   : > { %s3935_s3 = scalar_lea.hbm %s6218_s6, 512  ;;  %p6288_p7 = scmp.ne.s32.totalorder %s6282_s16, 0 }
  0x66   : > { %p3936_p2 = scmp.ne.s32.totalorder %s6218_s6, %s3935_s3  ;;  %p3942_p10 = scmp.lt.u32.totalorder %s3935_s3, %s6218_s6 }
  0x68   : > { %p3938_p0 = pnand %p3936_p2, %p6288_p7 }
  0x6a   : > { %p3939_p9 = pneg %p3938_p0 }
  0x6c   : > { %p3944_p1 = pnand %p3942_p10, %p3939_p9 }
  0x6e   : > { %3947 = shalt.err (!%p3944_p1)
}
  0x6f   : > { %s3948_s30 = scalar_lea.vmem %s363_s10, 512  ;;  %p3956_p13 = scmp.lt.s32.totalorder %s363_s10, %s363_s10 }
  0x70   : > { %p3949_p4 = scmp.ne.s32.totalorder %s363_s10, %s3948_s30  ;;  %p3957_p3 = scmp.lt.s32.totalorder %s3948_s30, %s3948_s30 }
  0x72   : > { %p3951_p5 = pnand %p3949_p4, %p6288_p7  ;;  %p3958_p8 = por %p3957_p3, %p3956_p13 }
  0x74   : > { %p3952_p11 = pneg %p3951_p5 }
  0x76   : > { %p3959_p6 = pnand %p3958_p8, %p3952_p11 }
  0x78   : > { %3962 = shalt.err (!%p3959_p6)
}
  0x79   : > { %p6289_p2 = scmp.ne.s32.totalorder %s6280_s20, 0  ;;  %s3963_s8 = scalar_lea.hbm %s6221_s9, 16 }
  0x7a   : > { %p3964_p0 = scmp.ne.s32.totalorder %s6221_s9, %s3963_s8  ;;  %p3970_p10 = scmp.lt.u32.totalorder %s3963_s8, %s6221_s9 }
  0x7b   : > { %3509 = dma.hbm_to_vmem [thread:$0]  (!%p6289_p2), %s6218_s6, 512, %s363_s10, [#allocation9], %s4135_s26, %s4135_s26, %s4136_s21  }
  0x7c   : > { %p3966_p6 = pnand %p3964_p0, %p6288_p7 }
  0x7e   : > { %p3967_p9 = pneg %p3966_p6 }
  0x80   : > { %p3972_p1 = pnand %p3970_p10, %p3967_p9 }
  0x82   : > { %3975 = shalt.err (!%p3972_p1)
}
  0x83   : > { %s3976_s18 = scalar_lea.vmem %s383_s15, 16  ;;  %s3983_s10 = scalar_lea.vmem %s383_s15, 32 }
  0x84   : > { %p3977_p4 = scmp.ne.s32.totalorder %s383_s15, %s3976_s18  ;;  %p3984_p13 = scmp.lt.s32.totalorder %s383_s15, %s383_s15 }
  0x85   : > { %p3985_p3 = scmp.lt.s32.totalorder %s3983_s10, %s3976_s18 }
  0x86   : > { %p3979_p5 = pnand %p3977_p4, %p6288_p7 }
  0x87   : > { %p3986_p8 = por %p3985_p3, %p3984_p13 }
  0x88   : > { %p3980_p11 = pneg %p3979_p5 }
  0x8a   : > { %p3987_p12 = pnand %p3986_p8, %p3980_p11 }
  0x8c   : > { %3990 = shalt.err (!%p3987_p12)
}
  0x8d   : > { %3512 = dma.hbm_to_vmem [thread:$0]  (!%p6289_p2), %s6221_s9, 16, %s383_s15, [#allocation12]  }
  0x8e   : > { %s6290_s16 = sshll.u32 %s4129_s24, 11  ;;  %s6291_s8 = sshll.u32 %s4308_s29, 7 }
  0x8f   : > { %s4409_s7 = scalar_lea.hbm %s6212_s0, %s6290_s16  ;;  %s403_s20 = scalar_lea.vmem [#allocation2], %s6291_s8 }
  0x90   : > { %s410_s23 = sshll.u32 %s403_s20, 4  ;;  %s3059_s13 = sshll.u32 %s4308_s29, 2  ;;  %s4414_s23 = int_to_ptr.vmem [resolvable:$true] %s410_s23 }
  0x91   : > { %s400_s19 = scalar_lea.sflag [#allocation3], %s4308_s29  ;;  %s3991_s11 = scalar_lea.hbm %s4409_s7, 2048 }
  0x92   : > { %p3992_p12 = scmp.ne.s32.totalorder %s4409_s7, %s3991_s11  ;;  %p6292_p7 = scmp.ne.s32.totalorder %s6287_s28, 0 }
  0x93   : > { %s3996_s10 = scalar_lea.hbm %s6212_s0, 8192  ;;  %p3997_p6 = scmp.lt.u32.totalorder %s4409_s7, %s6212_s0 }
  0x94   : > { %p3994_p2 = pnand %p3992_p12, %p6292_p7  ;;  %p3998_p9 = scmp.lt.u32.totalorder %s3996_s10, %s3991_s11 }
  0x95   : > { %p4000_p1 = scmp.lt.u32.totalorder %s3991_s11, %s4409_s7 }
  0x96   : > { %p3995_p0 = pneg %p3994_p2  ;;  %p3999_p10 = por %p3998_p9, %p3997_p6 }
  0x98   : > { %p4001_p4 = por %p4000_p1, %p3999_p10 }
  0x9a   : > { %p4002_p5 = pnand %p4001_p4, %p3995_p0 }
  0x9c   : > { %4005 = shalt.err (!%p4002_p5)
}
  0x9d   : > { %s4006_s16 = scalar_lea.vmem %s4414_s23, 2048  ;;  %s4139_s3 = smov [#allocation2]  }
  0x9e   : > { %p4007_p11 = scmp.ne.s32.totalorder %s4414_s23, %s4006_s16  ;;  %s4011_s5 = sshll.u32 %s4139_s3, 4  ;;  %s4012_s5 = int_to_ptr.vmem [resolvable:$false] %s4011_s5 }
  0x9f   : > { %s4013_s8 = scalar_lea.vmem %s4012_s5, 4096  ;;  %p4014_p8 = scmp.lt.s32.totalorder %s4414_s23, %s4012_s5 }
  0xa0   : > { %p4009_p13 = pnand %p4007_p11, %p6292_p7  ;;  %p4015_p12 = scmp.lt.s32.totalorder %s4013_s8, %s4006_s16 }
  0xa2   : > { %p4010_p3 = pneg %p4009_p13  ;;  %p4016_p2 = por %p4015_p12, %p4014_p8 }
  0xa4   : > { %p4017_p6 = pnand %p4016_p2, %p4010_p3 }
  0xa6   : > { %4020 = shalt.err (!%p4017_p6)
}
  0xa7   : > { %p6293_p0 = scmp.ne.s32.totalorder %s6285_s12, 0  ;;  %s3060_s20 = sshll.u32 %s4129_s24, 6 }
  0xa8   : > { %s446_s11 = scalar_lea.vmem [#allocation7], %s3059_s13  ;;  %s451_s30 = scalar_lea.hbm %s6214_s2, %s3060_s20 }
  0xa9   : > { %3516 = dma.hbm_to_vmem [thread:$0]  (!%p6293_p0), %s4409_s7, 2048, %s4414_s23, %s400_s19, %s4135_s26, %s4135_s26, %s4136_s21  }
  0xaa   : > { %s453_s15 = sshll.u32 %s446_s11, 4  ;;  %s4021_s1 = scalar_lea.hbm %s451_s30, 64  ;;  %s454_s15 = int_to_ptr.vmem [resolvable:$true] %s453_s15 }
  0xab   : > { %p4022_p9 = scmp.ne.s32.totalorder %s451_s30, %s4021_s1  ;;  %s4026_s5 = scalar_lea.hbm %s6214_s2, 256 }
  0xac   : > { %p4027_p4 = scmp.lt.u32.totalorder %s451_s30, %s6214_s2  ;;  %p4028_p5 = scmp.lt.u32.totalorder %s4026_s5, %s4021_s1 }
  0xad   : > { %p4024_p10 = pnand %p4022_p9, %p6292_p7  ;;  %p4030_p13 = scmp.lt.u32.totalorder %s4021_s1, %s451_s30 }
  0xae   : > { %p4029_p11 = por %p4028_p5, %p4027_p4 }
  0xaf   : > { %p4025_p1 = pneg %p4024_p10 }
  0xb0   : > { %p4031_p3 = por %p4030_p13, %p4029_p11 }
  0xb2   : > { %p4032_p8 = pnand %p4031_p3, %p4025_p1 }
  0xb4   : > { %4035 = shalt.err (!%p4032_p8)
}
  0xb5   : > { %s4036_s29 = scalar_lea.vmem %s454_s15, 64  ;;  %s4140_s21 = smov [#allocation7]  }
  0xb6   : > { %p4037_p12 = scmp.ne.s32.totalorder %s454_s15, %s4036_s29  ;;  %s4041_s7 = sshll.u32 %s4140_s21, 4  ;;  %s4042_s7 = int_to_ptr.vmem [resolvable:$false] %s4041_s7 }
  0xb7   : > { %s4043_s23 = scalar_lea.vmem %s4042_s7, 128  ;;  %p4044_p9 = scmp.lt.s32.totalorder %s454_s15, %s4042_s7 }
  0xb8   : > { %p4039_p2 = pnand %p4037_p12, %p6292_p7  ;;  %p4045_p10 = scmp.lt.s32.totalorder %s4043_s23, %s4036_s29 }
  0xba   : > { %p4040_p6 = pneg %p4039_p2  ;;  %p4046_p0 = por %p4045_p10, %p4044_p9 }
  0xbc   : > { %p4047_p4 = pnand %p4046_p0, %p4040_p6 }
  0xbe   : > { %4050 = shalt.err (!%p4047_p4)
}
  0xbf   : > { %p6294_p5 = scmp.ne.s32.totalorder %s6285_s12, 0  ;;  %p6295_p1 = scmp.ne.s32.totalorder %s6279_s17, 0 }
  0xc1   : > { %3522 = dma.hbm_to_vmem [thread:$0]  (!%p6294_p5), %s451_s30, 64, %s454_s15, %s4332_s27  }
  0xc2   : > { %462 = sbr.rel (%p6295_p1) target bundleno = 1533 (0x5fd), region = 68 }
  0xc9   : > { %s4465_s28 = sand.u32 1, %s4121_s22   ;;  %p6296_p7 = scmp.ne.s32.totalorder %s6274_s14, 0 }
  0xca   : > { %s3062_s13 = sshll.u32 %s4465_s28, 7  ;;  %s465_s19 = scalar_lea.sflag [#allocation3], %s4465_s28 }
  0xcb   : > { %s4469_s20 = scalar_lea.vmem [#allocation2], %s3062_s13 }
  0xcc   : > { %4096 = dma.done.wait (%p6296_p7), %s465_s19, 2048  }
  0xcd   : > { %4098 = vsyncadd (%p6296_p7), %s465_s19, 4294965248  ;;  %s473_s12 = sand.u32 1, %s4231_s25   ;;  %s4476_s27 = scalar_lea.vmem [#allocation5], %s3062_s13 }
  0xce   : > { %s474_s17 = scalar_lea.sflag [#allocation6], %s473_s12 }
  0xcf   : > { %4100 = dma.done.wait (%p6296_p7), %s474_s17, 2112  }
  0xd0   : > { %4102 = vsyncadd (%p6296_p7), %s474_s17, 4294965184  ;;  %s3064_s11 = sshll.u32 %s4465_s28, 2  ;;  %p6297_p0 = scmp.eq.s32.totalorder %s4231_s25, 0 }
  0xd1   : > { %s4483_s15 = scalar_lea.vmem [#allocation7], %s3064_s11 }
  0xd2   : > { %4104 = dma.done.wait (%p6297_p0), [#allocation9], 1024   ;;  %p6298_p11 = pmov %p6297_p0 }
  0xd3   : > { %p6299_p13 = pmov %p6297_p0 }
  0xd4   : > { %4106 = vsyncadd (%p6298_p11), [#allocation9], 4294966272 }
  0xd5   : > { %4108 = dma.done.wait (%p6299_p13), [#allocation12], 16   ;;  %p6300_p3 = pmov %p6297_p0 }
  0xd6   : > { %v3577_v0 = vld [vmem:[%s6216_s4] sm:$0xff]   ;;  %v3578_v1 = vld [vmem:[%s6216_s4 + $0x8] sm:$0xff]   ;;  %v3579_v2 = vld [vmem:[%s6216_s4 + $0x10] sm:$0xff]   ;;  %s6301_s11 = sld [smem:[#allocation35_spill]]  ;;  %s6378_s18 = sld [smem:[#allocation36_spill]] }
  0xd7   : > { %4110 = vsyncadd (%p6300_p3), [#allocation12], 4294967280  ;;  %3333 = vmatprep.subr.bf16.mxu0 %v3577_v0  ;;  %v3580_v3 = vld [vmem:[%s6216_s4 + $0x18] sm:$0xff]   ;;  %v3585_v4 = vld [vmem:[%s4469_s20] sm:$0xff]   ;;  %s6481_s16 = sld [smem:[#allocation37_spill]]  ;;  %s6494_s10 = sld [smem:[#allocation38_spill]] }
  0xd8   : > { %3334 = vmatpush3.bf16.msra.mxu0 %v3577_v0  ;;  %3349 = vmatprep.mubr.bf16.mxu0 %v3585_v4  ;;  %v3581_v5 = vld [vmem:[%s6216_s4 + $0x20] sm:$0xff]   ;;  %v3582_v6 = vld [vmem:[%s6216_s4 + $0x28] sm:$0xff]   ;;  %v3583_v7 = vld [vmem:[%s6216_s4 + $0x30] sm:$0xff]   ;;  %s3186_s14 = sshll.u32 %s4231_s25, 7  ;;  %s6497_s8 = sld [smem:[#allocation40_spill]] }
  0xd9   : > { %3335 = vmatprep.subr.bf16.mxu0 %v3578_v1  ;;  %v3584_v8 = vld [vmem:[%s6216_s4 + $0x38] sm:$0xff]   ;;  %v3586_v9 = vld [vmem:[%s4469_s20 + $0x8] sm:$0xff]   ;;  %v3587_v10 = vld [vmem:[%s4469_s20 + $0x10] sm:$0xff]   ;;  %s2891_s29 = scalar_lea.sflag [#allocation4], %s4465_s28  ;;  %s4144_s25 = smov [#allocation13]  }
  0xda   : > { %v3588_v11 = vld [vmem:[%s4469_s20 + $0x18] sm:$0xff]   ;;  %v3589_v12 = vld [vmem:[%s4469_s20 + $0x20] sm:$0xff]   ;;  %v3590_v13 = vld [vmem:[%s4469_s20 + $0x28] sm:$0xff]  }
  0xdb   : > { %v3591_v14 = vld [vmem:[%s4469_s20 + $0x30] sm:$0xff]   ;;  %v3592_v15 = vld [vmem:[%s4469_s20 + $0x38] sm:$0xff]   ;;  %v3593_v16 = vld [vmem:[%s4469_s20 + $0x40] sm:$0xff]  }
  0xdc   : > { %3336 = vmatpush3.bf16.msra.mxu0 %v3578_v1  ;;  %v3594_v17 = vld [vmem:[%s4469_s20 + $0x48] sm:$0xff]   ;;  %v3595_v18 = vld [vmem:[%s4469_s20 + $0x50] sm:$0xff]   ;;  %v3596_v19 = vld [vmem:[%s4469_s20 + $0x58] sm:$0xff]  }
  0xdd   : > { %3337 = vmatprep.subr.bf16.mxu0 %v3579_v2  ;;  %v3597_v20 = vld [vmem:[%s4469_s20 + $0x60] sm:$0xff]   ;;  %v3598_v21 = vld [vmem:[%s4469_s20 + $0x68] sm:$0xff]   ;;  %v3599_v22 = vld [vmem:[%s4469_s20 + $0x70] sm:$0xff]  }
  0xde   : > { %v3600_v23 = vld [vmem:[%s4469_s20 + $0x78] sm:$0xff]   ;;  %v3601_v24 = vld [vmem:[#allocation10] sm:$0xff]   ;;  %v3602_v25 = vld [vmem:[#allocation10 + $0x8] sm:$0xff]   ;;  %s3068_s20 = sshll.u32 %s4465_s28, 3  ;;  %s6168_s26 = scalar_lea.hbm %s6497_s8, %s3186_s14 }
  0xdf   : > { %3381 = vmatprep.subr.bf16.mxu1 %v3601_v24  ;;  %v3603_v26 = vld [vmem:[#allocation10 + $0x10] sm:$0xff]   ;;  %v3604_v27 = vld [vmem:[#allocation10 + $0x18] sm:$0xff]   ;;  %s548_s30 = scalar_lea.vmem [#allocation13], %s3068_s20 }
  0xe0   : > { %3338 = vmatpush3.bf16.msra.mxu0 %v3579_v2  ;;  %3382 = vmatpush3.bf16.msra.mxu1 %v3601_v24  ;;  %v4536_v28 = vld [vmem:[%s6301_s11] ss:$0 sm:$0xff]  ;;  %s6495_s11 = sld [smem:[#allocation39_spill]]  ;;  %s2904_s1 = sshll.u32 %s548_s30, 4  ;;  %s6170_s1 = int_to_ptr.vmem [resolvable:$true] %s2904_s1 }
  0xe1   : > { %3339 = vmatprep.subr.bf16.mxu0 %v3580_v3  ;;  %3383 = vmatprep.subr.bf16.mxu1 %v3602_v25  ;;  %s4051_s21 = scalar_lea.vmem %s6170_s1, 128 }
  0xe2   : > { %p4052_p8 = scmp.ne.s32.totalorder %s6170_s1, %s4051_s21 }
  0xe4   : > { %3340 = vmatpush3.bf16.msra.mxu0 %v3580_v3  ;;  %3384 = vmatpush3.bf16.msra.mxu1 %v3602_v25 }
  0xe5   : > { %3341 = vmatprep.subr.bf16.mxu0 %v3581_v5  ;;  %3385 = vmatprep.subr.bf16.mxu1 %v3603_v26 }
  0xe8   : > { %3342 = vmatpush3.bf16.msra.mxu0 %v3581_v5  ;;  %3386 = vmatpush3.bf16.msra.mxu1 %v3603_v26 }
  0xe9   : > { %3343 = vmatprep.subr.bf16.mxu0 %v3582_v6  ;;  %3387 = vmatprep.subr.bf16.mxu1 %v3604_v27 }
  0xec   : > { %3344 = vmatpush3.bf16.msra.mxu0 %v3582_v6  ;;  %3388 = vmatpush3.bf16.msra.mxu1 %v3604_v27 }
  0xed   : > { %3345 = vmatprep.subr.bf16.mxu0 %v3583_v7 }
  0xf0   : > { %3346 = vmatpush3.bf16.msra.mxu0 %v3583_v7 }
  0xf1   : > { %3347 = vmatprep.subr.bf16.mxu0 %v3584_v8 }
  0xf4   : > { %3348 = vmatpush3.bf16.msra.mxu0 %v3584_v8 }
  0xf7   : > { %3350 = vmatmul.mubr.bf16.vlgmr.msra.gmra.mrb[0].mxu0 %v3586_v9 }
  0xf8   : > { %3353 = vmatprep.mubr.bf16.mxu0 %v3587_v10 }
  0xff   : > { %3354 = vmatmul.mubr.bf16.gmra.mrb[4].mxu0 %v3588_v11 }
 0x100   : > { %3357 = vmatprep.mubr.bf16.mxu0 %v3589_v12 }
 0x107   : > { %3358 = vmatmul.mubr.bf16.gmra.mrb[8].mxu0 %v3590_v13 }
 0x108   : > { %3361 = vmatprep.mubr.bf16.mxu0 %v3591_v14 }
 0x10f   : > { %3362 = vmatmul.mubr.bf16.gmra.mrb[12].mxu0 %v3592_v15 }
 0x110   : > { %3365 = vmatprep.mubr.bf16.mxu0 %v3593_v16 }
 0x117   : > { %3366 = vmatmul.mubr.bf16.gmra.mrb[16].mxu0 %v3594_v17 }
 0x118   : > { %3369 = vmatprep.mubr.bf16.mxu0 %v3595_v18 }
 0x11f   : > { %3370 = vmatmul.mubr.bf16.gmra.mrb[20].mxu0 %v3596_v19 }
 0x120   : > { %3373 = vmatprep.mubr.bf16.mxu0 %v3597_v20 }
 0x127   : > { %3374 = vmatmul.mubr.bf16.gmra.mrb[24].mxu0 %v3598_v21 }
 0x128   : > { %3377 = vmatprep.mubr.bf16.mxu0 %v3599_v22 }
 0x12f   : > { %3378 = vmatmul.mubr.bf16.gmra.mrb[28].mxu0 %v3600_v23 }
 0x1ca   : > { %v3351_v29 = vpop.f32.mrb[0].mxu0 }
 0x1cb   : > { %v4539_v30 = vadd.f32 %v3351_v29, %v4536_v28  ;;  %v785_v31 = vpop.f32.mrb[1].mxu0 }
 0x1cc   : > { %v3352_v32 = vpop.f32.mrb[2].mxu0  ;;  %v4547_v39 = vadd.f32 %v4536_v28, %v785_v31 }
 0x1cd   : > { %v946_v33 = vand.u32 2147483647, %v4539_v30  ;;  %v4543_v34 = vadd.f32 %v3352_v32, %v4536_v28  ;;  %v788_v35 = vpop.f32.mrb[3].mxu0  ;;  %v914_v9 = vmax.f32 %v4539_v30, 0.0 }
 0x1ce   : > { %v4553_v45 = vadd.f32 %v4536_v28, %v788_v35  ;;  %v944_v48 = vand.u32 2147483647, %v4547_v39 }
 0x1cf   : > { %v978_v36 = vsub.f32 0.0, %v946_v33  ;;  %v947_v37 = vand.u32 2147483647, %v4543_v34  ;;  %v915_v15 = vmax.f32 %v4543_v34, 0.0 }
 0x1d0   : > { %v945_v56 = vand.u32 2147483647, %v4553_v45  ;;  %v976_v59 = vsub.f32 0.0, %v944_v48 }
 0x1d1   : > { %v1012_v38 = vmul.f32 1.442695, %v978_v36  ;;  %v979_v40 = vsub.f32 0.0, %v947_v37 }
 0x1d2   : > { %v3355_v41 = vpop.f32.mrb[4].mxu0  ;;  %v977_v4 = vsub.f32 0.0, %v945_v56  ;;  %v1008_v10 = vmul.f32 1.442695, %v976_v59 }
 0x1d3   : > { %3605 = vpow2.f32 %v1012_v38  ;;  %v1014_v42 = vmul.f32 1.442695, %v979_v40  ;;  %v4550_v43 = vadd.f32 %v3355_v41, %v4536_v28  ;;  %v801_v44 = vpop.f32.mrb[5].mxu0 }
 0x1d4   : > { %v4556_v46 = vadd.f32 %v4536_v28, %v801_v44  ;;  %v3356_v47 = vpop.f32.mrb[6].mxu0  ;;  %v1010_v23 = vmul.f32 1.442695, %v977_v4 }
 0x1d5   : > { %3607 = vpow2.f32 %v1014_v42  ;;  %v950_v49 = vand.u32 2147483647, %v4550_v43  ;;  %v4561_v50 = vadd.f32 %v3356_v47, %v4536_v28  ;;  %v804_v51 = vpop.f32.mrb[7].mxu0  ;;  %v918_v38 = vmax.f32 %v4550_v43, 0.0 }
 0x1d6   : > { %v948_v52 = vand.u32 2147483647, %v4556_v46  ;;  %v4565_v53 = vadd.f32 %v4536_v28, %v804_v51  ;;  %v916_v40 = vmax.f32 %v4556_v46, 0.0 }
 0x1d7   : > { %v982_v54 = vsub.f32 0.0, %v950_v49  ;;  %v951_v55 = vand.u32 2147483647, %v4561_v50  ;;  %v919_v41 = vmax.f32 %v4561_v50, 0.0 }
 0x1d8   : > { %v980_v57 = vsub.f32 0.0, %v948_v52  ;;  %v949_v58 = vand.u32 2147483647, %v4565_v53  ;;  %v917_v48 = vmax.f32 %v4565_v53, 0.0 }
 0x1d9   : > { %v1020_v60 = vmul.f32 1.442695, %v982_v54  ;;  %v983_v61 = vsub.f32 0.0, %v951_v55 }
 0x1da   : > { %v1016_v62 = vmul.f32 1.442695, %v980_v57  ;;  %v981_v63 = vsub.f32 0.0, %v949_v58  ;;  %v3359_v0 = vpop.f32.mrb[8].mxu0 }
 0x1db   : > { %3609 = vpow2.f32 %v1020_v60  ;;  %v1022_v1 = vmul.f32 1.442695, %v983_v61  ;;  %v4571_v2 = vadd.f32 %v3359_v0, %v4536_v28  ;;  %v817_v3 = vpop.f32.mrb[9].mxu0 }
 0x1dc   : > { %3611 = vpow2.f32 %v1016_v62  ;;  %v1018_v5 = vmul.f32 1.442695, %v981_v63  ;;  %v4574_v6 = vadd.f32 %v4536_v28, %v817_v3  ;;  %v3360_v7 = vpop.f32.mrb[10].mxu0 }
 0x1dd   : > { %v3606_v8 = vpop.eup %3605  ;;  %3613 = vpow2.f32 %v1022_v1  ;;  %v954_v11 = vand.u32 2147483647, %v4571_v2  ;;  %v820_v12 = vpop.f32.mrb[11].mxu0  ;;  %v4582_v20 = vadd.f32 %v3360_v7, %v4536_v28  ;;  %v922_v49 = vmax.f32 %v4571_v2, 0.0 }
 0x1de   : > { %v1090_v13 = vadd.f32 1.0, %v3606_v8  ;;  %3615 = vpow2.f32 %v1018_v5  ;;  %v1093_v17 = vmul.f32 -0.5, %v3606_v8  ;;  %v952_v19 = vand.u32 2147483647, %v4574_v6 }
 0x1df   : > { %v3608_v16 = vpop.eup %3607  ;;  %v986_v18 = vsub.f32 0.0, %v954_v11  ;;  %v1096_v27 = vand.u32 2147483647, %v3606_v8  ;;  %v4586_v31 = vadd.f32 %v4536_v28, %v820_v12  ;;  %v955_v36 = vand.u32 2147483647, %v4582_v20 }
 0x1e0   : > { %3617 = vlog2.f32 %v1090_v13  ;;  %v1099_v21 = vadd.f32 1.0, %v3608_v16  ;;  %v1102_v24 = vmul.f32 -0.5, %v3608_v16  ;;  %v984_v26 = vsub.f32 0.0, %v952_v19 }
 0x1e1   : > { %3619 = vpow2.f32 %v1008_v10  ;;  %v1028_v25 = vmul.f32 1.442695, %v986_v18  ;;  %v1105_v29 = vand.u32 2147483647, %v3608_v16  ;;  %v1094_v33 = vadd.f32 1.0, %v1093_v17 }
 0x1e2   : > { %3621 = vlog2.f32 %v1099_v21  ;;  %v3363_v32 = vpop.f32.mrb[12].mxu0  ;;  %v1024_v35 = vmul.f32 1.442695, %v984_v26  ;;  %v1103_v47 = vadd.f32 1.0, %v1102_v24  ;;  %vm4600_vm0 = vcmp.lt.f32.partialorder %v1096_v27, 0.0004427343 }
 0x1e3   : > { %3623 = vpow2.f32 %v1028_v25  ;;  %v833_v37 = vpop.f32.mrb[13].mxu0  ;;  %v920_v56 = vmax.f32 %v4574_v6, 0.0  ;;  %v953_v57 = vand.u32 2147483647, %v4586_v31  ;;  %v1095_v59 = vmul.f32 %v3606_v8, %v1094_v33 }
 0x1e4   : > { %3625 = vpow2.f32 %v1010_v23  ;;  %v3364_v42 = vpop.f32.mrb[14].mxu0  ;;  %vm4609_vm1 = vcmp.lt.f32.partialorder %v1105_v29, 0.0004427343  ;;  %v987_v62 = vsub.f32 0.0, %v955_v36  ;;  %v4617_v3 = vadd.f32 %v3363_v32, %v4536_v28 }
 0x1e5   : > { %v4592_v44 = vpop.eup %3609  ;;  %3627 = vpow2.f32 %v1024_v35  ;;  %v4596_v51 = vpop.f32.mrb[15].mxu0  ;;  %v1104_v4 = vmul.f32 %v3608_v16, %v1103_v47  ;;  %v4621_v7 = vadd.f32 %v4536_v28, %v833_v37  ;;  %v985_v12 = vsub.f32 0.0, %v953_v57 }
 0x1e6   : > { %v4598_v52 = vpop.eup %3611  ;;  %v1126_v55 = vadd.f32 1.0, %v4592_v44  ;;  %v1129_v0 = vmul.f32 -0.5, %v4592_v44  ;;  %v1030_v21 = vmul.f32 1.442695, %v987_v62  ;;  %v4629_v16 = vadd.f32 %v3364_v42, %v4536_v28 }
 0x1e7   : > { %v4607_v58 = vpop.eup %3613  ;;  %v1108_v61 = vadd.f32 1.0, %v4598_v52  ;;  %v1111_v5 = vmul.f32 -0.5, %v4598_v52  ;;  %v1132_v26 = vand.u32 2147483647, %v4592_v44  ;;  %v1114_v27 = vand.u32 2147483647, %v4598_v52 }
 0x1e8   : > { %v3616_v63 = vpop.eup %3615  ;;  %3629 = vlog2.f32 %v1126_v55  ;;  %v1135_v1 = vadd.f32 1.0, %v4607_v58  ;;  %v1138_v10 = vmul.f32 -0.5, %v4607_v58  ;;  %v1130_v25 = vadd.f32 1.0, %v1129_v0 }
 0x1e9   : > { %3631 = vlog2.f32 %v1108_v61  ;;  %v1117_v11 = vadd.f32 1.0, %v3616_v63  ;;  %v1120_v19 = vmul.f32 -0.5, %v3616_v63  ;;  %v1112_v35 = vadd.f32 1.0, %v1111_v5 }
 0x1ea   : > { %v3618_v8 = vpop.eup %3617  ;;  %3633 = vlog2.f32 %v1135_v1  ;;  %v4624_v13 = vpop.f32.mrb[16].mxu0  ;;  %v1141_v36 = vand.u32 2147483647, %v4607_v58  ;;  %v1139_v55 = vadd.f32 1.0, %v1138_v10  ;;  %v1026_v61 = vmul.f32 1.442695, %v985_v12 }
 0x1eb   : > { %v4626_v17 = vpop.eup %3619  ;;  %v1092_v18 = vmul.f32 0.6931472, %v3618_v8  ;;  %v4631_v23 = vpop.f32.mrb[17].mxu0  ;;  %3635 = vlog2.f32 %v1117_v11  ;;  %v1123_v1 = vand.u32 2147483647, %v3616_v63  ;;  %v1131_v8 = vmul.f32 %v4592_v44, %v1130_v25 }
 0x1ec   : > { %v3622_v24 = vpop.eup %3621  ;;  %v4640_v37 = vpop.f32.mrb[18].mxu0  ;;  %3637 = vpow2.f32 %v1030_v21  ;;  %vm4655_vm2 = vcmp.lt.f32.partialorder %v1132_v26, 0.0004427343  ;;  %vm4659_vm3 = vcmp.lt.f32.partialorder %v1114_v27, 0.0004427343  ;;  %v1113_v12 = vmul.f32 %v4598_v52, %v1112_v35 }
 0x1ed   : > { %v4635_v29 = vpop.eup %3623  ;;  %v1098_v32 = vsel %vm4600_vm0, %v1095_v59, %v1092_v18  ;;  %v1101_v33 = vmul.f32 0.6931472, %v3622_v24  ;;  %v4647_v62 = vpop.f32.mrb[19].mxu0  ;;  %v1121_v59 = vadd.f32 1.0, %v1120_v19  ;;  %vm4664_vm4 = vcmp.lt.f32.partialorder %v1141_v36, 0.0004427343 }
 0x1ee   : > { %v4642_v42 = vpop.eup %3625  ;;  %v1362_v47 = vadd.f32 %v1098_v32, %v914_v9  ;;  %v1162_v57 = vadd.f32 1.0, %v4635_v29  ;;  %v1140_v21 = vmul.f32 %v4607_v58, %v1139_v55  ;;  %vm4678_vm5 = vcmp.lt.f32.partialorder %v1123_v1, 0.0004427343 }
 0x1ef   : > { %v4649_v0 = vpop.eup %3627  ;;  %v1107_v54 = vsel %vm4609_vm1, %v1104_v4, %v1101_v33  ;;  %v1165_v4 = vmul.f32 -0.5, %v4635_v29  ;;  %v1122_v24 = vmul.f32 %v3616_v63, %v1121_v59  ;;  %v958_v52 = vand.u32 2147483647, %v4617_v3 }
 0x1f0   : > { %v1363_v5 = vadd.f32 %v1107_v54, %v915_v15  ;;  %3639 = vlog2.f32 %v1162_v57  ;;  %v1144_v34 = vadd.f32 1.0, %v4649_v0  ;;  %v4670_v10 = vadd.f32 -0.6931472, %v1362_v47 }
 0x1f1   : > { %3641 = vpow2.f32 %v1026_v61  ;;  %v1166_v36 = vadd.f32 1.0, %v1165_v4  ;;  %v956_v47 = vand.u32 2147483647, %v4621_v7  ;;  %v1168_v59 = vand.u32 2147483647, %v4635_v29 }
 0x1f2   : > { %v3630_v15 = vpop.eup %3629  ;;  %v4672_v11 = vadd.f32 -0.6931472, %v1363_v5  ;;  %v4675_v18 = vpop.f32.mrb[20].mxu0  ;;  %3643 = vlog2.f32 %v1144_v34  ;;  %v990_v1 = vsub.f32 0.0, %v958_v52  ;;  %v1147_v43 = vmul.f32 -0.5, %v4649_v0 }
 0x1f3   : > { %v3632_v19 = vpop.eup %3631  ;;  %v1128_v44 = vmul.f32 0.6931472, %v3630_v15  ;;  %v4682_v26 = vpop.f32.mrb[21].mxu0  ;;  %v988_v4 = vsub.f32 0.0, %v956_v47  ;;  %v959_v9 = vand.u32 2147483647, %v4629_v16 }
 0x1f4   : > { %v3634_v27 = vpop.eup %3633  ;;  %v1110_v33 = vmul.f32 0.6931472, %v3632_v19  ;;  %v4687_v35 = vpop.f32.mrb[22].mxu0  ;;  %v1150_v60 = vand.u32 2147483647, %v4649_v0 }
 0x1f5   : > { %v1134_v58 = vsel %vm4655_vm2, %v1131_v8, %v1128_v44  ;;  %v1137_v63 = vmul.f32 0.6931472, %v3634_v27  ;;  %v4692_v55 = vpop.f32.mrb[23].mxu0  ;;  %v3636_v57 = vpop.eup %3635  ;;  %v1032_v52 = vmul.f32 1.442695, %v988_v4  ;;  %v991_v25 = vsub.f32 0.0, %v959_v9 }
 0x1f6   : > { %v1366_v61 = vadd.f32 %v1134_v58, %v918_v38  ;;  %v1116_v54 = vsel %vm4659_vm3, %v1113_v12, %v1110_v33  ;;  %v1119_v8 = vmul.f32 0.6931472, %v3636_v57  ;;  %v1036_v38 = vmul.f32 1.442695, %v990_v1  ;;  %v3638_v15 = vpop.eup %3637 }
 0x1f7   : > { %v1364_v5 = vadd.f32 %v1116_v54, %v916_v40  ;;  %v1143_v30 = vsel %vm4664_vm4, %v1140_v21, %v1137_v63  ;;  %v1167_v40 = vmul.f32 %v4635_v29, %v1166_v36  ;;  %v1171_v21 = vadd.f32 1.0, %v3638_v15 }
 0x1f8   : > { %v1367_v34 = vadd.f32 %v1143_v30, %v919_v41  ;;  %v4707_v12 = vadd.f32 -0.6931472, %v1366_v61  ;;  %v1125_v46 = vsel %vm4678_vm5, %v1122_v24, %v1119_v8  ;;  %3645 = vpow2.f32 %v1036_v38 }
 0x1f9   : > { %v4713_v44 = vadd.f32 -0.6931472, %v1364_v5  ;;  %v1365_v41 = vadd.f32 %v1125_v46, %v917_v48  ;;  %3647 = vlog2.f32 %v1171_v21  ;;  %v1174_v36 = vmul.f32 -0.5, %v3638_v15 }
 0x1fa   : > { %v3640_v19 = vpop.eup %3639  ;;  %v4715_v50 = vadd.f32 -0.6931472, %v1367_v34  ;;  %v4719_v27 = vpop.f32.mrb[24].mxu0  ;;  %vm4729_vm6 = vcmp.lt.f32.partialorder %v1168_v59, 0.0004427343  ;;  %v923_v48 = vmax.f32 %v4582_v20, 0.0  ;;  %v4743_v59 = vadd.f32 %v4536_v28, %v4596_v51 }
 0x1fb   : > { %v1164_v33 = vmul.f32 0.6931472, %v3640_v19  ;;  %v4721_v24 = vpop.f32.mrb[25].mxu0  ;;  %v3642_v29 = vpop.eup %3641  ;;  %v4725_v63 = vadd.f32 -0.6931472, %v1365_v41  ;;  %v921_v57 = vmax.f32 %v4586_v31, 0.0  ;;  %v4756_v41 = vadd.f32 %v4624_v13, %v4536_v28 }
 0x1fc   : > { %v4727_v47 = vpop.f32.mrb[26].mxu0  ;;  %v1153_v61 = vadd.f32 1.0, %v3642_v29  ;;  %v3644_v1 = vpop.eup %3643  ;;  %v1148_v8 = vadd.f32 1.0, %v1147_v43  ;;  %v1177_v4 = vand.u32 2147483647, %v3638_v15  ;;  %v1156_v20 = vmul.f32 -0.5, %v3642_v29 }
 0x1fd   : > { %v4735_v54 = vpop.f32.mrb[27].mxu0  ;;  %v1170_v30 = vsel %vm4729_vm6, %v1167_v40, %v1164_v33  ;;  %v1038_v34 = vmul.f32 1.442695, %v991_v25  ;;  %vm4745_vm7 = vcmp.lt.f32.partialorder %v1150_v60, 0.0004427343  ;;  %v1175_v9 = vadd.f32 1.0, %v1174_v36 }
 0x1fe   : > { %3649 = vlog2.f32 %v1153_v61  ;;  %v926_v46 = vmax.f32 %v4617_v3, 0.0  ;;  %v1370_v40 = vadd.f32 %v1170_v30, %v922_v49  ;;  %v1146_v43 = vmul.f32 0.6931472, %v3644_v1 }
 0x1ff   : > { %3651 = vpow2.f32 %v1032_v52  ;;  %v957_v51 = vand.u32 2147483647, %v4743_v59  ;;  %v4760_v60 = vadd.f32 %v4536_v28, %v4631_v23  ;;  %v4764_v21 = vadd.f32 %v4640_v37, %v4536_v28 }
 0x200   : > { %3653 = vpow2.f32 %v1038_v34  ;;  %v1149_v49 = vmul.f32 %v4649_v0, %v1148_v8  ;;  %vm4769_vm8 = vcmp.lt.f32.partialorder %v1177_v4, 0.0004427343  ;;  %v1157_v52 = vadd.f32 1.0, %v1156_v20 }
 0x201   : > { %v927_v13 = vmax.f32 %v4629_v16, 0.0  ;;  %v1176_v36 = vmul.f32 %v3638_v15, %v1175_v9  ;;  %v1159_v23 = vand.u32 2147483647, %v3642_v29  ;;  %v989_v53 = vsub.f32 0.0, %v957_v51 }
 0x202   : > { %v4766_v2 = vpop.f32.mrb[28].mxu0  ;;  %v962_v61 = vand.u32 2147483647, %v4756_v41  ;;  %v4779_v1 = vpop.eup %3645  ;;  %v4781_v30 = vadd.f32 -0.6931472, %v1370_v40  ;;  %v1152_v0 = vsel %vm4745_vm7, %v1149_v49, %v1146_v43  ;;  %v4791_v51 = vadd.f32 %v4536_v28, %v4647_v62 }
 0x203   : > { %v4774_v25 = vpop.f32.mrb[29].mxu0  ;;  %v960_v8 = vand.u32 2147483647, %v4760_v60  ;;  %v963_v4 = vand.u32 2147483647, %v4764_v21  ;;  %v3648_v20 = vpop.eup %3647  ;;  %v1198_v15 = vadd.f32 1.0, %v4779_v1  ;;  %v1368_v43 = vadd.f32 %v1152_v0, %v920_v56 }
 0x204   : > { %v4777_v37 = vpop.f32.mrb[30].mxu0  ;;  %6320 = vst [vmem:[#allocation25_spill] sm:$0xff] %v4781_v30  ;;  %v1034_v9 = vmul.f32 1.442695, %v989_v53  ;;  %v1173_v58 = vmul.f32 0.6931472, %v3648_v20  ;;  %v1158_v49 = vmul.f32 %v3642_v29, %v1157_v52 }
 0x205   : > { %v994_v40 = vsub.f32 0.0, %v962_v61  ;;  %v992_v5 = vsub.f32 0.0, %v960_v8  ;;  %v995_v32 = vsub.f32 0.0, %v963_v4  ;;  %v4793_v38 = vpop.f32.mrb[31].mxu0  ;;  %vm4797_vm9 = vcmp.lt.f32.partialorder %v1159_v23, 0.0004427343 }
 0x206   : > { %3655 = vlog2.f32 %v1198_v15  ;;  %v1179_v62 = vsel %vm4769_vm8, %v1176_v36, %v1173_v58  ;;  %v1201_v20 = vmul.f32 -0.5, %v4779_v1  ;;  %v961_v6 = vand.u32 2147483647, %v4791_v51 }
 0x207   : > { %3657 = vpow2.f32 %v1034_v9  ;;  %v1044_v61 = vmul.f32 1.442695, %v994_v40  ;;  %v1371_v4 = vadd.f32 %v1179_v62, %v923_v48  ;;  %v1040_v34 = vmul.f32 1.442695, %v992_v5 }
 0x208   : > { %v3650_v53 = vpop.eup %3649  ;;  %v1046_v23 = vmul.f32 1.442695, %v995_v32  ;;  %v4809_v15 = vadd.f32 -0.6931472, %v1368_v43  ;;  %v4815_v5 = vadd.f32 %v4675_v18, %v4536_v28  ;;  %v1204_v9 = vand.u32 2147483647, %v4779_v1 }
 0x209   : > { %v3652_v8 = vpop.eup %3651  ;;  %v1155_v14 = vmul.f32 0.6931472, %v3650_v53  ;;  %3659 = vpow2.f32 %v1044_v61  ;;  %v4805_v0 = vadd.f32 -0.6931472, %v1371_v4  ;;  %v1202_v40 = vadd.f32 1.0, %v1201_v20 }
 0x20a   : > { %v3654_v56 = vpop.eup %3653  ;;  %v1180_v29 = vadd.f32 1.0, %v3652_v8  ;;  %v1183_v52 = vmul.f32 -0.5, %v3652_v8  ;;  %v993_v31 = vsub.f32 0.0, %v961_v6  ;;  %v1186_v43 = vand.u32 2147483647, %v3652_v8 }
 0x20b   : > { %v1161_v58 = vsel %vm4797_vm9, %v1158_v49, %v1155_v14  ;;  %v1207_v33 = vadd.f32 1.0, %v3654_v56  ;;  %v1210_v36 = vmul.f32 -0.5, %v3654_v56  ;;  %v4822_v14 = vadd.f32 %v4536_v28, %v4682_v26 }
 0x20c   : > { %v1369_v48 = vadd.f32 %v1161_v58, %v921_v57  ;;  %3661 = vlog2.f32 %v1180_v29  ;;  %v1184_v57 = vadd.f32 1.0, %v1183_v52  ;;  %v1213_v53 = vand.u32 2147483647, %v3654_v56 }
 0x20d   : > { %3663 = vlog2.f32 %v1207_v33  ;;  %v1211_v49 = vadd.f32 1.0, %v1210_v36  ;;  %v1042_v62 = vmul.f32 1.442695, %v993_v31  ;;  %v966_v61 = vand.u32 2147483647, %v4815_v5 }
 0x20e   : > { %v4824_v22 = vadd.f32 -0.6931472, %v1369_v48  ;;  %3665 = vpow2.f32 %v1040_v34  ;;  %v964_v58 = vand.u32 2147483647, %v4822_v14  ;;  %v1203_v33 = vmul.f32 %v4779_v1, %v1202_v40 }
 0x20f   : > { %3667 = vpow2.f32 %v1046_v23  ;;  %v998_v23 = vsub.f32 0.0, %v966_v61  ;;  %vm4835_vm10 = vcmp.lt.f32.partialorder %v1204_v9, 0.0004427343  ;;  %vm4839_vm11 = vcmp.lt.f32.partialorder %v1186_v43, 0.0004427343 }
 0x210   : > { %v3656_v4 = vpop.eup %3655  ;;  %3669 = vpow2.f32 %v1042_v62  ;;  %v1185_v18 = vmul.f32 %v3652_v8, %v1184_v57  ;;  %v1212_v34 = vmul.f32 %v3654_v56, %v1211_v49  ;;  %vm4843_vm12 = vcmp.lt.f32.partialorder %v1213_v53, 0.0004427343 }
 0x211   : > { %v3658_v6 = vpop.eup %3657  ;;  %v1200_v52 = vmul.f32 0.6931472, %v3656_v4  ;;  %v1052_v62 = vmul.f32 1.442695, %v998_v23  ;;  %v996_v20 = vsub.f32 0.0, %v964_v58  ;;  %v4853_v57 = vadd.f32 %v4687_v35, %v4536_v28 }
 0x212   : > { %v1189_v31 = vadd.f32 1.0, %v3658_v6  ;;  %v1192_v61 = vmul.f32 -0.5, %v3658_v6  ;;  %v4857_v49 = vadd.f32 %v4536_v28, %v4692_v55  ;;  %v1072_v53 = vadd.f32 1.0, %v4626_v17 }
 0x213   : > { %v3660_v32 = vpop.eup %3659  ;;  %v1206_v43 = vsel %vm4835_vm10, %v1203_v33, %v1200_v52  ;;  %v4861_v52 = vmul.f32 -0.5, %v4626_v17  ;;  %v1195_v35 = vand.u32 2147483647, %v3658_v6  ;;  %v1048_v19 = vmul.f32 1.442695, %v996_v20 }
 0x214   : > { %3671 = vlog2.f32 %v1189_v31  ;;  %v1234_v29 = vadd.f32 1.0, %v3660_v32  ;;  %v1237_v56 = vmul.f32 -0.5, %v3660_v32  ;;  %v1374_v33 = vadd.f32 %v1206_v43, %v926_v46 }
 0x215   : > { %3673 = vpow2.f32 %v1052_v62  ;;  %v1193_v36 = vadd.f32 1.0, %v1192_v61  ;;  %v1240_v1 = vand.u32 2147483647, %v3660_v32  ;;  %vm4879_vm13 = vcmp.lt.f32.partialorder %v1195_v35, 0.0004427343 }
 0x216   : > { %v3662_v40 = vpop.eup %3661  ;;  %3675 = vlog2.f32 %v1234_v29  ;;  %v1238_v29 = vadd.f32 1.0, %v1237_v56  ;;  %v4874_v4 = vadd.f32 -0.6931472, %v1374_v33  ;;  %v1081_v43 = vadd.f32 1.0, %v4642_v42 }
 0x217   : > { %v3664_v8 = vpop.eup %3663  ;;  %v1182_v31 = vmul.f32 0.6931472, %v3662_v40  ;;  %vm4883_vm14 = vcmp.lt.f32.partialorder %v1240_v1, 0.0004427343  ;;  %vm1479_vm4 = vcmask 523264   ;;  %vm2519_vm9 = vcmask 261120  }
 0x218   : > { %v3666_v23 = vpop.eup %3665  ;;  %v1209_v9 = vmul.f32 0.6931472, %v3664_v8  ;;  %v967_v8 = vand.u32 2147483647, %v4853_v57  ;;  %6329 = vst [vmem:[#allocation26_spill] sm:$0xff] %v4874_v4 }
 0x219   : > { %v3668_v58 = vpop.eup %3667  ;;  %v1216_v62 = vadd.f32 1.0, %v3666_v23  ;;  %v1188_v3 = vsel %vm4839_vm11, %v1185_v18, %v1182_v31  ;;  %v1219_v46 = vmul.f32 -0.5, %v3666_v23  ;;  %v1222_v61 = vand.u32 2147483647, %v3666_v23 }
 0x21a   : > { %v1215_v55 = vsel %vm4843_vm12, %v1212_v34, %v1209_v9  ;;  %v1243_v26 = vadd.f32 1.0, %v3668_v58  ;;  %v4870_v30 = vpop.eup %3669  ;;  %v1246_v20 = vmul.f32 -0.5, %v3668_v58  ;;  %v999_v31 = vsub.f32 0.0, %v967_v8 }
 0x21b   : > { %v1375_v40 = vadd.f32 %v1215_v55, %v927_v13  ;;  %3677 = vlog2.f32 %v1216_v62  ;;  %v1225_v16 = vadd.f32 1.0, %v4870_v30  ;;  %v1194_v13 = vmul.f32 %v3658_v6, %v1193_v36 }
 0x21c   : > { %3679 = vlog2.f32 %v1243_v26  ;;  %v6334_v26 = vmax.f32 %v4621_v7, 0.0  ;;  %v1239_v36 = vmul.f32 %v3660_v32, %v1238_v29  ;;  %v1220_v35 = vadd.f32 1.0, %v1219_v46 }
 0x21d   : > { %v4876_v34 = vadd.f32 -0.6931472, %v1375_v40  ;;  %3681 = vpow2.f32 %v1048_v19  ;;  %vm4891_vm15 = vcmp.lt.f32.partialorder %v1222_v61, 0.0004427343  ;;  %v1247_v1 = vadd.f32 1.0, %v1246_v20 }
 0x21e   : > { %v3672_v18 = vpop.eup %3671  ;;  %v1372_v48 = vadd.f32 %v1188_v3, %v6334_v26  ;;  %3683 = vlog2.f32 %v1225_v16  ;;  %v1249_v55 = vand.u32 2147483647, %v3668_v58  ;;  %v1228_v19 = vmul.f32 -0.5, %v4870_v30 }
 0x21f   : > { %v3674_v33 = vpop.eup %3673  ;;  %v1191_v6 = vmul.f32 0.6931472, %v3672_v18  ;;  %v1054_v26 = vmul.f32 1.442695, %v999_v31  ;;  %v965_v8 = vand.u32 2147483647, %v4857_v49  ;;  %3685 = vlog2.f32 %v1072_v53 }
 0x220   : > { %v1270_v40 = vadd.f32 1.0, %v3674_v33  ;;  %v3676_v7 = vpop.eup %3675  ;;  %v4899_v16 = vadd.f32 -0.6931472, %v1372_v48  ;;  %v6337_v32 = vmax.f32 %v4743_v59, 0.0  ;;  %v1221_v61 = vmul.f32 %v3666_v23, %v1220_v35 }
 0x221   : > { %v1197_v3 = vsel %vm4879_vm13, %v1194_v13, %v1191_v6  ;;  %v1236_v46 = vmul.f32 0.6931472, %v3676_v7  ;;  %v1231_v20 = vand.u32 2147483647, %v4870_v30  ;;  %v997_v18 = vsub.f32 0.0, %v965_v8 }
 0x222   : > { %v1373_v29 = vadd.f32 %v1197_v3, %v6337_v32  ;;  %3687 = vlog2.f32 %v1270_v40  ;;  %vm4908_vm0 = vcmp.lt.f32.partialorder %v1249_v55, 0.0004427343  ;;  %v1273_v9 = vmul.f32 -0.5, %v3674_v33 }
 0x223   : > { %3689 = vpow2.f32 %v1054_v26  ;;  %v1242_v13 = vsel %vm4883_vm14, %v1239_v36, %v1236_v46  ;;  %v1248_v31 = vmul.f32 %v3668_v58, %v1247_v1  ;;  %v1229_v6 = vadd.f32 1.0, %v1228_v19 }
 0x224   : > { %v4904_v4 = vadd.f32 -0.6931472, %v1373_v29  ;;  %v1050_v23 = vmul.f32 1.442695, %v997_v18  ;;  %v6340_v40 = vmax.f32 %v4756_v41, 0.0  ;;  %v1274_v19 = vadd.f32 1.0, %v1273_v9 }
 0x225   : > { %v3678_v56 = vpop.eup %3677  ;;  %vm4919_vm1 = vcmp.lt.f32.partialorder %v1231_v20, 0.0004427343  ;;  %v1276_v58 = vand.u32 2147483647, %v3674_v33  ;;  %v1078_v8 = vand.u32 2147483647, %v4626_v17  ;;  %v1230_v62 = vmul.f32 %v4870_v30, %v1229_v6 }
 0x226   : > { %v3680_v59 = vpop.eup %3679  ;;  %v1218_v48 = vmul.f32 0.6931472, %v3678_v56  ;;  %v1430_v35 = vpack.c.bf16 %v4904_v4, %v4899_v16  ;;  %v1378_v7 = vadd.f32 %v1242_v13, %v6340_v40  ;;  %3691 = vpow2.f32 %v1050_v23 }
 0x227   : > { %v1245_v3 = vmul.f32 0.6931472, %v3680_v59  ;;  %v3682_v36 = vpop.eup %3681  ;;  %v6343_v32 = vmax.f32 %v4764_v21, 0.0  ;;  %3693 = vlog2.f32 %v1081_v43  ;;  %v6344_v20 = vmax.f32 %v4760_v60, 0.0 }
 0x228   : > { %v1224_v55 = vsel %vm4891_vm15, %v1221_v61, %v1218_v48  ;;  %v3684_v56 = vpop.eup %3683  ;;  %v1252_v41 = vadd.f32 1.0, %v3682_v36  ;;  %v4929_v61 = vadd.f32 -0.6931472, %v1378_v7  ;;  %v1076_v13 = vadd.f32 1.0, %v4861_v52 }
 0x229   : > { %v1251_v1 = vsel %vm4908_vm0, %v1248_v31, %v1245_v3  ;;  %v1227_v46 = vmul.f32 0.6931472, %v3684_v56  ;;  %v1376_v18 = vadd.f32 %v1224_v55, %v6344_v20  ;;  %v1084_v53 = vmul.f32 -0.5, %v4642_v42  ;;  %v3686_v9 = vpop.eup %3685 }
 0x22a   : > { %v1379_v29 = vadd.f32 %v1251_v1, %v6343_v32  ;;  %3695 = vlog2.f32 %v1252_v41  ;;  %v1255_v48 = vmul.f32 -0.5, %v3682_v36  ;;  %v6345_v30 = vmax.f32 %v4791_v51, 0.0 }
 0x22b   : > { %v1233_v21 = vsel %vm4919_vm1, %v1230_v62, %v1227_v46  ;;  %v1275_v23 = vmul.f32 %v3674_v33, %v1274_v19  ;;  %vm4941_vm2 = vcmp.lt.f32.partialorder %v1276_v58, 0.0004427343  ;;  %vm4945_vm3 = vcmp.lt.f32.partialorder %v1078_v8, 0.0004427343 }
 0x22c   : > { %v4935_v59 = vadd.f32 -0.6931472, %v1379_v29  ;;  %v3688_v31 = vpop.eup %3687  ;;  %v1377_v6 = vadd.f32 %v1233_v21, %v6345_v30  ;;  %v1074_v43 = vmul.f32 0.6931472, %v3686_v9  ;;  %v4953_v55 = vadd.f32 %v4719_v27, %v4536_v28 }
 0x22d   : > { %v3690_v40 = vpop.eup %3689  ;;  %v1272_v3 = vmul.f32 0.6931472, %v3688_v31  ;;  %v4955_v51 = vadd.f32 -0.6931472, %v1376_v18  ;;  %v1077_v58 = vmul.f32 %v4626_v17, %v1076_v13  ;;  %v1256_v56 = vadd.f32 1.0, %v1255_v48 }
 0x22e   : > { %v1433_v7 = vpack.c.bf16 %v4935_v59, %v4929_v61  ;;  %v4957_v33 = vadd.f32 -0.6931472, %v1377_v6  ;;  %v1279_v26 = vadd.f32 1.0, %v3690_v40  ;;  %v1258_v1 = vand.u32 2147483647, %v3682_v36 }
 0x22f   : > { %v1085_v19 = vadd.f32 1.0, %v1084_v53  ;;  %v970_v41 = vand.u32 2147483647, %v4953_v55  ;;  %v1278_v32 = vsel %vm4941_vm2, %v1275_v23, %v1272_v3  ;;  %v1087_v27 = vand.u32 2147483647, %v4642_v42 }
 0x230   : > { %v1432_v8 = vpack.c.bf16 %v4957_v33, %v4955_v51  ;;  %3697 = vlog2.f32 %v1279_v26  ;;  %v4966_v29 = vpop.eup %3691  ;;  %v1282_v46 = vmul.f32 -0.5, %v3690_v40  ;;  %v1080_v17 = vsel %vm4945_vm3, %v1077_v58, %v1074_v43 }
 0x231   : > { %v1002_v62 = vsub.f32 0.0, %v970_v41  ;;  %v4972_v20 = vadd.f32 %v4536_v28, %v4721_v24  ;;  %v935_v18 = vmax.f32 %v4853_v57, 0.0  ;;  %v1285_v13 = vand.u32 2147483647, %v3690_v40  ;;  %v3694_v21 = vpop.eup %3693 }
 0x232   : > { %v933_v53 = vmax.f32 %v4857_v49, 0.0  ;;  %v1261_v9 = vadd.f32 1.0, %v4966_v29  ;;  %v6350_v48 = vmax.f32 %v4815_v5, 0.0  ;;  %v1257_v30 = vmul.f32 %v3682_v36, %v1256_v56 }
 0x233   : > { %v1060_v6 = vmul.f32 1.442695, %v1002_v62  ;;  %v4981_v23 = vadd.f32 %v4727_v47, %v4536_v28  ;;  %vm4983_vm5 = vcmp.lt.f32.partialorder %v1258_v1, 0.0004427343  ;;  %v1083_v57 = vmul.f32 0.6931472, %v3694_v21 }
 0x234   : > { %v1382_v31 = vadd.f32 %v1278_v32, %v6350_v48  ;;  %3699 = vlog2.f32 %v1261_v9  ;;  %v1086_v60 = vmul.f32 %v4642_v42, %v1085_v19  ;;  %v6353_v52 = vmax.f32 %v4547_v39, 0.0  ;;  %v3696_v43 = vpop.eup %3695 }
 0x235   : > { %v1283_v5 = vadd.f32 1.0, %v1282_v46  ;;  %vm1088_vm6 = vcmp.lt.f32.partialorder %v1087_v27, 0.0004427343  ;;  %3701 = vpow2.f32 %v1060_v6  ;;  %v968_v36 = vand.u32 2147483647, %v4972_v20 }
 0x236   : > { %v1360_v3 = vadd.f32 %v1080_v17, %v6353_v52  ;;  %vm4991_vm7 = vcmp.lt.f32.partialorder %v1285_v13, 0.0004427343  ;;  %v1264_v26 = vmul.f32 -0.5, %v4966_v29  ;;  %v1089_v58 = vsel %vm1088_vm6, %v1086_v60, %v1083_v57 }
 0x237   : > { %v971_v56 = vand.u32 2147483647, %v4981_v23  ;;  %v4997_v1 = vadd.f32 -0.6931472, %v1382_v31  ;;  %v6356_v39 = vmax.f32 %v4553_v45, 0.0  ;;  %v1000_v19 = vsub.f32 0.0, %v968_v36 }
 0x238   : > { %v5003_v41 = vadd.f32 %v4536_v28, %v4735_v54  ;;  %v1254_v32 = vmul.f32 0.6931472, %v3696_v43  ;;  %v3094_v27 = vadd.f32 -0.6931472, %v1360_v3  ;;  %v5007_v17 = vadd.f32 %v4766_v2, %v4536_v28 }
 0x239   : > { %v1361_v42 = vadd.f32 %v1089_v58, %v6356_v39  ;;  %v1003_v46 = vsub.f32 0.0, %v971_v56  ;;  %v1056_v13 = vmul.f32 1.442695, %v1000_v19  ;;  %v5011_v9 = vadd.f32 %v4536_v28, %v4774_v25 }
 0x23a   : > { %v5015_v45 = vadd.f32 %v4777_v37, %v4536_v28  ;;  %v3698_v21 = vpop.eup %3697  ;;  %v1284_v54 = vmul.f32 %v3690_v40, %v1283_v5  ;;  %v1265_v48 = vadd.f32 1.0, %v1264_v26  ;;  %v969_v6 = vand.u32 2147483647, %v5003_v41 }
 0x23b   : > { %v3095_v62 = vadd.f32 -0.6931472, %v1361_v42  ;;  %v1062_v31 = vmul.f32 1.442695, %v1003_v46  ;;  %v1281_v57 = vmul.f32 0.6931472, %v3698_v21  ;;  %3703 = vpow2.f32 %v1056_v13 }
 0x23c   : > { %v5020_v2 = vadd.f32 %v4536_v28, %v4793_v38  ;;  %v1267_v25 = vand.u32 2147483647, %v4966_v29  ;;  %v1001_v52 = vsub.f32 0.0, %v969_v6  ;;  %v974_v37 = vand.u32 2147483647, %v5007_v17 }
 0x23d   : > { %v1424_v60 = vpack.c.bf16 %v3095_v62, %v3094_v27  ;;  %3705 = vpow2.f32 %v1062_v31  ;;  %v1260_v40 = vsel %vm4983_vm5, %v1257_v30, %v1254_v32  ;;  %v1287_v3 = vsel %vm4991_vm7, %v1284_v54, %v1281_v57  ;;  %v2297_v54 = vld [vmem:[%s4483_s15] sm:$0xf]  ;;  %s6496_s15 = sld [smem:[#allocation23_spill]] }
 0x23e   : > { %v972_v43 = vand.u32 2147483647, %v5011_v9  ;;  %v975_v5 = vand.u32 2147483647, %v5015_v45  ;;  %v3700_v28 = vpop.eup %3699  ;;  %v1383_v38 = vadd.f32 %v1287_v3, %v935_v18  ;;  %v1266_v36 = vmul.f32 %v4966_v29, %v1265_v48 }
 0x23f   : > { %3389 = vmatprep.mubr.msk.bf16.mxu1 %vm1479_vm4, %v1424_v60  ;;  %v6357_v26 = vpack.c.bf16 %v4672_v11, %v4670_v10  ;;  %v1058_v24 = vmul.f32 1.442695, %v1001_v52  ;;  %v1006_v30 = vsub.f32 0.0, %v974_v37  ;;  %v5036_v58 = vpop.eup %3701  ;;  %v1263_v47 = vmul.f32 0.6931472, %v3700_v28 }
 0x240   : > { %v6358_v56 = vpack.c.bf16 %v4725_v63, %v4713_v44  ;;  %v1004_v39 = vsub.f32 0.0, %v972_v43  ;;  %v1007_v42 = vsub.f32 0.0, %v975_v5  ;;  %v973_v18 = vand.u32 2147483647, %v5020_v2 }
 0x241   : > { %3390 = vmatmul.mubr.msk.bf16.vlgmr.msra.gmra.mrb[0].mxu1 %vm1479_vm4, %v6357_v26  ;;  %v6359_v29 = vmax.f32 %v4822_v14, 0.0  ;;  %v5045_v10 = vadd.f32 -0.6931472, %v1383_v38  ;;  %vm1268_vm8 = vcmp.lt.f32.partialorder %v1267_v25, 0.0004427343  ;;  %v1306_v11 = vadd.f32 1.0, %v5036_v58 }
 0x242   : > { %3393 = vmatprep.mubr.msk.bf16.mxu1 %vm1479_vm4, %v6358_v56  ;;  %v1269_v32 = vsel %vm1268_vm8, %v1266_v36, %v1263_v47  ;;  %3707 = vpow2.f32 %v1058_v24  ;;  %v1068_v27 = vmul.f32 1.442695, %v1006_v30  ;;  %v1064_v46 = vmul.f32 1.442695, %v1004_v39 }
 0x243   : > { %v1380_v19 = vadd.f32 %v1260_v40, %v6359_v29  ;;  %v1435_v44 = vpack.c.bf16 %v5045_v10, %v4997_v1  ;;  %v1381_v63 = vadd.f32 %v1269_v32, %v933_v53  ;;  %3709 = vlog2.f32 %v1306_v11  ;;  %v6362_v29 = vld [vmem:[#allocation25_spill] sm:$0xff]  ;;  %p6498_p12 = scmp.ne.s32.totalorder %s6496_s15, 0 }
 0x244   : > { %3711 = vpow2.f32 %v1068_v27  ;;  %v1070_v14 = vmul.f32 1.442695, %v1007_v42  ;;  %v1005_v62 = vsub.f32 0.0, %v973_v18  ;;  %v2335_v6 = vlaneseq }
 0x245   : > { %v5052_v13 = vadd.f32 -0.6931472, %v1380_v19  ;;  %v5054_v21 = vadd.f32 -0.6931472, %v1381_v63  ;;  %3713 = vpow2.f32 %v1064_v46  ;;  %v5057_v48 = vpop.eup %3703  ;;  %v6360_v60 = vpack.c.bf16 %v4715_v50, %v4707_v12  ;;  %p4053_p2 = pnand %p4052_p8, %p6498_p12 }
 0x246   : > { %3715 = vpow2.f32 %v1070_v14  ;;  %v1066_v31 = vmul.f32 1.442695, %v1005_v62  ;;  %v1288_v53 = vadd.f32 1.0, %v5057_v48  ;;  %v6361_v52 = vpack.c.bf16 %v4824_v22, %v4809_v15 }
 0x247   : > { %v3706_v57 = vpop.eup %3705  ;;  %v1434_v49 = vpack.c.bf16 %v5054_v21, %v5052_v13  ;;  %v5070_v37 = vunpack.c.l.bf16 %v2297_v54  ;;  %v1309_v40 = vmul.f32 -0.5, %v5036_v58  ;;  %v5073_v3 = vshrl.u32 %v2335_v6, 7  ;;  %p4054_p6 = pneg %p4053_p2 }
 0x248   : > { %v1315_v25 = vadd.f32 1.0, %v3706_v57  ;;  %3717 = vpow2.f32 %v1066_v31  ;;  %v1318_v28 = vmul.f32 -0.5, %v3706_v57  ;;  %v938_v24 = vmax.f32 %v4953_v55, 0.0 }
 0x249   : > { %3394 = vmatmul.mubr.msk.bf16.gmra.mrb[4].mxu1 %vm1479_vm4, %v6360_v60  ;;  %3719 = vlog2.f32 %v1288_v53  ;;  %v2520_v12 = vsel %vm2519_vm9, %v5070_v37, 0.0  ;;  %v2356_v50 = vsub.s32 1, %v5073_v3  ;;  %v2375_v43 = vsub.s32 2, %v5073_v3 }
 0x24a   : > { %3397 = vmatprep.mubr.msk.bf16.mxu1 %vm1479_vm4, %v6361_v52  ;;  %3721 = vlog2.f32 %v1315_v25  ;;  %2521 = vadd.xlane.f32.xlu0 %v2520_v12  ;;  %v1310_v22 = vadd.f32 1.0, %v1309_v40  ;;  %v1312_v30 = vand.u32 2147483647, %v5036_v58  ;;  %v936_v47 = vmax.f32 %v4972_v20, 0.0 }
 0x24b   : > { %v5082_v36 = vrot.slane %v5070_v37, %v2356_v50  ;;  %v1291_v56 = vmul.f32 -0.5, %v5057_v48  ;;  %v6363_v19 = vpack.c.bf16 %v4805_v0, %v6362_v29  ;;  %v5099_v55 = vrot.slane %v5070_v37, %v2375_v43 }
 0x24c   : > { %v5078_v5 = vpop.eup %3707  ;;  %v1294_v20 = vand.u32 2147483647, %v5057_v48  ;;  %v939_v32 = vmax.f32 %v4981_v23, 0.0  ;;  %v1321_v27 = vand.u32 2147483647, %v3706_v57  ;;  %v1311_v0 = vmul.f32 %v5036_v58, %v1310_v22 }
 0x24d   : > { %v3710_v15 = vpop.eup %3709  ;;  %v1297_v38 = vadd.f32 1.0, %v5078_v5  ;;  %2363 = vbcast.lane.b32.xlu1 %v5082_v36, 264  ;;  %v1319_v63 = vadd.f32 1.0, %v1318_v28  ;;  %v937_v14 = vmax.f32 %v5003_v41, 0.0  ;;  %vm5114_vm10 = vcmp.lt.f32.partialorder %v1312_v30, 0.0004427343 }
 0x24e   : > { %v5084_v26 = vpop.eup %3711  ;;  %v1308_v42 = vmul.f32 0.6931472, %v3710_v15  ;;  %v1292_v23 = vadd.f32 1.0, %v1291_v56  ;;  %v1300_v31 = vmul.f32 -0.5, %v5078_v5  ;;  %v2337_v41 = vsub.s32 0, %v5073_v3  ;;  %v6370_v56 = vld [vmem:[#allocation26_spill] sm:$0xff] }
 0x24f   : > { %v5090_v39 = vpop.eup %3713  ;;  %3723 = vlog2.f32 %v1297_v38  ;;  %v1342_v18 = vadd.f32 1.0, %v5084_v26  ;;  %v1345_v16 = vmul.f32 -0.5, %v5084_v26  ;;  %vm5125_vm11 = vcmp.lt.f32.partialorder %v1294_v20, 0.0004427343 }
 0x250   : > { %v5101_v11 = vpop.eup %3715  ;;  %v1324_v46 = vadd.f32 1.0, %v5090_v39  ;;  %v1314_v4 = vsel %vm5114_vm10, %v1311_v0, %v1308_v42  ;;  %vm5129_vm12 = vcmp.lt.f32.partialorder %v1321_v27, 0.0004427343  ;;  %v1320_v40 = vmul.f32 %v3706_v57, %v1319_v63 }
 0x251   : > { %3398 = vmatmul.mubr.msk.bf16.gmra.mrb[8].mxu1 %vm1479_vm4, %v6363_v19  ;;  %3725 = vlog2.f32 %v1342_v18  ;;  %2378 = vbcast.lane.b32.xlu1 %v5099_v55, 256  ;;  %v1303_v12 = vand.u32 2147483647, %v5078_v5  ;;  %v1386_v50 = vadd.f32 %v1314_v4, %v938_v24  ;;  %v1293_v43 = vmul.f32 %v5057_v48, %v1292_v23 }
 0x252   : > { %3401 = vmatprep.mubr.msk.bf16.mxu1 %vm1479_vm4, %v1430_v35  ;;  %v5112_v62 = vpop.eup %3717  ;;  %3727 = vlog2.f32 %v1324_v46  ;;  %v1351_v35 = vadd.f32 1.0, %v5101_v11  ;;  %v1301_v15 = vadd.f32 1.0, %v1300_v31  ;;  %v1346_v38 = vadd.f32 1.0, %v1345_v16 }
 0x253   : > { %v3720_v6 = vpop.eup %3719  ;;  %v1333_v22 = vadd.f32 1.0, %v5112_v62  ;;  %v1327_v30 = vmul.f32 -0.5, %v5090_v39  ;;  %v6371_v42 = vpack.c.bf16 %v4876_v34, %v6370_v56  ;;  %v5145_v57 = vrot.slane %v5070_v37, %v2337_v41 }
 0x254   : > { %v3722_v58 = vpop.eup %3721  ;;  %v1290_v53 = vmul.f32 0.6931472, %v3720_v6  ;;  %3729 = vlog2.f32 %v1351_v35  ;;  %v1354_v18 = vmul.f32 -0.5, %v5101_v11  ;;  %vm5154_vm13 = vcmp.lt.f32.partialorder %v1303_v12, 0.0004427343 }
 0x255   : > { %v1317_v52 = vmul.f32 0.6931472, %v3722_v58  ;;  %2382 = vbcast.lane.b32.xlu1 %v5099_v55, 264  ;;  %3731 = vlog2.f32 %v1333_v22  ;;  %v1348_v19 = vand.u32 2147483647, %v5084_v26  ;;  %v1302_v0 = vmul.f32 %v5078_v5, %v1301_v15 }
 0x256   : > { %v1296_v48 = vsel %vm5125_vm11, %v1293_v43, %v1290_v53  ;;  %v1330_v20 = vand.u32 2147483647, %v5090_v39  ;;  %v5160_v27 = vadd.f32 -0.6931472, %v1386_v50  ;;  %v1347_v33 = vmul.f32 %v5084_v26, %v1346_v38 }
 0x257   : > { %v1323_v28 = vsel %vm5129_vm12, %v1320_v40, %v1317_v52  ;;  %v1384_v51 = vadd.f32 %v1296_v48, %v936_v47  ;;  %v1336_v54 = vmul.f32 -0.5, %v5112_v62  ;;  %v1355_v16 = vadd.f32 1.0, %v1354_v18 }
 0x258   : > { %v1387_v24 = vadd.f32 %v1323_v28, %v939_v32  ;;  %vm5172_vm14 = vcmp.lt.f32.partialorder %v1348_v19, 0.0004427343  ;;  %v1357_v47 = vand.u32 2147483647, %v5101_v11  ;;  %v942_v41 = vmax.f32 %v5007_v17, 0.0  ;;  %v5263_v17 = vld [vmem:[%s4476_s27 + $0x10] sm:$0xff]  }
 0x259   : > { %3402 = vmatmul.mubr.msk.bf16.gmra.mrb[12].mxu1 %vm1479_vm4, %v6371_v42  ;;  %v3724_v34 = vpop.eup %3723  ;;  %2340 = vbcast.lane.b32.xlu1 %v5145_v57, 256  ;;  %v943_v53 = vmax.f32 %v5015_v45, 0.0  ;;  %v2394_v60 = vsub.s32 3, %v5073_v3  ;;  %v3118_v52 = vadd.f32 -0.6931472, %v1384_v51  ;;  %v1337_v12 = vadd.f32 1.0, %v1336_v54 }
 0x25a   : > { %3405 = vmatprep.mubr.msk.bf16.mxu1 %vm1479_vm4, %v1432_v8  ;;  %v5162_v32 = vadd.f32 -0.6931472, %v1387_v24  ;;  %v1299_v46 = vmul.f32 0.6931472, %v3724_v34  ;;  %v1328_v8 = vadd.f32 1.0, %v1327_v30  ;;  %v1356_v50 = vmul.f32 %v5101_v11, %v1355_v16 }
 0x25b   : > { %v3726_v63 = vpop.eup %3725  ;;  %vm5188_vm15 = vcmp.lt.f32.partialorder %v1330_v20, 0.0004427343  ;;  %v1339_v43 = vand.u32 2147483647, %v5112_v62  ;;  %vm1358_vm0 = vcmp.lt.f32.partialorder %v1357_v47, 0.0004427343  ;;  %v1338_v13 = vmul.f32 %v5112_v62, %v1337_v12 }
 0x25c   : > { %v3728_v23 = vpop.eup %3727  ;;  %v1437_v31 = vpack.c.bf16 %v5162_v32, %v5160_v27  ;;  %v1305_v6 = vsel %vm5154_vm13, %v1302_v0, %v1299_v46  ;;  %v1344_v4 = vmul.f32 0.6931472, %v3726_v63  ;;  %v940_v15 = vmax.f32 %v5011_v9, 0.0 }
 0x25d   : > { %v1385_v35 = vadd.f32 %v1305_v6, %v937_v14  ;;  %v1326_v26 = vmul.f32 0.6931472, %v3728_v23  ;;  %v1329_v14 = vmul.f32 %v5090_v39, %v1328_v8  ;;  %2344 = vbcast.lane.b32.xlu1 %v5145_v57, 264  ;;  %v2413_v11 = vsub.s32 4, %v5073_v3 }
 0x25e   : > { %v1350_v58 = vsel %vm5172_vm14, %v1347_v33, %v1344_v4  ;;  %v3730_v25 = vpop.eup %3729  ;;  %v2395_v21 = vrot.slane %v5070_v37, %v2394_v60  ;;  %v941_v30 = vmax.f32 %v5020_v2, 0.0  ;;  %vm1340_vm1 = vcmp.lt.f32.partialorder %v1339_v43, 0.0004427343  ;;  %v5249_v4 = vld [vmem:[%s4476_s27] sm:$0xff]  }
 0x25f   : > { %v3119_v40 = vadd.f32 -0.6931472, %v1385_v35  ;;  %v1353_v45 = vmul.f32 0.6931472, %v3730_v25  ;;  %v1390_v61 = vadd.f32 %v1350_v58, %v942_v41  ;;  %v1332_v59 = vsel %vm5188_vm15, %v1329_v14, %v1326_v26  ;;  %v5252_v41 = vld [vmem:[%s4476_s27 + $0x18] sm:$0xff]  }
 0x260   : > { %2359 = vbcast.lane.b32.xlu0 %v5082_v36, 256  ;;  %v2414_v62 = vrot.slane %v5070_v37, %v2413_v11  ;;  %v2432_v1 = vsub.s32 5, %v5073_v3  ;;  %v2470_v19 = vsub.s32 7, %v5073_v3 }
 0x261   : > { %3406 = vmatmul.mubr.msk.bf16.gmra.mrb[16].mxu1 %vm1479_vm4, %v1433_v7  ;;  %v1436_v39 = vpack.c.bf16 %v3119_v40, %v3118_v52  ;;  %v3732_v7 = vpop.eup %3731  ;;  %v1359_v22 = vsel %vm1358_vm0, %v1356_v50, %v1353_v45  ;;  %2367 = vbcast.lane.b32.xlu1 %v5082_v36, 272  ;;  %v3124_v56 = vadd.f32 -0.6931472, %v1390_v61  ;;  %v5266_v45 = vld [vmem:[%s4476_s27 + $0x20] sm:$0xff]  }
 0x262   : > { %3409 = vmatprep.mubr.msk.bf16.mxu1 %vm1479_vm4, %v1434_v49  ;;  %v1391_v28 = vadd.f32 %v1359_v22, %v943_v53  ;;  %v1335_v38 = vmul.f32 0.6931472, %v3732_v7  ;;  %v1388_v49 = vadd.f32 %v1332_v59, %v940_v15  ;;  %v2433_v10 = vrot.slane %v5070_v37, %v2432_v1  ;;  %v5276_v7 = vld [vmem:[%s4476_s27 + $0x28] sm:$0xff]  }
 0x264   : > { %v3125_v42 = vadd.f32 -0.6931472, %v1391_v28  ;;  %v1341_v48 = vsel %vm1340_vm1, %v1338_v13, %v1335_v38  ;;  %2401 = vbcast.lane.b32.xlu0 %v2395_v21, 264  ;;  %v3122_v18 = vadd.f32 -0.6931472, %v1388_v49  ;;  %v5284_v28 = vld [vmem:[%s4476_s27 + $0x30] sm:$0xff]  }
 0x265   : > { %v1389_v9 = vadd.f32 %v1341_v48, %v941_v30  ;;  %2397 = vbcast.lane.b32.xlu1 %v2395_v21, 256  ;;  %6379 = vst [vmem:[#allocation25_spill] sm:$0xff] %v5284_v28 }
 0x266   : > { %v1439_v24 = vpack.c.bf16 %v3125_v42, %v3124_v56  ;;  %v5292_v56 = vld [vmem:[%s4476_s27 + $0x8] sm:$0xff]  }
 0x267   : > { %v3123_v34 = vadd.f32 -0.6931472, %v1389_v9  ;;  %6381 = vst [vmem:[#allocation27_spill] sm:$0xff] %v5292_v56 }
 0x268   : > { %2416 = vbcast.lane.b32.xlu0 %v2414_v62, 256 }
 0x269   : > { %3410 = vmatmul.mubr.msk.bf16.gmra.mrb[20].mxu1 %vm1479_vm4, %v1435_v44  ;;  %v1438_v2 = vpack.c.bf16 %v3123_v34, %v3122_v18  ;;  %2386 = vbcast.lane.b32.xlu1 %v5099_v55, 272  ;;  %v2451_v44 = vsub.s32 6, %v5073_v3 }
 0x26a   : > { %3413 = vmatprep.mubr.msk.bf16.mxu1 %vm1479_vm4, %v1436_v39 }
 0x26b   : > { %v2452_v29 = vrot.slane %v5070_v37, %v2451_v44 }
 0x26c   : > { %2348 = vbcast.lane.b32.xlu0 %v5145_v57, 272 }
 0x26d   : > { %2420 = vbcast.lane.b32.xlu1 %v2414_v62, 264 }
 0x270   : > { %2405 = vbcast.lane.b32.xlu0 %v2395_v21, 272 }
 0x271   : > { %3414 = vmatmul.mubr.msk.bf16.gmra.mrb[24].mxu1 %vm1479_vm4, %v1437_v31  ;;  %2371 = vbcast.lane.b32.xlu1 %v5082_v36, 280  ;;  %v2471_v36 = vrot.slane %v5070_v37, %v2470_v19  ;;  %v5301_v19 = vld [vmem:[%s4476_s27 + $0x40] sm:$0xff]  }
 0x272   : > { %3417 = vmatprep.mubr.msk.bf16.mxu1 %vm1479_vm4, %v1438_v2  ;;  %6382 = vst [vmem:[#allocation28_spill] sm:$0xff] %v5301_v19 }
 0x274   : > { %2439 = vbcast.lane.b32.xlu0 %v2433_v10, 264 }
 0x275   : > { %2435 = vbcast.lane.b32.xlu1 %v2433_v10, 256 }
 0x278   : > { %2424 = vbcast.lane.b32.xlu0 %v2414_v62, 272 }
 0x279   : > { %3418 = vmatmul.mubr.msk.bf16.gmra.mrb[28].mxu1 %vm1479_vm4, %v1439_v24  ;;  %2390 = vbcast.lane.b32.xlu1 %v5099_v55, 280  ;;  %v5230_v55 = vld [vmem:[%s6378_s18] ss:$0 sm:$0xff] }
 0x27c   : > { %2458 = vbcast.lane.b32.xlu0 %v2452_v29, 264 }
 0x27d   : > { %2454 = vbcast.lane.b32.xlu1 %v2452_v29, 256 }
 0x280   : > { %2409 = vbcast.lane.b32.xlu0 %v2395_v21, 280 }
 0x281   : > { %2352 = vbcast.lane.b32.xlu1 %v5145_v57, 280 }
 0x284   : > { %2473 = vbcast.lane.b32.xlu0 %v2471_v36, 256 }
 0x285   : > { %2443 = vbcast.lane.b32.xlu1 %v2433_v10, 272 }
 0x288   : > { %2428 = vbcast.lane.b32.xlu0 %v2414_v62, 280 }
 0x289   : > { %2477 = vbcast.lane.b32.xlu1 %v2471_v36, 264 }
 0x28c   : > { %2447 = vbcast.lane.b32.xlu0 %v2433_v10, 280 }
 0x28d   : > { %2462 = vbcast.lane.b32.xlu1 %v2452_v29, 272 }
 0x290   : > { %2466 = vbcast.lane.b32.xlu0 %v2452_v29, 280 }
 0x291   : > { %2481 = vbcast.lane.b32.xlu1 %v2471_v36, 272 }
 0x295   : > { %2485 = vbcast.lane.b32.xlu1 %v2471_v36, 280 }
 0x2bf   : > { %v5268_v50 = vpop.permute.xlu1 %2363 }
 0x2d7   : > { %v2522_v3 = vpop.xlane.xlu0 %2521 }
 0x2d8   : > { %v2523_v20 = vmax.f32 %v2522_v3, 1.0  ;;  %v5304_v3 = vpop.permute.xlu1 %2378 }
 0x2da   : > { %3733 = vrcp.f32 %v2523_v20 }
 0x2e4   : > { %v5286_v38 = vpop.eup %3733 }
 0x2e5   : > { %6380 = vst [vmem:[#allocation26_spill] sm:$0xff] %v5286_v38 }
 0x314   : > { %v3391_v37 = vpop.f32.mrb[0].mxu1 }
 0x315   : > { %v5233_v57 = vadd.f32 %v3391_v37, %v5230_v55  ;;  %v1562_v27 = vpop.f32.mrb[1].mxu1 }
 0x316   : > { %v5236_v32 = vadd.f32 %v5230_v55, %v1562_v27  ;;  %v3392_v46 = vpop.f32.mrb[2].mxu1 }
 0x317   : > { %v1723_v0 = vand.u32 2147483647, %v5233_v57  ;;  %v5240_v63 = vadd.f32 %v3392_v46, %v5230_v55  ;;  %v1565_v51 = vpop.f32.mrb[3].mxu1 }
 0x318   : > { %v1721_v33 = vand.u32 2147483647, %v5236_v32  ;;  %v5244_v8 = vadd.f32 %v5230_v55, %v1565_v51 }
 0x319   : > { %v1755_v54 = vsub.f32 0.0, %v1723_v0  ;;  %v1724_v23 = vand.u32 2147483647, %v5240_v63 }
 0x31a   : > { %v1753_v31 = vsub.f32 0.0, %v1721_v33  ;;  %v1722_v6 = vand.u32 2147483647, %v5244_v8 }
 0x31b   : > { %v1789_v16 = vmul.f32 1.442695, %v1755_v54  ;;  %v1756_v35 = vsub.f32 0.0, %v1724_v23 }
 0x31c   : > { %v1785_v5 = vmul.f32 1.442695, %v1753_v31  ;;  %v1754_v26 = vsub.f32 0.0, %v1722_v6  ;;  %v3395_v47 = vpop.f32.mrb[4].mxu1 }
 0x31d   : > { %3735 = vpow2.f32 %v1789_v16  ;;  %v1791_v58 = vmul.f32 1.442695, %v1756_v35  ;;  %v5256_v60 = vadd.f32 %v3395_v47, %v5230_v55  ;;  %v1578_v25 = vpop.f32.mrb[5].mxu1 }
 0x31e   : > { %3737 = vpow2.f32 %v1785_v5  ;;  %v1787_v52 = vmul.f32 1.442695, %v1754_v26  ;;  %v5260_v14 = vadd.f32 %v5230_v55, %v1578_v25  ;;  %v3396_v12 = vpop.f32.mrb[6].mxu1 }
 0x31f   : > { %3739 = vpow2.f32 %v1791_v58  ;;  %v1727_v43 = vand.u32 2147483647, %v5256_v60  ;;  %v5272_v39 = vadd.f32 %v3396_v12, %v5230_v55  ;;  %v1581_v61 = vpop.f32.mrb[7].mxu1 }
 0x320   : > { %3741 = vpow2.f32 %v1787_v52  ;;  %v1725_v15 = vand.u32 2147483647, %v5260_v14  ;;  %v5280_v22 = vadd.f32 %v5230_v55, %v1581_v61 }
 0x321   : > { %v1759_v13 = vsub.f32 0.0, %v1727_v43  ;;  %v1728_v21 = vand.u32 2147483647, %v5272_v39 }
 0x322   : > { %v1757_v42 = vsub.f32 0.0, %v1725_v15  ;;  %v1726_v48 = vand.u32 2147483647, %v5280_v22 }
 0x323   : > { %v1797_v62 = vmul.f32 1.442695, %v1759_v13  ;;  %v1760_v18 = vsub.f32 0.0, %v1728_v21 }
 0x324   : > { %v1793_v1 = vmul.f32 1.442695, %v1757_v42  ;;  %v1758_v10 = vsub.f32 0.0, %v1726_v48  ;;  %v3399_v44 = vpop.f32.mrb[8].mxu1  ;;  %v5331_v48 = vld [vmem:[%s4476_s27 + $0x50] sm:$0xff]  }
 0x325   : > { %3743 = vpow2.f32 %v1797_v62  ;;  %v1799_v20 = vmul.f32 1.442695, %v1760_v18  ;;  %v5307_v37 = vadd.f32 %v3399_v44, %v5230_v55  ;;  %v1594_v27 = vpop.f32.mrb[9].mxu1  ;;  %6383 = vst [vmem:[#allocation29_spill] sm:$0xff] %v5331_v48  ;;  %v5333_v62 = vpop.permute.xlu1 %2382 }
 0x326   : > { %3745 = vpow2.f32 %v1793_v1  ;;  %v1795_v0 = vmul.f32 1.442695, %v1758_v10  ;;  %v3400_v51 = vpop.f32.mrb[10].mxu1  ;;  %6384 = vst [vmem:[#allocation30_spill] sm:$0xff] %v5333_v62  ;;  %v5349_v36 = vadd.f32 %v5230_v55, %v1594_v27 }
 0x327   : > { %v3736_v23 = vpop.eup %3735  ;;  %3747 = vpow2.f32 %v1799_v20  ;;  %v1731_v31 = vand.u32 2147483647, %v5307_v37  ;;  %v5313_v6 = vpop.f32.mrb[11].mxu1  ;;  %v5356_v54 = vadd.f32 %v3400_v51, %v5230_v55 }
 0x328   : > { %v5317_v5 = vpop.eup %3737  ;;  %v1867_v26 = vadd.f32 1.0, %v3736_v23  ;;  %v1870_v47 = vmul.f32 -0.5, %v3736_v23  ;;  %3749 = vpow2.f32 %v1795_v0 }
 0x329   : > { %v5320_v25 = vpop.eup %3739  ;;  %v1849_v43 = vadd.f32 1.0, %v5317_v5  ;;  %v1763_v42 = vsub.f32 0.0, %v1731_v31  ;;  %v1852_v18 = vmul.f32 -0.5, %v5317_v5  ;;  %v1855_v20 = vand.u32 2147483647, %v5317_v5  ;;  %v5371_v51 = vpop.permute.xlu1 %2340 }
 0x32a   : > { %v5326_v15 = vpop.eup %3741  ;;  %3751 = vlog2.f32 %v1867_v26  ;;  %v1876_v13 = vadd.f32 1.0, %v5320_v25  ;;  %v1871_v44 = vadd.f32 1.0, %v1870_v47  ;;  %v1873_v31 = vand.u32 2147483647, %v3736_v23 }
 0x32b   : > { %3753 = vlog2.f32 %v1849_v43  ;;  %v1858_v0 = vadd.f32 1.0, %v5326_v15  ;;  %v1879_v46 = vmul.f32 -0.5, %v5320_v25  ;;  %v1805_v47 = vmul.f32 1.442695, %v1763_v42 }
 0x32c   : > { %v5341_v58 = vpop.f32.mrb[12].mxu1  ;;  %3755 = vlog2.f32 %v1876_v13  ;;  %v1853_v2 = vadd.f32 1.0, %v1852_v18  ;;  %v1861_v34 = vmul.f32 -0.5, %v5326_v15  ;;  %v5360_v9 = vmul.f32 %v3736_v23, %v1871_v44  ;;  %v5429_v18 = vld [vmem:[#allocation8] sm:$0xff] }
 0x32d   : > { %v5344_v43 = vpop.f32.mrb[13].mxu1  ;;  %3757 = vlog2.f32 %v1858_v0  ;;  %vm5362_vm2 = vcmp.lt.f32.partialorder %v1855_v20, 0.0004427343  ;;  %vm5366_vm3 = vcmp.lt.f32.partialorder %v1873_v31, 0.0004427343  ;;  %v1880_v44 = vadd.f32 1.0, %v1879_v46 }
 0x32e   : > { %v5351_v33 = vpop.f32.mrb[14].mxu1  ;;  %3759 = vpow2.f32 %v1805_v47  ;;  %v1882_v30 = vand.u32 2147483647, %v5320_v25  ;;  %v1864_v20 = vand.u32 2147483647, %v5326_v15  ;;  %v1862_v47 = vadd.f32 1.0, %v1861_v34 }
 0x32f   : > { %v3744_v29 = vpop.eup %3743  ;;  %v5358_v49 = vpop.f32.mrb[15].mxu1  ;;  %v1729_v31 = vand.u32 2147483647, %v5349_v36  ;;  %v1854_v46 = vmul.f32 %v5317_v5, %v1853_v2  ;;  %v5392_v19 = vmul.f32 %v5320_v25, %v1880_v44 }
 0x330   : > { %v3746_v16 = vpop.eup %3745  ;;  %v1903_v27 = vadd.f32 1.0, %v3744_v29  ;;  %v1906_v24 = vmul.f32 -0.5, %v3744_v29  ;;  %v1909_v26 = vand.u32 2147483647, %v3744_v29  ;;  %vm5381_vm5 = vcmp.lt.f32.partialorder %v1882_v30, 0.0004427343 }
 0x331   : > { %v3748_v0 = vpop.eup %3747  ;;  %v1885_v11 = vadd.f32 1.0, %v3746_v16  ;;  %v1888_v13 = vmul.f32 -0.5, %v3746_v16  ;;  %v1891_v35 = vand.u32 2147483647, %v3746_v16  ;;  %vm5387_vm6 = vcmp.lt.f32.partialorder %v1864_v20, 0.0004427343 }
 0x332   : > { %v5373_v23 = vpop.eup %3749  ;;  %3761 = vlog2.f32 %v1903_v27  ;;  %v1912_v59 = vadd.f32 1.0, %v3748_v0  ;;  %v1915_v61 = vmul.f32 -0.5, %v3748_v0  ;;  %v1907_v34 = vadd.f32 1.0, %v1906_v24  ;;  %v5399_v24 = vpop.permute.xlu1 %2344 }
 0x333   : > { %3763 = vlog2.f32 %v1885_v11  ;;  %v1894_v40 = vadd.f32 1.0, %v5373_v23  ;;  %v1889_v27 = vadd.f32 1.0, %v1888_v13  ;;  %v1863_v30 = vmul.f32 %v5326_v15, %v1862_v47 }
 0x334   : > { %v3752_v10 = vpop.eup %3751  ;;  %3765 = vlog2.f32 %v1912_v59  ;;  %v5378_v1 = vpop.f32.mrb[16].mxu1  ;;  %vm5395_vm7 = vcmp.lt.f32.partialorder %v1909_v26, 0.0004427343  ;;  %v1918_v5 = vand.u32 2147483647, %v3748_v0  ;;  %v1916_v25 = vadd.f32 1.0, %v1915_v61 }
 0x335   : > { %v3754_v53 = vpop.eup %3753  ;;  %v5385_v11 = vpop.f32.mrb[17].mxu1  ;;  %v1869_v21 = vmul.f32 0.6931472, %v3752_v10  ;;  %3767 = vlog2.f32 %v1894_v40  ;;  %vm5405_vm8 = vcmp.lt.f32.partialorder %v1891_v35, 0.0004427343  ;;  %v1897_v15 = vmul.f32 -0.5, %v5373_v23 }
 0x336   : > { %v1851_v12 = vmul.f32 0.6931472, %v3754_v53  ;;  %v3756_v48 = vpop.eup %3755  ;;  %v5401_v10 = vpop.f32.mrb[18].mxu1  ;;  %v1761_v26 = vsub.f32 0.0, %v1729_v31  ;;  %v6397_v20 = vmax.f32 %v5236_v32, 0.0  ;;  %v1908_v38 = vmul.f32 %v3744_v29, %v1907_v34 }
 0x337   : > { %v3758_v53 = vpop.eup %3757  ;;  %v5410_v44 = vpop.f32.mrb[19].mxu1  ;;  %v1890_v28 = vmul.f32 %v3746_v16, %v1889_v27  ;;  %v1875_v35 = vsel %vm5366_vm3, %v5360_v9, %v1869_v21  ;;  %v1900_v61 = vand.u32 2147483647, %v5373_v23  ;;  %vm5422_vm9 = vcmp.lt.f32.partialorder %v1918_v5, 0.0004427343 }
 0x338   : > { %v1857_v13 = vsel %vm5362_vm2, %v1854_v46, %v1851_v12  ;;  %v1860_v56 = vmul.f32 0.6931472, %v3758_v53  ;;  %v5414_v62 = vpop.eup %3759  ;;  %v1878_v12 = vmul.f32 0.6931472, %v3756_v48  ;;  %v1801_v42 = vmul.f32 1.442695, %v1761_v26  ;;  %v5437_v26 = vpop.permute.xlu1 %2367 }
 0x339   : > { %v2137_v47 = vadd.f32 %v1857_v13, %v6397_v20  ;;  %v1939_v29 = vadd.f32 1.0, %v5414_v62  ;;  %v6400_v34 = vmax.f32 %v5244_v8, 0.0  ;;  %v1917_v9 = vmul.f32 %v3748_v0, %v1916_v25 }
 0x33a   : > { %v1866_v31 = vsel %vm5387_vm6, %v1863_v30, %v1860_v56  ;;  %v1898_v21 = vadd.f32 1.0, %v1897_v15  ;;  %3769 = vpow2.f32 %v1801_v42  ;;  %v6401_v56 = vmax.f32 %v5233_v57, 0.0  ;;  %v5451_v42 = vld [vmem:[#allocation8 + $0x8] sm:$0xff] }
 0x33b   : > { %v3147_v46 = vadd.f32 -0.6931472, %v2137_v47  ;;  %v2138_v27 = vadd.f32 %v1866_v31, %v6400_v34  ;;  %v6402_v30 = vunpack.c.l.bf16 %v5249_v4  ;;  %3771 = vlog2.f32 %v1939_v29 }
 0x33c   : > { %v3762_v16 = vpop.eup %3761  ;;  %v5431_v48 = vpop.f32.mrb[20].mxu1  ;;  %v2139_v59 = vadd.f32 %v1875_v35, %v6401_v56  ;;  %v1884_v0 = vsel %vm5381_vm5, %v5392_v19, %v1878_v12  ;;  %vm5444_vm10 = vcmp.lt.f32.partialorder %v1900_v61, 0.0004427343  ;;  %v1942_v31 = vmul.f32 -0.5, %v5414_v62 }
 0x33d   : > { %v3764_v53 = vpop.eup %3763  ;;  %v2265_v5 = vmul.f32 %v6402_v30, %v3147_v46  ;;  %v1905_v13 = vmul.f32 0.6931472, %v3762_v16  ;;  %v5439_v8 = vpop.f32.mrb[21].mxu1  ;;  %v3148_v25 = vadd.f32 -0.6931472, %v2138_v27  ;;  %v6405_v19 = vmax.f32 %v5256_v60, 0.0 }
 0x33e   : > { %v3766_v20 = vpop.eup %3765  ;;  %v1887_v15 = vmul.f32 0.6931472, %v3764_v53  ;;  %v5454_v29 = vpop.f32.mrb[22].mxu1  ;;  %v6406_v61 = vunpack.c.h.bf16 %v5249_v4  ;;  %v1899_v34 = vmul.f32 %v5373_v23, %v1898_v21  ;;  %v1732_v27 = vand.u32 2147483647, %v5356_v54 }
 0x33f   : > { %v2303_v57 = vmul.f32 %v5429_v18, %v2265_v5  ;;  %v1911_v35 = vsel %vm5395_vm7, %v1908_v38, %v1905_v13  ;;  %v1914_v46 = vmul.f32 0.6931472, %v3766_v20  ;;  %v3768_v52 = vpop.eup %3767  ;;  %v5462_v2 = vpop.f32.mrb[23].mxu1  ;;  %v5469_v30 = vadd.f32 %v5230_v55, %v5313_v6 }
 0x340   : > { %v2143_v12 = vadd.f32 %v1911_v35, %v6405_v19  ;;  %v2266_v16 = vmul.f32 %v6406_v61, %v3148_v25  ;;  %v1893_v53 = vsel %vm5405_vm8, %v1890_v28, %v1887_v15  ;;  %v1896_v56 = vmul.f32 0.6931472, %v3768_v52  ;;  %v5478_v40 = vpop.permute.xlu1 %2397 }
 0x341   : > { %v2487_v38 = vmul.f32 %v5371_v51, %v2303_v57  ;;  %v1920_v23 = vsel %vm5422_vm9, %v1917_v9, %v1914_v46  ;;  %v1764_v21 = vsub.f32 0.0, %v1732_v27  ;;  %v5474_v5 = vadd.f32 -0.6931472, %v2139_v59 }
 0x342   : > { %v3153_v60 = vadd.f32 -0.6931472, %v2143_v12  ;;  %v2304_v4 = vmul.f32 %v5451_v42, %v2266_v16  ;;  %v1902_v51 = vsel %vm5444_vm10, %v1899_v34, %v1896_v56  ;;  %v1943_v13 = vadd.f32 1.0, %v1942_v31 }
 0x343   : > { %v1697_v28 = vmax.f32 %v5349_v36, 0.0  ;;  %v6407_v6 = vmax.f32 %v5240_v63, 0.0  ;;  %v6408_v32 = vmax.f32 %v5280_v22, 0.0  ;;  %v1945_v59 = vand.u32 2147483647, %v5414_v62 }
 0x344   : > { %v2488_v25 = vmul.f32 %v5399_v24, %v2304_v4  ;;  %v5489_v15 = vpop.f32.mrb[24].mxu1  ;;  %v6409_v47 = vmax.f32 %v5260_v14, 0.0  ;;  %v6410_v35 = vmax.f32 %v5272_v39, 0.0  ;;  %v1807_v31 = vmul.f32 1.442695, %v1764_v21  ;;  %v5498_v52 = vpop.eup %3769 }
 0x345   : > { %v5483_v20 = vadd.f32 %v1884_v0, %v6407_v6  ;;  %v2142_v9 = vadd.f32 %v1902_v51, %v6408_v32  ;;  %v1730_v63 = vand.u32 2147483647, %v5469_v30  ;;  %v5496_v0 = vpop.f32.mrb[25].mxu1  ;;  %v2525_v22 = vsel %vm1479_vm4, %v2487_v38, 0.0  ;;  %v3772_v61 = vpop.eup %3771 }
 0x346   : > { %v2141_v57 = vadd.f32 %v1893_v53, %v6409_v47  ;;  %v2144_v46 = vadd.f32 %v1920_v23, %v6410_v35  ;;  %v2526_v24 = vsel %vm1479_vm4, %v2488_v25, 0.0  ;;  %v6411_v19 = vunpack.c.l.bf16 %v5252_v41  ;;  %v5508_v39 = vpop.f32.mrb[26].mxu1  ;;  %v5524_v23 = vld [vmem:[#allocation8 + $0x10] sm:$0xff]  ;;  %v5526_v21 = vpop.permute.xlu1 %2386 }
 0x347   : > { %v5506_v14 = vadd.f32 %v5341_v58, %v5230_v55  ;;  %v5510_v16 = vadd.f32 %v2526_v24, %v2525_v22  ;;  %v1944_v34 = vmul.f32 %v5414_v62, %v1943_v13  ;;  %v1921_v27 = vadd.f32 1.0, %v5498_v52  ;;  %v5518_v53 = vpop.f32.mrb[27].mxu1 }
 0x348   : > { %v2271_v12 = vmul.f32 %v6411_v19, %v3153_v60  ;;  %v5516_v38 = vadd.f32 %v5230_v55, %v5344_v43  ;;  %v3152_v56 = vadd.f32 -0.6931472, %v2142_v9  ;;  %v1941_v60 = vmul.f32 0.6931472, %v3772_v61 }
 0x349   : > { %3773 = vpow2.f32 %v1807_v31  ;;  %v5522_v58 = vadd.f32 %v5351_v33, %v5230_v55  ;;  %v3154_v4 = vadd.f32 -0.6931472, %v2144_v46  ;;  %vm1946_vm11 = vcmp.lt.f32.partialorder %v1945_v59, 0.0004427343 }
 0x34a   : > { %3775 = vlog2.f32 %v1921_v27  ;;  %v1762_v62 = vsub.f32 0.0, %v1730_v63  ;;  %v3151_v51 = vadd.f32 -0.6931472, %v2141_v57  ;;  %v2309_v43 = vmul.f32 %v5524_v23, %v2271_v12 }
 0x34b   : > { %v1947_v13 = vsel %vm1946_vm11, %v1944_v34, %v1941_v60  ;;  %v1735_v6 = vand.u32 2147483647, %v5506_v14  ;;  %v6412_v25 = vmax.f32 %v5307_v37, 0.0  ;;  %v1924_v33 = vmul.f32 -0.5, %v5498_v52 }
 0x34c   : > { %v1927_v9 = vand.u32 2147483647, %v5498_v52  ;;  %v1803_v47 = vmul.f32 1.442695, %v1762_v62  ;;  %v6413_v59 = vunpack.c.h.bf16 %v5263_v17  ;;  %v1733_v31 = vand.u32 2147483647, %v5516_v38 }
 0x34d   : > { %v2147_v32 = vadd.f32 %v1947_v13, %v6412_v25  ;;  %v1767_v46 = vsub.f32 0.0, %v1735_v6  ;;  %v1736_v57 = vand.u32 2147483647, %v5522_v58  ;;  %v5540_v22 = vadd.f32 %v5230_v55, %v5358_v49  ;;  %v5544_v19 = vpop.f32.mrb[28].mxu1  ;;  %v5553_v25 = vpop.permute.xlu1 %2420 }
 0x34e   : > { %v2270_v35 = vmul.f32 %v6413_v59, %v3152_v56  ;;  %3777 = vpow2.f32 %v1803_v47  ;;  %v6414_v37 = vunpack.c.h.bf16 %v5252_v41  ;;  %v1765_v61 = vsub.f32 0.0, %v1733_v31  ;;  %v5548_v60 = vpop.f32.mrb[29].mxu1 }
 0x34f   : > { %v3157_v63 = vadd.f32 -0.6931472, %v2147_v32  ;;  %v1813_v12 = vmul.f32 1.442695, %v1767_v46  ;;  %v1768_v34 = vsub.f32 0.0, %v1736_v57  ;;  %v6415_v27 = vunpack.c.l.bf16 %v5263_v17  ;;  %v5566_v46 = vld [vmem:[#allocation8 + $0x18] sm:$0xff] }
 0x350   : > { %v2272_v24 = vmul.f32 %v6414_v37, %v3154_v4  ;;  %v2493_v62 = vmul.f32 %v5437_v26, %v2309_v43  ;;  %v1925_v13 = vadd.f32 1.0, %v1924_v33  ;;  %v6416_v6 = vunpack.c.l.bf16 %v5276_v7  ;;  %v5556_v4 = vpop.f32.mrb[30].mxu1 }
 0x351   : > { %v2269_v56 = vmul.f32 %v6415_v27, %v3151_v51  ;;  %v1734_v41 = vand.u32 2147483647, %v5540_v22  ;;  %6417 = vst [vmem:[#allocation31_spill] sm:$0xff] %v5556_v4  ;;  %3779 = vpow2.f32 %v1813_v12  ;;  %v1809_v32 = vmul.f32 1.442695, %v1765_v61  ;;  %v5559_v51 = vpop.f32.mrb[31].mxu1 }
 0x352   : > { %v2275_v49 = vmul.f32 %v6416_v6, %v3157_v63  ;;  %v1815_v47 = vmul.f32 1.442695, %v1768_v34  ;;  %6418 = vst [vmem:[#allocation32_spill] sm:$0xff] %v5559_v51  ;;  %v5562_v59 = vadd.f32 -0.6931472, %v5483_v20  ;;  %v2310_v63 = vmul.f32 %v5566_v46, %v2272_v24  ;;  %v2372_v24 = vpop.permute.xlu1 %2371 }
 0x353   : > { %v2307_v17 = vmul.f32 %v5429_v18, %v2269_v56  ;;  %v1766_v33 = vsub.f32 0.0, %v1734_v41  ;;  %v3774_v31 = vpop.eup %3773  ;;  %vm5568_vm12 = vcmp.lt.f32.partialorder %v1927_v9, 0.0004427343  ;;  %3781 = vpow2.f32 %v1809_v32  ;;  %v2360_v56 = vpop.permute.xlu0 %2359 }
 0x354   : > { %v2308_v37 = vmul.f32 %v5451_v42, %v2270_v35  ;;  %v3776_v12 = vpop.eup %3775  ;;  %v2541_v20 = vsel %vm1479_vm4, %v2493_v62, 0.0  ;;  %v1926_v61 = vmul.f32 %v5498_v52, %v1925_v13  ;;  %v1948_v34 = vadd.f32 1.0, %v3774_v31 }
 0x355   : > { %v2313_v27 = vmul.f32 %v5524_v23, %v2275_v49  ;;  %v1923_v6 = vmul.f32 0.6931472, %v3776_v12  ;;  %3783 = vpow2.f32 %v1815_v47  ;;  %v1811_v9 = vmul.f32 1.442695, %v1766_v33 }
 0x356   : > { %v2491_v41 = vmul.f32 %v2360_v56, %v2307_v17  ;;  %3785 = vlog2.f32 %v1948_v34  ;;  %v1951_v43 = vmul.f32 -0.5, %v3774_v31  ;;  %v5580_v35 = vadd.f32 %v5378_v1, %v5230_v55 }
 0x357   : > { %v1929_v52 = vsel %vm5568_vm12, %v1926_v61, %v1923_v6  ;;  %3787 = vpow2.f32 %v1811_v9  ;;  %v2494_v62 = vmul.f32 %v2372_v24, %v2310_v63  ;;  %v2492_v13 = vmul.f32 %v5268_v50, %v2308_v37 }
 0x358   : > { %v3778_v49 = vpop.eup %3777  ;;  %v2145_v47 = vadd.f32 %v1929_v52, %v1697_v28  ;;  %v1954_v17 = vand.u32 2147483647, %v3774_v31  ;;  %v5590_v12 = vadd.f32 %v5230_v55, %v5385_v11  ;;  %v2497_v34 = vmul.f32 %v5526_v21, %v2313_v27 }
 0x359   : > { %v1930_v1 = vadd.f32 1.0, %v3778_v49  ;;  %v2538_v57 = vsel %vm1479_vm4, %v2491_v41, 0.0  ;;  %v2539_v63 = vsel %vm1479_vm4, %v2492_v13, 0.0  ;;  %v1952_v50 = vadd.f32 1.0, %v1951_v43 }
 0x35a   : > { %v3155_v61 = vadd.f32 -0.6931472, %v2145_v47  ;;  %v2540_v37 = vadd.f32 %v2539_v63, %v2538_v57  ;;  %v1739_v36 = vand.u32 2147483647, %v5580_v35  ;;  %v2543_v11 = vsel %vm1479_vm4, %v2494_v62, 0.0 }
 0x35b   : > { %v3780_v28 = vpop.eup %3779  ;;  %3789 = vlog2.f32 %v1930_v1  ;;  %v6421_v9 = vunpack.c.l.bf16 %v5266_v45  ;;  %v1933_v27 = vmul.f32 -0.5, %v3778_v49  ;;  %vm5601_vm13 = vcmp.lt.f32.partialorder %v1954_v17, 0.0004427343 }
 0x35c   : > { %v1975_v41 = vadd.f32 1.0, %v3780_v28  ;;  %v1978_v24 = vmul.f32 -0.5, %v3780_v28  ;;  %v5606_v13 = vsel %vm1479_vm4, %v2497_v34, 0.0  ;;  %v2542_v47 = vadd.f32 %v2541_v20, %v2540_v37 }
 0x35d   : > { %v2273_v21 = vmul.f32 %v6421_v9, %v3155_v61  ;;  %v3782_v52 = vpop.eup %3781  ;;  %v1737_v1 = vand.u32 2147483647, %v5590_v12  ;;  %v1953_v57 = vmul.f32 %v3774_v31, %v1952_v50  ;;  %v1771_v63 = vsub.f32 0.0, %v1739_v36 }
 0x35e   : > { %3791 = vlog2.f32 %v1975_v41  ;;  %v1936_v9 = vand.u32 2147483647, %v3778_v49  ;;  %v1957_v56 = vadd.f32 1.0, %v3782_v52  ;;  %v2544_v6 = vadd.f32 %v2543_v11, %v2542_v47 }
 0x35f   : > { %v3784_v61 = vpop.eup %3783  ;;  %v2311_v33 = vmul.f32 %v5429_v18, %v2273_v21  ;;  %v1934_v26 = vadd.f32 1.0, %v1933_v27  ;;  %v1979_v34 = vadd.f32 1.0, %v1978_v24  ;;  %v1960_v31 = vmul.f32 -0.5, %v3782_v52 }
 0x360   : > { %v3786_v32 = vpop.eup %3785  ;;  %v1984_v51 = vadd.f32 1.0, %v3784_v61  ;;  %3793 = vlog2.f32 %v1957_v56  ;;  %v1769_v50 = vsub.f32 0.0, %v1737_v1  ;;  %v1981_v41 = vand.u32 2147483647, %v3780_v28 }
 0x361   : > { %v3788_v20 = vpop.eup %3787  ;;  %v1950_v37 = vmul.f32 0.6931472, %v3786_v32  ;;  %v1963_v62 = vand.u32 2147483647, %v3782_v52  ;;  %v1821_v36 = vmul.f32 1.442695, %v1771_v63  ;;  %v1935_v32 = vmul.f32 %v3778_v49, %v1934_v26 }
 0x362   : > { %3795 = vlog2.f32 %v1984_v51  ;;  %vm5614_vm14 = vcmp.lt.f32.partialorder %v1936_v9, 0.0004427343  ;;  %v1987_v21 = vmul.f32 -0.5, %v3784_v61  ;;  %v1966_v27 = vadd.f32 1.0, %v3788_v20 }
 0x363   : > { %v1956_v11 = vsel %vm5601_vm13, %v1953_v57, %v1950_v37  ;;  %v6426_v24 = vmax.f32 %v5356_v54, 0.0  ;;  %v2495_v56 = vmul.f32 %v5304_v3, %v2311_v33  ;;  %v5621_v1 = vmul.f32 %v3780_v28, %v1979_v34 }
 0x364   : > { %v1961_v51 = vadd.f32 1.0, %v1960_v31  ;;  %3797 = vlog2.f32 %v1966_v27  ;;  %v2545_v63 = vrot.slane %v2544_v6, 4  ;;  %v1817_v43 = vmul.f32 1.442695, %v1769_v50 }
 0x365   : > { %v2148_v17 = vadd.f32 %v1956_v11, %v6426_v24  ;;  %v3790_v4 = vpop.eup %3789  ;;  %vm5623_vm15 = vcmp.lt.f32.partialorder %v1981_v41, 0.0004427343  ;;  %vm5627_vm0 = vcmp.lt.f32.partialorder %v1963_v62, 0.0004427343  ;;  %v1969_v54 = vmul.f32 -0.5, %v3788_v20 }
 0x366   : > { %v1932_v57 = vmul.f32 0.6931472, %v3790_v4  ;;  %3799 = vpow2.f32 %v1821_v36  ;;  %v1988_v3 = vadd.f32 1.0, %v1987_v21  ;;  %v2546_v49 = vadd.f32 %v2545_v63, %v2544_v6 }
 0x367   : > { %v3158_v26 = vadd.f32 -0.6931472, %v2148_v17  ;;  %v5633_v33 = vadd.f32 %v5401_v10, %v5230_v55  ;;  %v1990_v34 = vand.u32 2147483647, %v3784_v61  ;;  %3801 = vpow2.f32 %v1817_v43 }
 0x368   : > { %v3792_v28 = vpop.eup %3791  ;;  %v1938_v4 = vsel %vm5614_vm14, %v1935_v32, %v1932_v57  ;;  %v5639_v62 = vadd.f32 %v5230_v55, %v5410_v44  ;;  %v6431_v31 = vmax.f32 %v5469_v30, 0.0  ;;  %v2551_v17 = vsel %vm1479_vm4, %v2495_v56, 0.0  ;;  %v6441_v56 = vld [vmem:[#allocation25_spill] sm:$0xff] }
 0x369   : > { %v1972_v6 = vand.u32 2147483647, %v3788_v20  ;;  %v2547_v41 = vrot.slane %v2546_v49, 2  ;;  %v1962_v36 = vmul.f32 %v3782_v52, %v1961_v51  ;;  %v1970_v10 = vadd.f32 1.0, %v1969_v54  ;;  %v5652_v52 = vpop.permute.xlu1 %2435 }
 0x36a   : > { %v2146_v50 = vadd.f32 %v1938_v4, %v6431_v31  ;;  %v1740_v11 = vand.u32 2147483647, %v5633_v33  ;;  %v1738_v47 = vand.u32 2147483647, %v5639_v62  ;;  %v3794_v21 = vpop.eup %3793  ;;  %v1977_v24 = vmul.f32 0.6931472, %v3792_v28 }
 0x36b   : > { %v2548_v32 = vadd.f32 %v2547_v41, %v2546_v49  ;;  %v6432_v44 = vunpack.c.h.bf16 %v5276_v7  ;;  %v1959_v30 = vmul.f32 0.6931472, %v3794_v21  ;;  %v1989_v57 = vmul.f32 %v3784_v61, %v1988_v3 }
 0x36c   : > { %v3156_v27 = vadd.f32 -0.6931472, %v2146_v50  ;;  %v3796_v43 = vpop.eup %3795  ;;  %vm5648_vm1 = vcmp.lt.f32.partialorder %v1990_v34, 0.0004427343  ;;  %v1772_v51 = vsub.f32 0.0, %v1740_v11  ;;  %v6435_v54 = vunpack.c.h.bf16 %v5266_v45 }
 0x36d   : > { %v2276_v63 = vmul.f32 %v6432_v44, %v3158_v26  ;;  %v1986_v31 = vmul.f32 0.6931472, %v3796_v43  ;;  %vm5656_vm2 = vcmp.lt.f32.partialorder %v1972_v6, 0.0004427343  ;;  %v2549_v7 = vrot.slane %v2548_v32, 1 }
 0x36e   : > { %v2274_v4 = vmul.f32 %v6435_v54, %v3156_v27  ;;  %v1965_v26 = vsel %vm5627_vm0, %v1962_v36, %v1959_v30  ;;  %v1971_v61 = vmul.f32 %v3788_v20, %v1970_v10  ;;  %v1823_v3 = vmul.f32 1.442695, %v1772_v51  ;;  %v3798_v34 = vpop.eup %3797  ;;  %v6439_v10 = vld [vmem:[#allocation30_spill] sm:$0xff] }
 0x36f   : > { %v1770_v49 = vsub.f32 0.0, %v1738_v47  ;;  %v1983_v45 = vsel %vm5623_vm15, %v5621_v1, %v1977_v24  ;;  %v6438_v41 = vmax.f32 %v5516_v38, 0.0  ;;  %v2314_v11 = vmul.f32 %v5566_v46, %v2276_v63 }
 0x370   : > { %v2312_v50 = vmul.f32 %v5451_v42, %v2274_v4  ;;  %v5669_v21 = vpop.eup %3799  ;;  %v1992_v37 = vsel %vm5648_vm1, %v1989_v57, %v1986_v31  ;;  %v1968_v20 = vmul.f32 0.6931472, %v3798_v34  ;;  %3803 = vpow2.f32 %v1823_v3  ;;  %v2391_v57 = vpop.permute.xlu1 %2390  ;;  %v6445_v3 = vld [vmem:[#allocation26_spill] sm:$0xff] }
 0x371   : > { %v2149_v6 = vadd.f32 %v1965_v26, %v6438_v41  ;;  %v5675_v36 = vadd.f32 %v5431_v48, %v5230_v55  ;;  %v2550_v1 = vadd.f32 %v2549_v7, %v2548_v32  ;;  %v2011_v38 = vadd.f32 1.0, %v5669_v21  ;;  %v5679_v27 = vpop.eup %3801 }
 0x372   : > { %v2496_v47 = vmul.f32 %v6439_v10, %v2312_v50  ;;  %v6440_v24 = vmax.f32 %v5506_v14, 0.0  ;;  %v1974_v63 = vsel %vm5656_vm2, %v1971_v61, %v1968_v20  ;;  %v1708_v43 = vmax.f32 %v5633_v33, 0.0 }
 0x373   : > { %v3159_v9 = vadd.f32 -0.6931472, %v2149_v6  ;;  %v1819_v30 = vmul.f32 1.442695, %v1770_v49  ;;  %v6442_v51 = vunpack.c.l.bf16 %v6441_v56  ;;  %v6443_v32 = vmax.f32 %v5540_v22, 0.0 }
 0x374   : > { %v2151_v44 = vadd.f32 %v1983_v45, %v6440_v24  ;;  %v2552_v48 = vsel %vm1479_vm4, %v2496_v47, 0.0  ;;  %v2498_v31 = vmul.f32 %v2391_v57, %v2314_v11  ;;  %v6444_v14 = vmax.f32 %v5522_v58, 0.0  ;;  %v2402_v45 = vpop.permute.xlu0 %2401 }
 0x375   : > { %v2277_v54 = vmul.f32 %v6442_v51, %v3159_v9  ;;  %v2150_v4 = vadd.f32 %v1974_v63, %v6443_v32  ;;  %v2553_v7 = vadd.f32 %v2552_v48, %v2551_v17  ;;  %3805 = vlog2.f32 %v2011_v38 }
 0x376   : > { %v2152_v26 = vadd.f32 %v1992_v37, %v6444_v14  ;;  %v1706_v28 = vmax.f32 %v5639_v62, 0.0  ;;  %v6446_v49 = vrot.slane %v6445_v3, 1  ;;  %v1993_v50 = vadd.f32 1.0, %v5679_v27  ;;  %v6448_v14 = vld [vmem:[#allocation27_spill] sm:$0xff] }
 0x377   : > { %v3160_v61 = vadd.f32 -0.6931472, %v2150_v4  ;;  %v1711_v41 = vmax.f32 %v5675_v36, 0.0  ;;  %v2555_v22 = vadd.f32 %v5606_v13, %v2553_v7  ;;  %v2014_v17 = vmul.f32 -0.5, %v5669_v21 }
 0x378   : > { %v5696_v34 = vmul.f32 %v6446_v49, %v2550_v1  ;;  %v2315_v58 = vmul.f32 %v5429_v18, %v2277_v54  ;;  %3807 = vpow2.f32 %v1819_v30  ;;  %v5703_v6 = vadd.f32 -0.6931472, %v2151_v44  ;;  %v5724_v32 = vpop.permute.xlu0 %2416 }
 0x379   : > { %3809 = vlog2.f32 %v1993_v50  ;;  %v6447_v11 = vunpack.c.h.bf16 %v6441_v56  ;;  %v2556_v20 = vsel %vm1479_vm4, %v2498_v31, 0.0  ;;  %v5708_v10 = vadd.f32 -0.6931472, %v2152_v26 }
 0x37a   : > { %v2557_v47 = vadd.f32 %v2556_v20, %v2555_v22  ;;  %v1743_v9 = vand.u32 2147483647, %v5675_v36  ;;  %v5713_v13 = vadd.f32 %v5230_v55, %v5439_v8  ;;  %v2017_v1 = vand.u32 2147483647, %v5669_v21  ;;  %v5719_v63 = vpop.eup %3803 }
 0x37b   : > { %v2278_v37 = vmul.f32 %v6447_v11, %v3160_v61  ;;  %v1996_v38 = vmul.f32 -0.5, %v5679_v27  ;;  %v2499_v44 = vmul.f32 %v5478_v40, %v2315_v58  ;;  %v2676_v30 = vrot.slane %v5696_v34, 7 }
 0x37c   : > { %v2015_v57 = vadd.f32 1.0, %v2014_v17  ;;  %v2558_v48 = vrot.slane %v2557_v47, 4  ;;  %v1775_v56 = vsub.f32 0.0, %v1743_v9  ;;  %v1999_v51 = vand.u32 2147483647, %v5679_v27 }
 0x37d   : > { %v2316_v24 = vmul.f32 %v5451_v42, %v2278_v37  ;;  %v2020_v8 = vadd.f32 1.0, %v5719_v63  ;;  %v5728_v4 = vadd.f32 %v5454_v29, %v5230_v55  ;;  %v1741_v7 = vand.u32 2147483647, %v5713_v13 }
 0x37e   : > { %v2559_v31 = vadd.f32 %v2558_v48, %v2557_v47  ;;  %v1829_v40 = vmul.f32 1.442695, %v1775_v56  ;;  %v6449_v26 = vunpack.c.l.bf16 %v6448_v14  ;;  %v1997_v49 = vadd.f32 1.0, %v1996_v38 }
 0x37f   : > { %v2500_v54 = vmul.f32 %v2402_v45, %v2316_v24  ;;  %3811 = vlog2.f32 %v2020_v8  ;;  %v2564_v50 = vsel %vm1479_vm4, %v2499_v44, 0.0  ;;  %v3806_v22 = vpop.eup %3805  ;;  %v1773_v55 = vsub.f32 0.0, %v1741_v7  ;;  %v5764_v7 = vpop.permute.xlu1 %2454 }
 0x380   : > { %v2267_v61 = vmul.f32 %v6449_v26, %v5474_v5  ;;  %v2560_v58 = vrot.slane %v2559_v31, 2  ;;  %3813 = vpow2.f32 %v1829_v40  ;;  %v2013_v29 = vmul.f32 0.6931472, %v3806_v22 }
 0x381   : > { %v2565_v45 = vsel %vm1479_vm4, %v2500_v54, 0.0  ;;  %v2016_v11 = vmul.f32 %v5669_v21, %v2015_v57  ;;  %vm5739_vm3 = vcmp.lt.f32.partialorder %v2017_v1, 0.0004427343  ;;  %v1744_v5 = vand.u32 2147483647, %v5728_v4  ;;  %v2349_v57 = vpop.permute.xlu0 %2348 }
 0x382   : > { %v5736_v17 = vadd.f32 %v2565_v45, %v2564_v50  ;;  %v3808_v20 = vpop.eup %3807  ;;  %v2023_v47 = vmul.f32 -0.5, %v5719_v63  ;;  %v2561_v9 = vadd.f32 %v2560_v58, %v2559_v31  ;;  %v1825_v38 = vmul.f32 1.442695, %v1773_v55  ;;  %v5755_v31 = vld [vmem:[%s6378_s18] ss:$0 sm:$0xff] }
 0x383   : > { %v2305_v24 = vmul.f32 %v5524_v23, %v2267_v61  ;;  %v3810_v44 = vpop.eup %3809  ;;  %v1998_v48 = vmul.f32 %v5679_v27, %v1997_v49  ;;  %vm5747_vm5 = vcmp.lt.f32.partialorder %v1999_v51, 0.0004427343  ;;  %v2002_v21 = vadd.f32 1.0, %v3808_v20 }
 0x384   : > { %v1709_v1 = vmax.f32 %v5713_v13, 0.0  ;;  %v1995_v8 = vmul.f32 0.6931472, %v3810_v44  ;;  %v2562_v54 = vrot.slane %v2561_v9, 1  ;;  %3815 = vpow2.f32 %v1825_v38 }
 0x385   : > { %v5759_v40 = vadd.f32 %v5755_v31, %v5462_v2  ;;  %v2019_v27 = vsel %vm5739_vm3, %v2016_v11, %v2013_v29  ;;  %v2026_v51 = vand.u32 2147483647, %v5719_v63  ;;  %3817 = vlog2.f32 %v2002_v21 }
 0x386   : > { %v1776_v26 = vsub.f32 0.0, %v1744_v5  ;;  %v2001_v61 = vsel %vm5747_vm5, %v1998_v48, %v1995_v8  ;;  %v2024_v49 = vadd.f32 1.0, %v2023_v47  ;;  %v1712_v50 = vmax.f32 %v5728_v4, 0.0  ;;  %v5900_v4 = vld [vmem:[%s4476_s27 + $0x60] sm:$0xff]  }
 0x387   : > { %v2489_v45 = vmul.f32 %v2349_v57, %v2305_v24  ;;  %v6454_v22 = vmax.f32 %v5590_v12, 0.0  ;;  %v2005_v58 = vmul.f32 -0.5, %v3808_v20  ;;  %v2563_v55 = vadd.f32 %v2562_v54, %v2561_v9 }
 0x388   : > { %v1831_v37 = vmul.f32 1.442695, %v1776_v26  ;;  %v6455_v29 = vmax.f32 %v5580_v35, 0.0  ;;  %v2008_v38 = vand.u32 2147483647, %v3808_v20  ;;  %v6456_v12 = vunpack.c.h.bf16 %v6448_v14  ;;  %v2353_v14 = vpop.permute.xlu1 %2352 }
 0x389   : > { %v2153_v2 = vadd.f32 %v2001_v61, %v6454_v22  ;;  %v2528_v44 = vsel %vm1479_vm4, %v2489_v45, 0.0  ;;  %v1742_v5 = vand.u32 2147483647, %v5759_v40  ;;  %v3812_v56 = vpop.eup %3811  ;;  %v2025_v57 = vmul.f32 %v5719_v63, %v2024_v49  ;;  %v6458_v61 = vld [vmem:[#allocation28_spill] sm:$0xff] }
 0x38a   : > { %v2155_v11 = vadd.f32 %v2019_v27, %v6455_v29  ;;  %3819 = vpow2.f32 %v1831_v37  ;;  %v2529_v47 = vadd.f32 %v2528_v44, %v5510_v16  ;;  %v2268_v24 = vmul.f32 %v6456_v12, %v5562_v59  ;;  %v3814_v21 = vpop.eup %3813 }
 0x38b   : > { %v3163_v48 = vadd.f32 -0.6931472, %v2153_v2  ;;  %v2022_v9 = vmul.f32 0.6931472, %v3812_v56  ;;  %v1774_v35 = vsub.f32 0.0, %v1742_v5  ;;  %v5782_v8 = vadd.f32 %v5755_v31, %v5489_v15 }
 0x38c   : > { %v2006_v54 = vadd.f32 1.0, %v2005_v58  ;;  %v6457_v27 = vrot.slane %v6445_v3, 2  ;;  %v6459_v16 = vunpack.c.l.bf16 %v6458_v61  ;;  %v2047_v22 = vadd.f32 1.0, %v3814_v21 }
 0x38d   : > { %vm5790_vm6 = vcmp.lt.f32.partialorder %v2026_v51, 0.0004427343  ;;  %vm5794_vm7 = vcmp.lt.f32.partialorder %v2008_v38, 0.0004427343  ;;  %v1827_v15 = vmul.f32 1.442695, %v1774_v35  ;;  %v2306_v49 = vmul.f32 %v5566_v46, %v2268_v24 }
 0x38e   : > { %v5786_v26 = vmul.f32 %v6457_v27, %v2563_v55  ;;  %v2281_v45 = vmul.f32 %v6459_v16, %v3163_v48  ;;  %v5799_v2 = vadd.f32 -0.6931472, %v2155_v11  ;;  %v2028_v58 = vsel %vm5790_vm6, %v2025_v57, %v2022_v9  ;;  %v3816_v37 = vpop.eup %3815 }
 0x38f   : > { %3821 = vlog2.f32 %v2047_v22  ;;  %v2050_v55 = vmul.f32 -0.5, %v3814_v21  ;;  %v2490_v29 = vmul.f32 %v2353_v14, %v2306_v49  ;;  %v1747_v38 = vand.u32 2147483647, %v5782_v8  ;;  %v3818_v44 = vpop.eup %3817 }
 0x390   : > { %v2319_v51 = vmul.f32 %v5429_v18, %v2281_v45  ;;  %3823 = vpow2.f32 %v1827_v15  ;;  %v2007_v5 = vmul.f32 %v3808_v20, %v2006_v54  ;;  %v2679_v56 = vrot.slane %v5786_v26, 6 }
 0x391   : > { %v2029_v48 = vadd.f32 1.0, %v3816_v37  ;;  %v1710_v11 = vmax.f32 %v5759_v40, 0.0  ;;  %v2004_v12 = vmul.f32 0.6931472, %v3818_v44  ;;  %v2053_v24 = vand.u32 2147483647, %v3814_v21 }
 0x392   : > { %v2032_v35 = vmul.f32 -0.5, %v3816_v37  ;;  %v2530_v9 = vsel %vm1479_vm4, %v2490_v29, 0.0  ;;  %v2156_v57 = vadd.f32 %v2028_v58, %v1708_v43  ;;  %v1779_v16 = vsub.f32 0.0, %v1747_v38 }
 0x393   : > { %3825 = vlog2.f32 %v2029_v48  ;;  %v2531_v27 = vadd.f32 %v2530_v9, %v2529_v47  ;;  %v2010_v45 = vsel %vm5794_vm7, %v2007_v5, %v2004_v12  ;;  %v2503_v20 = vmul.f32 %v5724_v32, %v2319_v51 }
 0x394   : > { %v2051_v54 = vadd.f32 1.0, %v2050_v55  ;;  %v5815_v22 = vadd.f32 %v5755_v31, %v5496_v0  ;;  %v3820_v14 = vpop.eup %3819  ;;  %v2154_v59 = vadd.f32 %v2010_v45, %v1706_v28  ;;  %v2035_v15 = vand.u32 2147483647, %v3816_v37 }
 0x395   : > { %v2532_v33 = vrot.slane %v2531_v27, 4  ;;  %v1837_v43 = vmul.f32 1.442695, %v1779_v16  ;;  %vm5819_vm8 = vcmp.lt.f32.partialorder %v2053_v24, 0.0004427343  ;;  %v2033_v63 = vadd.f32 1.0, %v2032_v35 }
 0x396   : > { %v2056_v49 = vadd.f32 1.0, %v3820_v14  ;;  %v1715_v32 = vmax.f32 %v5782_v8, 0.0  ;;  %v3164_v58 = vadd.f32 -0.6931472, %v2154_v59  ;;  %v2059_v55 = vmul.f32 -0.5, %v3820_v14 }
 0x397   : > { %v2533_v51 = vadd.f32 %v2532_v33, %v2531_v27  ;;  %3827 = vpow2.f32 %v1837_v43  ;;  %v5824_v0 = vadd.f32 -0.6931472, %v2156_v57  ;;  %v2052_v62 = vmul.f32 %v3814_v21, %v2051_v54  ;;  %v5835_v27 = vld [vmem:[%s4476_s27 + $0x38] sm:$0xff]  }
 0x398   : > { %3829 = vlog2.f32 %v2056_v49  ;;  %v1745_v28 = vand.u32 2147483647, %v5815_v22  ;;  %v6466_v38 = vunpack.c.h.bf16 %v6458_v61  ;;  %v2577_v5 = vsel %vm1479_vm4, %v2503_v20, 0.0 }
 0x399   : > { %v3822_v29 = vpop.eup %3821  ;;  %vm5830_vm9 = vcmp.lt.f32.partialorder %v2035_v15, 0.0004427343  ;;  %vm2677_vm10 = vcmask 1041409   ;;  %v2534_v12 = vrot.slane %v2533_v51, 2  ;;  %v2034_v9 = vmul.f32 %v3816_v37, %v2033_v63 }
 0x39a   : > { %v2282_v44 = vmul.f32 %v6466_v38, %v3164_v58  ;;  %v3824_v24 = vpop.eup %3823  ;;  %v2049_v35 = vmul.f32 0.6931472, %v3822_v29  ;;  %v2062_v57 = vand.u32 2147483647, %v3820_v14  ;;  %vm2680_vm11 = vcmask 1042434  }
 0x39b   : > { %v1777_v21 = vsub.f32 0.0, %v1745_v28  ;;  %v2060_v61 = vadd.f32 1.0, %v2059_v55  ;;  %v2038_v45 = vadd.f32 1.0, %v3824_v24  ;;  %v5840_v20 = vadd.f32 %v5755_v31, %v5508_v39 }
 0x39c   : > { %v2320_v16 = vmul.f32 %v5451_v42, %v2282_v44  ;;  %v2535_v54 = vadd.f32 %v2534_v12, %v2533_v51  ;;  %v1713_v59 = vmax.f32 %v5815_v22, 0.0  ;;  %v5845_v37 = vadd.f32 %v5755_v31, %v5518_v53 }
 0x39d   : > { %v1833_v15 = vmul.f32 1.442695, %v1777_v21  ;;  %v3826_v33 = vpop.eup %3825  ;;  %3831 = vlog2.f32 %v2038_v45  ;;  %v2041_v63 = vmul.f32 -0.5, %v3824_v24  ;;  %v3222_v49 = vunpack.c.l.bf16 %v5835_v27 }
 0x39e   : > { %v2504_v43 = vmul.f32 %v5553_v25, %v2320_v16  ;;  %v2055_v58 = vsel %vm5819_vm8, %v2052_v62, %v2049_v35  ;;  %v2031_v39 = vmul.f32 0.6931472, %v3826_v33  ;;  %v2536_v55 = vrot.slane %v2535_v54, 1 }
 0x39f   : > { %3833 = vpow2.f32 %v1833_v15  ;;  %v2061_v28 = vmul.f32 %v3820_v14, %v2060_v61  ;;  %vm5852_vm12 = vcmp.lt.f32.partialorder %v2062_v57, 0.0004427343  ;;  %v1748_v53 = vand.u32 2147483647, %v5840_v20  ;;  %v2406_v15 = vpop.permute.xlu0 %2405 }
 0x3a0   : > { %v2578_v51 = vsel %vm1479_vm4, %v2504_v43, 0.0  ;;  %v2037_v38 = vsel %vm5830_vm9, %v2034_v9, %v2031_v39  ;;  %v2044_v44 = vand.u32 2147483647, %v3824_v24  ;;  %v2537_v47 = vadd.f32 %v2536_v55, %v2535_v54  ;;  %v6473_v39 = vld [vmem:[#allocation29_spill] sm:$0xff] }
 0x3a1   : > { %v5857_v25 = vadd.f32 %v2578_v51, %v2577_v5  ;;  %v3828_v62 = vpop.eup %3827  ;;  %v2159_v12 = vadd.f32 %v2055_v58, %v1711_v41  ;;  %v2157_v14 = vadd.f32 %v2037_v38, %v1709_v1  ;;  %v1780_v35 = vsub.f32 0.0, %v1748_v53 }
 0x3a2   : > { %v2279_v57 = vmul.f32 %v3222_v49, %v5703_v6  ;;  %v3830_v21 = vpop.eup %3829  ;;  %v2042_v16 = vadd.f32 1.0, %v2041_v63  ;;  %v2645_v5 = vmul.f32 %v6445_v3, %v2537_v47  ;;  %v2083_v61 = vadd.f32 1.0, %v3828_v62 }
 0x3a3   : > { %v1746_v48 = vand.u32 2147483647, %v5845_v37  ;;  %v3167_v9 = vadd.f32 -0.6931472, %v2157_v14  ;;  %v2058_v45 = vmul.f32 0.6931472, %v3830_v21  ;;  %v6474_v55 = vunpack.c.l.bf16 %v6473_v39  ;;  %v2440_v14 = vpop.permute.xlu0 %2439 }
 0x3a4   : > { %v1839_v54 = vmul.f32 1.442695, %v1780_v35  ;;  %v2317_v36 = vmul.f32 %v5524_v23, %v2279_v57  ;;  %vm5869_vm13 = vcmp.lt.f32.partialorder %v2044_v44, 0.0004427343  ;;  %v2678_v6 = vsel %vm2677_vm10, %v2676_v30, %v2645_v5  ;;  %v6475_v35 = vld [vmem:[#allocation31_spill] sm:$0xff]  ;;  %v2653_v5 = vld [vmem:[%s6481_s16] sm:$0xff] }
 0x3a5   : > { %3835 = vlog2.f32 %v2083_v61  ;;  %v1716_v13 = vmax.f32 %v5840_v20, 0.0  ;;  %v2064_v1 = vsel %vm5852_vm12, %v2061_v28, %v2058_v45  ;;  %v5882_v33 = vsel %vm2680_vm11, %v2679_v56, %v2678_v6  ;;  %v3872_v61 = vld [vmem:[%s4476_s27 + $0x50] sm:$0xff]   ;;  %v5921_v45 = vld [vmem:[%s4476_s27 + $0x48] sm:$0xff]  }
 0x3a6   : > { %v2086_v43 = vmul.f32 -0.5, %v3828_v62  ;;  %3837 = vpow2.f32 %v1839_v54  ;;  %v5884_v63 = vadd.f32 -0.6931472, %v2159_v12  ;;  %v2043_v49 = vmul.f32 %v3824_v24, %v2042_v16 }
 0x3a7   : > { %v1778_v34 = vsub.f32 0.0, %v1746_v48  ;;  %v2501_v58 = vmul.f32 %v2406_v15, %v2317_v36  ;;  %v3832_v30 = vpop.eup %3831  ;;  %v2285_v51 = vmul.f32 %v6474_v55, %v3167_v9  ;;  %v2160_v28 = vadd.f32 %v2064_v1, %v1712_v50 }
 0x3a8   : > { %v2089_v29 = vand.u32 2147483647, %v3828_v62  ;;  %v1714_v26 = vmax.f32 %v5845_v37, 0.0  ;;  %v2040_v53 = vmul.f32 0.6931472, %v3832_v30  ;;  %v5893_v44 = vadd.f32 %v5755_v31, %v5544_v19 }
 0x3a9   : > { %v3834_v56 = vpop.eup %3833  ;;  %v1835_v38 = vmul.f32 1.442695, %v1778_v34  ;;  %v5897_v24 = vadd.f32 %v5755_v31, %v5548_v60  ;;  %v2087_v47 = vadd.f32 1.0, %v2086_v43  ;;  %v2567_v50 = vsel %vm1479_vm4, %v2501_v58, 0.0 }
 0x3aa   : > { %v2065_v12 = vadd.f32 1.0, %v3834_v56  ;;  %v5905_v57 = vadd.f32 %v5755_v31, %v6475_v35  ;;  %v2046_v19 = vsel %vm5869_vm13, %v2043_v49, %v2040_v53  ;;  %v2068_v21 = vmul.f32 -0.5, %v3834_v56 }
 0x3ab   : > { %3839 = vpow2.f32 %v1835_v38  ;;  %v5910_v60 = vadd.f32 %v2567_v50, %v5736_v17  ;;  %v2158_v16 = vadd.f32 %v2046_v19, %v1710_v11  ;;  %vm5914_vm14 = vcmp.lt.f32.partialorder %v2089_v29, 0.0004427343  ;;  %v2425_v29 = vpop.permute.xlu0 %2424 }
 0x3ac   : > { %3841 = vlog2.f32 %v2065_v12  ;;  %v3235_v48 = vunpack.c.h.bf16 %v3872_v61  ;;  %v2323_v9 = vmul.f32 %v5429_v18, %v2285_v51  ;;  %v5923_v54 = vadd.f32 -0.6931472, %v2160_v28  ;;  %v6478_v51 = vld [vmem:[#allocation32_spill] sm:$0xff] }
 0x3ad   : > { %v3242_v15 = vunpack.c.l.bf16 %v5900_v4  ;;  %v1751_v17 = vand.u32 2147483647, %v5893_v44  ;;  %v1749_v40 = vand.u32 2147483647, %v5897_v24  ;;  %v3168_v11 = vadd.f32 -0.6931472, %v2158_v16 }
 0x3ae   : > { %v2088_v36 = vmul.f32 %v3828_v62, %v2087_v47  ;;  %v2071_v41 = vand.u32 2147483647, %v3834_v56  ;;  %v1752_v6 = vand.u32 2147483647, %v5905_v57  ;;  %v2069_v43 = vadd.f32 1.0, %v2068_v21 }
 0x3af   : > { %v3836_v1 = vpop.eup %3835  ;;  %v1719_v49 = vmax.f32 %v5893_v44, 0.0  ;;  %v1783_v18 = vsub.f32 0.0, %v1751_v17  ;;  %v1781_v34 = vsub.f32 0.0, %v1749_v40  ;;  %v2286_v30 = vmul.f32 %v3235_v48, %v3168_v11 }
 0x3b0   : > { %v3838_v58 = vpop.eup %3837  ;;  %v2507_v39 = vmul.f32 %v5652_v52, %v2323_v9  ;;  %v1784_v55 = vsub.f32 0.0, %v1752_v6  ;;  %v5933_v28 = vadd.f32 %v5755_v31, %v6478_v51  ;;  %v2085_v62 = vmul.f32 0.6931472, %v3836_v1 }
 0x3b1   : > { %v2092_v53 = vadd.f32 1.0, %v3838_v58  ;;  %v1845_v38 = vmul.f32 1.442695, %v1783_v18  ;;  %v3230_v47 = vunpack.c.l.bf16 %v5921_v45  ;;  %vm5936_vm15 = vcmp.lt.f32.partialorder %v2071_v41, 0.0004427343 }
 0x3b2   : > { %v2324_v50 = vmul.f32 %v5451_v42, %v2286_v30  ;;  %v1717_v35 = vmax.f32 %v5897_v24, 0.0  ;;  %v1841_v52 = vmul.f32 1.442695, %v1781_v34  ;;  %v2070_v19 = vmul.f32 %v3834_v56, %v2069_v43  ;;  %v5949_v43 = vpop.permute.xlu0 %2458 }
 0x3b3   : > { %3843 = vlog2.f32 %v2092_v53  ;;  %v1720_v31 = vmax.f32 %v5905_v57, 0.0  ;;  %v1847_v21 = vmul.f32 1.442695, %v1784_v55  ;;  %v2095_v16 = vmul.f32 -0.5, %v3838_v58 }
 0x3b4   : > { %3845 = vpow2.f32 %v1845_v38  ;;  %v2508_v61 = vmul.f32 %v2440_v14, %v2324_v50  ;;  %v1750_v48 = vand.u32 2147483647, %v5933_v28  ;;  %v2091_v17 = vsel %vm5914_vm14, %v2088_v36, %v2085_v62 }
 0x3b5   : > { %v3840_v9 = vpop.eup %3839  ;;  %v2590_v40 = vsel %vm1479_vm4, %v2507_v39, 0.0  ;;  %3847 = vpow2.f32 %v1841_v52  ;;  %v2283_v42 = vmul.f32 %v3230_v47, %v5799_v2  ;;  %v2098_v56 = vand.u32 2147483647, %v3838_v58  ;;  %v2654_v2 = vld [vmem:[%s6481_s16 + $0x8] sm:$0xff] }
 0x3b6   : > { %v3842_v11 = vpop.eup %3841  ;;  %v2074_v41 = vadd.f32 1.0, %v3840_v9  ;;  %v2077_v6 = vmul.f32 -0.5, %v3840_v9  ;;  %v2591_v1 = vsel %vm1479_vm4, %v2508_v61, 0.0  ;;  %3849 = vpow2.f32 %v1847_v21  ;;  %v5984_v61 = vld [vmem:[%s4476_s27 + $0x70] sm:$0xff]  }
 0x3b7   : > { %v2067_v14 = vmul.f32 0.6931472, %v3842_v11  ;;  %v5951_v18 = vadd.f32 %v2591_v1, %v2590_v40  ;;  %v1782_v34 = vsub.f32 0.0, %v1750_v48  ;;  %v2163_v36 = vadd.f32 %v2091_v17, %v1715_v32  ;;  %v2655_v32 = vld [vmem:[%s6481_s16 + $0x10] sm:$0xff] }
 0x3b8   : > { %v2096_v30 = vadd.f32 1.0, %v2095_v16  ;;  %3851 = vlog2.f32 %v2074_v41  ;;  %v2321_v39 = vmul.f32 %v5524_v23, %v2283_v42  ;;  %v2080_v51 = vand.u32 2147483647, %v3840_v9  ;;  %v2656_v23 = vld [vmem:[%s6481_s16 + $0x18] sm:$0xff]  ;;  %v2410_v16 = vpop.permute.xlu0 %2409 }
 0x3b9   : > { %v2073_v55 = vsel %vm5936_vm15, %v2070_v19, %v2067_v14  ;;  %v1843_v62 = vmul.f32 1.442695, %v1782_v34  ;;  %v2078_v38 = vadd.f32 1.0, %v2077_v6  ;;  %v4141_v50 = vmov 0.0|0.0  }
 0x3ba   : > { %v2161_v53 = vadd.f32 %v2073_v55, %v1713_v59  ;;  %v2505_v47 = vmul.f32 %v2425_v29, %v2321_v39  ;;  %3459 = vmatprep.subr.bf16.mxu1 %v4141_v50  ;;  %v3460_v8 = vpack.c.bf16 %v2654_v2, %v2653_v5  ;;  %vm5973_vm0 = vcmp.lt.f32.partialorder %v2098_v56, 0.0004427343  ;;  %3471 = vmatprep.subr.bf16.mxu0 %v4141_v50 }
 0x3bb   : > { %v1718_v22 = vmax.f32 %v5933_v28, 0.0  ;;  %3853 = vpow2.f32 %v1843_v62  ;;  %v3223_v59 = vunpack.c.h.bf16 %v5835_v27  ;;  %v5980_v29 = vadd.f32 -0.6931472, %v2163_v36  ;;  %v3266_v62 = vld [vmem:[%s4476_s27 + $0x58] sm:$0xff]  }
 0x3bc   : > { %v3171_v52 = vadd.f32 -0.6931472, %v2161_v53  ;;  %v2097_v19 = vmul.f32 %v3838_v58, %v2096_v30  ;;  %v2580_v21 = vsel %vm1479_vm4, %v2505_v47, 0.0  ;;  %3461 = vmatpush3.bf16.msra.mxu1 %v3460_v8  ;;  %vm5986_vm1 = vcmp.lt.f32.partialorder %v2080_v51, 0.0004427343  ;;  %v6009_v47 = vpop.permute.xlu0 %2473 }
 0x3bd   : > { %v3844_v48 = vpop.eup %3843  ;;  %v5991_v40 = vadd.f32 %v2580_v21, %v5857_v25  ;;  %v2280_v27 = vmul.f32 %v3223_v59, %v5708_v10  ;;  %3462 = vmatprep.subr.bf16.mxu1 %v4141_v50  ;;  %v3463_v42 = vpack.c.bf16 %v2656_v23, %v2655_v32  ;;  %v2079_v56 = vmul.f32 %v3840_v9, %v2078_v38  ;;  %v6011_v59 = vld [vmem:[#allocation8] sm:$0xff] }
 0x3be   : > { %v3846_v58 = vpop.eup %3845  ;;  %v2094_v11 = vmul.f32 0.6931472, %v3844_v48  ;;  %v3243_v41 = vunpack.c.h.bf16 %v5900_v4  ;;  %v2632_v6 = vrot.slane %v6445_v3, 3  ;;  %v3250_v5 = vunpack.c.l.bf16 %v5984_v61 }
 0x3bf   : > { %v3848_v1 = vpop.eup %3847  ;;  %v2119_v14 = vadd.f32 1.0, %v3846_v58  ;;  %v2122_v34 = vmul.f32 -0.5, %v3846_v58  ;;  %v2633_v25 = vrot.slane %v6445_v3, 4  ;;  %v2289_v10 = vmul.f32 %v3242_v15, %v3171_v52 }
 0x3c0   : > { %v2100_v2 = vsel %vm5973_vm0, %v2097_v19, %v2094_v11  ;;  %v2101_v36 = vadd.f32 1.0, %v3848_v1  ;;  %v2104_v9 = vmul.f32 -0.5, %v3848_v1  ;;  %3464 = vmatpush3.bf16.msra.mxu1 %v3463_v42  ;;  %v3850_v30 = vpop.eup %3849  ;;  %v2125_v39 = vand.u32 2147483647, %v3846_v58 }
 0x3c1   : > { %3855 = vlog2.f32 %v2119_v14  ;;  %v2318_v55 = vmul.f32 %v5566_v46, %v2280_v27  ;;  %v3231_v51 = vunpack.c.h.bf16 %v5921_v45  ;;  %3465 = vmatprep.subr.bf16.mxu1 %v4141_v50  ;;  %v2164_v4 = vadd.f32 %v2100_v2, %v1716_v13 }
 0x3c2   : > { %v3852_v53 = vpop.eup %3851  ;;  %3857 = vlog2.f32 %v2101_v36  ;;  %v2107_v15 = vand.u32 2147483647, %v3848_v1  ;;  %v2128_v38 = vadd.f32 1.0, %v3850_v30  ;;  %v2123_v32 = vadd.f32 1.0, %v2122_v34  ;;  %v2444_v34 = vpop.permute.xlu1 %2443 }
 0x3c3   : > { %v2076_v8 = vmul.f32 0.6931472, %v3852_v53  ;;  %v2105_v23 = vadd.f32 1.0, %v2104_v9  ;;  %v2131_v12 = vmul.f32 -0.5, %v3850_v30  ;;  %v2134_v46 = vand.u32 2147483647, %v3850_v30  ;;  %v2429_v9 = vpop.permute.xlu0 %2428 }
 0x3c4   : > { %3859 = vlog2.f32 %v2128_v38  ;;  %v2327_v45 = vmul.f32 %v6011_v59, %v2289_v10  ;;  %v3238_v52 = vunpack.c.l.bf16 %v3266_v62  ;;  %vm6018_vm2 = vcmp.lt.f32.partialorder %v2125_v39, 0.0004427343  ;;  %v6038_v39 = vld [vmem:[%s4476_s27 + $0x68] sm:$0xff]  }
 0x3c5   : > { %v6014_v19 = vpop.eup %3853  ;;  %v2082_v20 = vsel %vm5986_vm1, %v2079_v56, %v2076_v8  ;;  %v2132_v21 = vadd.f32 1.0, %v2131_v12  ;;  %v2502_v48 = vmul.f32 %v2410_v16, %v2318_v55  ;;  %v2284_v27 = vmul.f32 %v3231_v51, %v5824_v0 }
 0x3c6   : > { %v6023_v42 = vadd.f32 -0.6931472, %v2164_v4  ;;  %v2162_v11 = vadd.f32 %v2082_v20, %v1714_v26  ;;  %vm6027_vm3 = vcmp.lt.f32.partialorder %v2107_v15, 0.0004427343  ;;  %v2110_v17 = vadd.f32 1.0, %v6014_v19 }
 0x3c7   : > { %v2113_v56 = vmul.f32 -0.5, %v6014_v19  ;;  %v2124_v10 = vmul.f32 %v3846_v58, %v2123_v32  ;;  %v2106_v2 = vmul.f32 %v3848_v1, %v2105_v23  ;;  %v2511_v16 = vmul.f32 %v5764_v7, %v2327_v45  ;;  %v6044_v58 = vld [vmem:[#allocation8 + $0x18] sm:$0xff]  ;;  %v6049_v23 = vld [vmem:[#allocation8 + $0x10] sm:$0xff] }
 0x3c8   : > { %v2569_v0 = vsel %vm1479_vm4, %v2502_v48, 0.0  ;;  %v3172_v36 = vadd.f32 -0.6931472, %v2162_v11  ;;  %3861 = vlog2.f32 %v2110_v17  ;;  %v2116_v37 = vand.u32 2147483647, %v6014_v19 }
 0x3c9   : > { %v2570_v26 = vadd.f32 %v2569_v0, %v5910_v60  ;;  %v2133_v55 = vmul.f32 %v3850_v30, %v2132_v21  ;;  %vm6040_vm5 = vcmp.lt.f32.partialorder %v2134_v46, 0.0004427343  ;;  %v2322_v7 = vmul.f32 %v6044_v58, %v2284_v27  ;;  %v6061_v21 = vpop.permute.xlu1 %2477 }
 0x3ca   : > { %v2287_v1 = vmul.f32 %v3238_v52, %v5884_v63  ;;  %v2114_v53 = vadd.f32 1.0, %v2113_v56  ;;  %v2290_v4 = vmul.f32 %v3243_v41, %v3172_v36  ;;  %v3239_v38 = vunpack.c.h.bf16 %v3266_v62  ;;  %v6057_v63 = vld [vmem:[#allocation8 + $0x8] sm:$0xff] }
 0x3cb   : > { %v2571_v15 = vrot.slane %v2570_v26, 4  ;;  %v3856_v8 = vpop.eup %3855  ;;  %v2603_v60 = vsel %vm1479_vm4, %v2511_v16, 0.0  ;;  %v2506_v32 = vmul.f32 %v2429_v9, %v2322_v7  ;;  %v3246_v12 = vunpack.c.l.bf16 %v6038_v39 }
 0x3cc   : > { %v2325_v30 = vmul.f32 %v6049_v23, %v2287_v1  ;;  %v3858_v46 = vpop.eup %3857  ;;  %v2121_v45 = vmul.f32 0.6931472, %v3856_v8  ;;  %vm6053_vm6 = vcmp.lt.f32.partialorder %v2116_v37, 0.0004427343  ;;  %v2328_v41 = vmul.f32 %v6057_v63, %v2290_v4 }
 0x3cd   : > { %v2572_v62 = vadd.f32 %v2571_v15, %v2570_v26  ;;  %v2288_v52 = vmul.f32 %v3239_v38, %v5923_v54  ;;  %v2103_v48 = vmul.f32 0.6931472, %v3858_v46  ;;  %v2582_v27 = vsel %vm1479_vm4, %v2506_v32, 0.0  ;;  %v2448_v15 = vpop.permute.xlu0 %2447  ;;  %v3270_v32 = vld [vmem:[%s4476_s27 + $0x78] sm:$0xff]   ;;  %s4055_s27 = sshll.u32 %s4144_s25, 4  ;;  %s4056_s27 = int_to_ptr.vmem [resolvable:$false] %s4055_s27 }
 0x3ce   : > { %v2509_v11 = vmul.f32 %v2444_v34, %v2325_v30  ;;  %v2291_v17 = vmul.f32 %v3246_v12, %v5980_v29  ;;  %v3860_v56 = vpop.eup %3859  ;;  %v2127_v16 = vsel %vm6018_vm2, %v2124_v10, %v2121_v45  ;;  %v2512_v0 = vmul.f32 %v5949_v43, %v2328_v41  ;;  %s4057_s7 = scalar_lea.vmem %s4056_s27, 256  ;;  %p4058_p9 = scmp.lt.s32.totalorder %s6170_s1, %s4056_s27 }
 0x3cf   : > { %v2573_v36 = vrot.slane %v2572_v62, 2  ;;  %v2583_v37 = vadd.f32 %v2582_v27, %v5991_v40  ;;  %v2167_v54 = vadd.f32 %v2127_v16, %v1719_v49  ;;  %v2109_v26 = vsel %vm6027_vm3, %v2106_v2, %v2103_v48  ;;  %v2657_v48 = vld [vmem:[%s6481_s16 + $0x20] sm:$0xff]  ;;  %p4059_p10 = scmp.lt.s32.totalorder %s4057_s7, %s4051_s21 }
 0x3d0   : > { %v2130_v9 = vmul.f32 0.6931472, %v3860_v56  ;;  %vm2683_vm7 = vcmask 1043459   ;;  %v2593_v34 = vsel %vm1479_vm4, %v2509_v11, 0.0  ;;  %v2165_v29 = vadd.f32 %v2109_v26, %v1717_v35  ;;  %v2463_v35 = vpop.permute.xlu1 %2462  ;;  %v2659_v26 = vld [vmem:[%s6481_s16 + $0x30] sm:$0xff] }
 0x3d1   : > { %v2604_v13 = vsel %vm1479_vm4, %v2512_v0, 0.0  ;;  %v2574_v10 = vadd.f32 %v2573_v36, %v2572_v62  ;;  %v2584_v43 = vrot.slane %v2583_v37, 4  ;;  %v2115_v44 = vmul.f32 %v6014_v19, %v2114_v53  ;;  %v2467_v11 = vpop.permute.xlu0 %2466  ;;  %p4060_p4 = por %p4059_p10, %p4058_p9 }
 0x3d2   : > { %v2136_v40 = vsel %vm6040_vm5, %v2133_v55, %v2130_v9  ;;  %v2605_v49 = vadd.f32 %v2604_v13, %v2603_v60  ;;  %v2594_v14 = vadd.f32 %v2593_v34, %v5951_v18  ;;  %v3862_v2 = vpop.eup %3861  ;;  %v3175_v7 = vadd.f32 -0.6931472, %v2165_v29  ;;  %v2660_v9 = vld [vmem:[%s6481_s16 + $0x38] sm:$0xff] }
 0x3d3   : > { %v2575_v1 = vrot.slane %v2574_v10, 1  ;;  %v2585_v4 = vadd.f32 %v2584_v43, %v2583_v37  ;;  %v3251_v24 = vunpack.c.h.bf16 %v5984_v61  ;;  %v2168_v38 = vadd.f32 %v2136_v40, %v1720_v31  ;;  %p4061_p5 = pnand %p4060_p4, %p4054_p6 }
 0x3d4   : > { %v2112_v8 = vmul.f32 0.6931472, %v3862_v2  ;;  %v2326_v55 = vmul.f32 %v6044_v58, %v2288_v52  ;;  %v2329_v19 = vmul.f32 %v6049_v23, %v2291_v17  ;;  %v3177_v51 = vadd.f32 -0.6931472, %v2167_v54 }
 0x3d5   : > { %v2576_v53 = vadd.f32 %v2575_v1, %v2574_v10  ;;  %v2293_v18 = vmul.f32 %v3250_v5, %v3175_v7  ;;  %v2586_v60 = vrot.slane %v2585_v4, 2  ;;  %v3247_v57 = vunpack.c.h.bf16 %v6038_v39 }
 0x3d6   : > { %v2118_v30 = vsel %vm6053_vm6, %v2115_v44, %v2112_v8  ;;  %v2510_v12 = vmul.f32 %v2448_v15, %v2326_v55  ;;  %v2513_v46 = vmul.f32 %v2463_v35, %v2329_v19  ;;  %v3178_v61 = vadd.f32 -0.6931472, %v2168_v38  ;;  %v2786_v8 = vld [vmem:[%s6494_s10 + $0x8] sm:$0xff] }
 0x3d7   : > { %v2166_v31 = vadd.f32 %v2118_v30, %v1718_v22  ;;  %v2648_v45 = vmul.f32 %v2632_v6, %v2576_v53  ;;  %v2331_v41 = vmul.f32 %v6011_v59, %v2293_v18  ;;  %v2587_v62 = vadd.f32 %v2586_v60, %v2585_v4  ;;  %v2658_v6 = vld [vmem:[%s6481_s16 + $0x28] sm:$0xff]  ;;  %v2787_v60 = vld [vmem:[%s6494_s10 + $0x10] sm:$0xff] }
 0x3d8   : > { %v2595_v5 = vsel %vm1479_vm4, %v2510_v12, 0.0  ;;  %v2292_v52 = vmul.f32 %v3247_v57, %v6023_v42  ;;  %v3254_v20 = vunpack.c.l.bf16 %v3270_v32  ;;  %v2606_v22 = vsel %vm1479_vm4, %v2513_v46, 0.0  ;;  %v2482_v42 = vpop.permute.xlu1 %2481 }
 0x3d9   : > { %v3176_v39 = vadd.f32 -0.6931472, %v2166_v31  ;;  %v2682_v27 = vrot.slane %v2648_v45, 5  ;;  %v2588_v28 = vrot.slane %v2587_v62, 1  ;;  %v2596_v59 = vadd.f32 %v2595_v5, %v2594_v14 }
 0x3da   : > { %v2607_v17 = vadd.f32 %v2606_v22, %v2605_v49  ;;  %v2330_v56 = vmul.f32 %v6044_v58, %v2292_v52  ;;  %v2295_v16 = vmul.f32 %v3254_v20, %v3177_v51  ;;  %v2515_v36 = vmul.f32 %v6009_v47, %v2331_v41 }
 0x3db   : > { %v2684_v0 = vsel %vm2683_vm7, %v2682_v27, %v5882_v33  ;;  %v2589_v37 = vadd.f32 %v2588_v28, %v2587_v62  ;;  %v2294_v54 = vmul.f32 %v3251_v24, %v3176_v39  ;;  %v2597_v34 = vrot.slane %v2596_v59, 4 }
 0x3dc   : > { %v2514_v29 = vmul.f32 %v2467_v11, %v2330_v56  ;;  %v2333_v13 = vmul.f32 %v6049_v23, %v2295_v16  ;;  %v3466_v10 = vpack.c.bf16 %v2658_v6, %v2657_v48  ;;  %v3255_v43 = vunpack.c.h.bf16 %v3270_v32  ;;  %v2788_v32 = vld [vmem:[%s6494_s10 + $0x18] sm:$0xff] }
 0x3dd   : > { %v2649_v33 = vmul.f32 %v2633_v25, %v2589_v37  ;;  %v2332_v47 = vmul.f32 %v6057_v63, %v2294_v54  ;;  %v2598_v40 = vadd.f32 %v2597_v34, %v2596_v59  ;;  %v3469_v14 = vpack.c.bf16 %v2660_v9, %v2659_v26  ;;  %v2486_v25 = vpop.permute.xlu1 %2485  ;;  %v2789_v9 = vld [vmem:[%s6494_s10 + $0x20] sm:$0xff]  ;;  %v2790_v34 = vld [vmem:[%s6494_s10 + $0x28] sm:$0xff] }
 0x3de   : > { %v2608_v44 = vsel %vm1479_vm4, %v2514_v29, 0.0  ;;  %v2517_v49 = vmul.f32 %v2482_v42, %v2333_v13  ;;  %3467 = vmatpush3.bf16.msra.mxu1 %v3466_v10  ;;  %v2296_v4 = vmul.f32 %v3255_v43, %v3178_v61  ;;  %v2616_v23 = vsel %vm1479_vm4, %v2515_v36, 0.0  ;;  %v2791_v29 = vld [vmem:[%s6494_s10 + $0x30] sm:$0xff]  ;;  %v2792_v13 = vld [vmem:[%s6494_s10 + $0x38] sm:$0xff] }
 0x3df   : > { %v2685_v2 = vrot.slane %v2649_v33, 4  ;;  %v2516_v7 = vmul.f32 %v6061_v21, %v2332_v47  ;;  %v2609_v1 = vadd.f32 %v2608_v44, %v2607_v17  ;;  %3468 = vmatprep.subr.bf16.mxu1 %v4141_v50  ;;  %v2599_v15 = vrot.slane %v2598_v40, 2  ;;  %v2785_v21 = vld [vmem:[%s6494_s10] sm:$0xff]  ;;  %v3179_v33 = vld [vmem:[#allocation11] ss:$0 sm:$0xff] }
 0x3e0   : > { %v2334_v35 = vmul.f32 %v6044_v58, %v2296_v4  ;;  %vm4142_vm8 = vmmov 0   ;;  %v4143_v38 = vmov 0.0   ;;  %vm2686_vm9 = vcmask 1044484  }
 0x3e1   : > { %v2617_v63 = vsel %vm1479_vm4, %v2516_v7, 0.0  ;;  %v2610_v24 = vrot.slane %v2609_v1, 4  ;;  %3437 = vmatprep.mubr.msk.f32.mxu1 %vm4142_vm8, %v4143_v38  ;;  %3456 = vmatprep.mubr.msk.f32.mxu0 %vm4142_vm8, %v4143_v38  ;;  %v2600_v55 = vadd.f32 %v2599_v15, %v2598_v40  ;;  %v2687_v51 = vsel %vm2686_vm9, %v2685_v2, %v2684_v0 }
 0x3e2   : > { %v2618_v19 = vadd.f32 %v2617_v63, %v2616_v23  ;;  %3470 = vmatpush3.bf16.msra.mxu1 %v3469_v14  ;;  %v2619_v58 = vsel %vm1479_vm4, %v2517_v49, 0.0  ;;  %v2518_v18 = vmul.f32 %v2486_v25, %v2334_v35  ;;  %v3472_v46 = vpack.c.bf16 %v2786_v8, %v2785_v21  ;;  %v3182_v21 = vld [vmem:[%s6495_s11] ss:$0 sm:$0xff] }
 0x3e3   : > { %v2611_v53 = vadd.f32 %v2610_v24, %v2609_v1  ;;  %v2601_v30 = vrot.slane %v2600_v55, 1  ;;  %v2634_v45 = vrot.slane %v6445_v3, 5  ;;  %v3475_v61 = vpack.c.bf16 %v2788_v32, %v2787_v60 }
 0x3e4   : > { %v2620_v12 = vadd.f32 %v2619_v58, %v2618_v19  ;;  %v2621_v31 = vsel %vm1479_vm4, %v2518_v18, 0.0  ;;  %3473 = vmatpush3.bf16.msra.mxu0 %v3472_v46  ;;  %vm2689_vm10 = vcmask 1045509   ;;  %v2635_v28 = vrot.slane %v6445_v3, 6 }
 0x3e5   : > { %v2612_v57 = vrot.slane %v2611_v53, 2  ;;  %v2602_v41 = vadd.f32 %v2601_v30, %v2600_v55  ;;  %3474 = vmatprep.subr.bf16.mxu0 %v4141_v50  ;;  %vm2692_vm11 = vcmask 1046534   ;;  %v2636_v0 = vrot.slane %v6445_v3, 7 }
 0x3e6   : > { %v2622_v62 = vadd.f32 %v2621_v31, %v2620_v12  ;;  %vm2695_vm12 = vcmask 1047559   ;;  %v3478_v3 = vpack.c.bf16 %v2790_v34, %v2789_v9  ;;  %v3481_v10 = vpack.c.bf16 %v2792_v13, %v2791_v29 }
 0x3e7   : > { %v2613_v5 = vadd.f32 %v2612_v57, %v2611_v53  ;;  %v2650_v52 = vmul.f32 %v2634_v45, %v2602_v41 }
 0x3e8   : > { %v2623_v20 = vrot.slane %v2622_v62, 4  ;;  %3476 = vmatpush3.bf16.msra.mxu0 %v3475_v61 }
 0x3e9   : > { %v2614_v48 = vrot.slane %v2613_v5, 1  ;;  %v2688_v39 = vrot.slane %v2650_v52, 3  ;;  %3477 = vmatprep.subr.bf16.mxu0 %v4141_v50 }
 0x3ea   : > { %v2624_v27 = vadd.f32 %v2623_v20, %v2622_v62 }
 0x3eb   : > { %v2615_v22 = vadd.f32 %v2614_v48, %v2613_v5  ;;  %v2690_v6 = vsel %vm2689_vm10, %v2688_v39, %v2687_v51 }
 0x3ec   : > { %v2625_v11 = vrot.slane %v2624_v27, 2  ;;  %3479 = vmatpush3.bf16.msra.mxu0 %v3478_v3 }
 0x3ed   : > { %v2651_v59 = vmul.f32 %v2635_v28, %v2615_v22  ;;  %3480 = vmatprep.subr.bf16.mxu0 %v4141_v50 }
 0x3ee   : > { %v2626_v17 = vadd.f32 %v2625_v11, %v2624_v27 }
 0x3ef   : > { %v2691_v56 = vrot.slane %v2651_v59, 2 }
 0x3f0   : > { %v2627_v42 = vrot.slane %v2626_v17, 1  ;;  %3482 = vmatpush3.bf16.msra.mxu0 %v3481_v10 }
 0x3f1   : > { %v2693_v16 = vsel %vm2692_vm11, %v2691_v56, %v2690_v6 }
 0x3f2   : > { %v2628_v36 = vadd.f32 %v2627_v42, %v2626_v17 }
 0x3f4   : > { %v2652_v37 = vmul.f32 %v2636_v0, %v2628_v36 }
 0x3f6   : > { %v2694_v54 = vrot.slane %v2652_v37, 1 }
 0x3f8   : > { %v2696_v26 = vsel %vm2695_vm12, %v2694_v54, %v2693_v16 }
 0x3f9   : > { %3438 = vmatmul.mubr.msk.f32.vlgmr.msra.gmra.mrb[32].mxu1 %vm1479_vm4, %v2696_v26 }
 0x4cc   : > { %v2765_v47 = vpop.f32.mrb[32].mxu1 }
 0x4cd   : > { %v2766_v43 = vadd.f32 %v3179_v33, %v2765_v47  ;;  %v3439_v40 = vpop.f32.mrb[33].mxu1 }
 0x4cf   : > { %v2770_v44 = vand.u32 2147483647, %v2766_v43  ;;  %v2769_v24 = vmax.f32 %v2766_v43, 0.0 }
 0x4d1   : > { %v2771_v49 = vsub.f32 0.0, %v2770_v44 }
 0x4d3   : > { %v2772_v14 = vmul.f32 1.442695, %v2771_v49 }
 0x4d5   : > { %3863 = vpow2.f32 %v2772_v14 }
 0x4df   : > { %v3864_v2 = vpop.eup %3863 }
 0x4e0   : > { %v2774_v7 = vadd.f32 1.0, %v3864_v2  ;;  %v2777_v1 = vmul.f32 -0.5, %v3864_v2  ;;  %v2780_v23 = vand.u32 2147483647, %v3864_v2 }
 0x4e2   : > { %3865 = vlog2.f32 %v2774_v7  ;;  %v2778_v4 = vadd.f32 1.0, %v2777_v1  ;;  %vm2781_vm13 = vcmp.lt.f32.partialorder %v2780_v23, 0.0004427343 }
 0x4e4   : > { %v2779_v63 = vmul.f32 %v3864_v2, %v2778_v4 }
 0x4ec   : > { %v3866_v15 = vpop.eup %3865 }
 0x4ed   : > { %v2776_v25 = vmul.f32 0.6931472, %v3866_v15 }
 0x4ef   : > { %v2782_v50 = vsel %vm2781_vm13, %v2779_v63, %v2776_v25 }
 0x4f0   : > { %v2783_v35 = vadd.f32 %v2782_v50, %v2769_v24 }
 0x4f2   : > { %v3181_v38 = vadd.f32 -0.6931472, %v2783_v35 }
 0x4f4   : > { %3457 = vmatmul.mubr.msk.f32.vlgmr.msra.gmra.mrb[32].mxu0 %vm1479_vm4, %v3181_v38 }
 0x5c7   : > { %v2869_v8 = vpop.f32.mrb[32].mxu0 }
 0x5c8   : > { %v2870_v55 = vadd.f32 %v3182_v21, %v2869_v8  ;;  %v3458_v19 = vpop.f32.mrb[33].mxu0 }
 0x5ca   : > { %v2874_v51 = vand.u32 2147483647, %v2870_v55  ;;  %v2873_v45 = vmax.f32 %v2870_v55, 0.0 }
 0x5cc   : > { %v2875_v53 = vsub.f32 0.0, %v2874_v51 }
 0x5ce   : > { %v2876_v58 = vmul.f32 1.442695, %v2875_v53 }
 0x5d0   : > { %3867 = vpow2.f32 %v2876_v58 }
 0x5da   : > { %v3868_v18 = vpop.eup %3867 }
 0x5db   : > { %v2878_v60 = vadd.f32 1.0, %v3868_v18  ;;  %v2881_v32 = vmul.f32 -0.5, %v3868_v18  ;;  %v2884_v12 = vand.u32 2147483647, %v3868_v18 }
 0x5dd   : > { %3869 = vlog2.f32 %v2878_v60  ;;  %v2882_v30 = vadd.f32 1.0, %v2881_v32  ;;  %vm2885_vm14 = vcmp.lt.f32.partialorder %v2884_v12, 0.0004427343 }
 0x5df   : > { %v2883_v31 = vmul.f32 %v3868_v18, %v2882_v30 }
 0x5e7   : > { %v3870_v46 = vpop.eup %3869 }
 0x5e8   : > { %v2880_v57 = vmul.f32 0.6931472, %v3870_v46 }
 0x5ea   : > { %v2886_v41 = vsel %vm2885_vm14, %v2883_v31, %v2880_v57 }
 0x5eb   : > { %v2887_v62 = vadd.f32 %v2886_v41, %v2873_v45 }
 0x5ed   : > { %v3184_v61 = vadd.f32 -0.6931472, %v2887_v62 }
 0x5ef   : > { %2889 = vst.msk [vmem:[%s548_s30] sm:$0xff] %vm1479_vm4, %v3184_v61 }
 0x5f0   : > { %4064 = shalt.err (!%p4061_p5)
}
 0x5f1   : > { %s4065_s28 = scalar_lea.hbm %s6168_s26, 128  ;;  %s4069_s19 = scalar_lea.hbm %s6497_s8, 512 }
 0x5f2   : > { %p4066_p1 = scmp.ne.s32.totalorder %s6168_s26, %s4065_s28  ;;  %p4070_p11 = scmp.lt.u32.totalorder %s6168_s26, %s6497_s8 }
 0x5f3   : > { %p4071_p13 = scmp.lt.u32.totalorder %s4069_s19, %s4065_s28  ;;  %p4073_p8 = scmp.lt.u32.totalorder %s4065_s28, %s6168_s26 }
 0x5f4   : > { %p4067_p7 = pnand %p4066_p1, %p6498_p12 }
 0x5f5   : > { %p4072_p3 = por %p4071_p13, %p4070_p11 }
 0x5f6   : > { %p4068_p0 = pneg %p4067_p7 }
 0x5f7   : > { %p4074_p2 = por %p4073_p8, %p4072_p3 }
 0x5f9   : > { %p4075_p6 = pnand %p4074_p2, %p4068_p0 }
 0x5fb   : > { %4078 = shalt.err (!%p4075_p6)
}
 0x5fc   : > { %3501 = dma.vmem_to_hbm [thread:$0]  (%p6498_p12), %s6170_s1, 128, %s6168_s26, %s2891_s29  }
 0x5fd PF: > { %s6499_s11 = sld [smem:[#allocation19_spill]]  ;;  %s6500_s20 = sld [smem:[#allocation24_spill]] }
 0x5fe   : > { %p3534_p9 = scmp.ge.s32.totalorder %s4129_s24, 2 }
 0x603   : > { %s2916_s14 = sand.u32 1, %s6499_s11   ;;  %p6501_p10 = scmp.ne.s32.totalorder %s6500_s20, 0 }
 0x604   : > { %s2917_s30 = scalar_lea.sflag [#allocation4], %s2916_s14 }
 0x605   : > { %p3524_p4 = pnand %p3534_p9, %p6501_p10 }
 0x607   : > { %4112 = dma.done.wait (!%p3524_p4), %s2917_s30, 128  }
 0x608   : > { %4114 = vsyncadd (!%p3524_p4), %s2917_s30, 4294967168  ;;  %s6502_s24 = sld [smem:[#allocation21_spill]]  ;;  %s6503_s3 = sld [smem:[#allocation20_spill]] }
 0x609   : > { %s6504_s23 = sld [smem:[#allocation22_spill]]  ;;  %s6505_s21 = smov %s4121_s22 }
 0x60e   : > { %p30_p5 = scmp.ge.s32.totalorder %s6502_s24, 6   ;;  %s6506_s22 = smov %s6503_s3 }
 0x610   :  { %32 = sbr.rel (!%p30_p5) target bundleno = 18 (0x12), region = 149 }
 0x617   :  { %2922 = vsyncpa [#allocation3], 1 }
 0x618   :  { %2924 = vsyncpa [#allocation3 + $0x1], 1 }
 0x619   :  { %2925 = vsyncpa [#allocation6], 1 }
 0x61a   :  { %2927 = vsyncpa [#allocation6 + $0x1], 1 }
 0x61b   :  { %2928 = vsyncpa [#allocation9], 1 }
 0x61c   :  { %2929 = vsyncpa [#allocation12], 1 }
 0x61d   :  { %2930 = vsyncpa [#allocation4], 1 }
 0x61e   :  { %2932 = vsyncpa [#allocation4 + $0x1], 1 }

</bundles_post_ra>
